<compile_context>
chip_gen: v7x
topology: tpu7x:2x2x1
jax: 0.10.0
libtpu: 0.0.40
codegen_flags: <defaults>
</compile_context>

<pallas_src>
import functools

import jax
import jax.numpy as jnp
from jax.experimental import pallas as pl
from jax.experimental.pallas import tpu as pltpu


# ---------------------------------------------------------------------------
# Pallas kernels
# ---------------------------------------------------------------------------
def _matmul_bias_act_kernel(p_ref, w_ref, b_ref, o_ref, acc_ref, *, leaky):
    """M-tiled conv matmul (no InstanceNorm); bias (+ LeakyReLU) epilogue.

    p_ref:   (tm, tk)  bf16   im2col rows (samples folded into M)
    w_ref:   (tk, tn)  bf16   weight tile
    b_ref:   (1, tn)   f32    bias tile
    o_ref:   (tm, tn)  bf16/f32 output tile (K-resident)
    acc_ref: (tm, tn)  f32    small VMEM accumulator
    """
    k = pl.program_id(2)

    @pl.when(k == 0)
    def _():
        acc_ref[...] = jnp.zeros_like(acc_ref)

    acc_ref[...] += jnp.dot(p_ref[...], w_ref[...],
                            preferred_element_type=jnp.float32)

    @pl.when(k == pl.num_programs(2) - 1)
    def _():
        y = acc_ref[...] + b_ref[...]
        if leaky:
            y = jnp.where(y >= 0.0, y, 0.2 * y)
        o_ref[...] = y.astype(o_ref.dtype)


def _matmul_in_lrelu_kernel(p_ref, w_ref, b_ref, o_ref, acc_ref):
    """Per-sample conv matmul with fused bias + InstanceNorm2d + LeakyReLU(0.2).

    p_ref:   (1, OHW, tk)  bf16
    w_ref:   (tk, tn)      bf16
    b_ref:   (1, tn)       f32
    o_ref:   (1, OHW, tn)  bf16   (K-resident; covers all spatial rows of one sample)
    acc_ref: (OHW, tn)     f32    accumulator needed for IN statistics
    """
    k = pl.program_id(2)

    @pl.when(k == 0)
    def _():
        acc_ref[...] = jnp.zeros_like(acc_ref)

    acc_ref[...] += jnp.dot(p_ref[0], w_ref[...],
                            preferred_element_type=jnp.float32)

    @pl.when(k == pl.num_programs(2) - 1)
    def _():
        y = acc_ref[...] + b_ref[...]
        # InstanceNorm2d (affine=False, eps=1e-5, biased variance) over spatial axis.
        # NOTE: zero-padded cout columns give var=0 -> 0*rsqrt(eps)=0 (finite, benign;
        # they are sliced off in the wrapper).
        mean = jnp.mean(y, axis=0, keepdims=True)
        cent = y - mean
        var = jnp.mean(cent * cent, axis=0, keepdims=True)
        y = cent * jax.lax.rsqrt(var + 1e-5)
        y = jnp.where(y >= 0.0, y, 0.2 * y)
        o_ref[0] = y.astype(o_ref.dtype)


# ---------------------------------------------------------------------------
# JAX glue
# ---------------------------------------------------------------------------
def _round_up(x, m):
    return (x + m - 1) // m * m


def _im2col(x, k, stride, pad):
    """x: (N, H, W, C) bf16; pad = ((top, bottom), (left, right)).

    Returns (N, OH*OW, k*k*C) patches ordered (kh, kw, cin) on the last axis.
    """
    x = jnp.pad(x, ((0, 0), pad[0], pad[1], (0, 0)))
    N, H, W, C = x.shape
    OH = (H - k) // stride + 1
    OW = (W - k) // stride + 1
    cols = []
    for i in range(k):
        for j in range(k):
            cols.append(x[:, i:i + stride * OH:stride, j:j + stride * OW:stride, :])
    p = jnp.stack(cols, axis=3)  # (N, OH, OW, k*k, C)
    return p.reshape(N, OH * OW, k * k * C), (N, OH, OW)


def _conv2d_fused(x, w, b, *, stride, pad, leaky, instance_norm, out_dtype):
    """Conv2d (+ optional InstanceNorm2d + LeakyReLU(0.2)) via a Pallas MXU matmul.

    x: NHWC (f32 or bf16); w: (Cout, Cin, KH, KW) PyTorch layout; b: (Cout,).
    """
    cout, cin, kh, kw = w.shape

    # im2col in bf16 (f32 accumulation inside the kernel keeps numerics close
    # to the f32 PyTorch reference; ~1e-2 relative drift is expected).
    patches, (N, OH, OW) = _im2col(x.astype(jnp.bfloat16), kh, stride, pad)
    OHW = OH * OW
    K = kh * kw * cin
    cout_pad = _round_up(cout, 128)

    # Weight / bias: (kh, kw, cin, cout) -> (K, cout_pad), bf16 / f32.
    w2 = jnp.transpose(w, (2, 3, 1, 0)).reshape(K, cout)
    w2 = jnp.pad(w2, ((0, 0), (0, cout_pad - cout))).astype(jnp.bfloat16)
    b2 = jnp.pad(b, (0, cout_pad - cout)).reshape(1, cout_pad).astype(jnp.float32)

    # K tiling: keep K unpadded.  Layer 1 (K = 16*Cin, not a multiple of 128)
    # uses a single full-extent K block -- no zero-column inflation.
    if K % 128 == 0:
        tk = 512 if K % 512 == 0 else (256 if K % 256 == 0 else 128)
        if instance_norm and OHW >= 4096:
            tk = min(tk, 256)  # keep double-buffered patch blocks small (v5e 16 MiB)
    else:
        tk = K
    k_steps = K // tk

    # cout tiling: 256-wide tiles for the 256/512-channel layers (v6e/v7x MXU
    # is 2x256^2; also halves the im2col re-read across cout tiles).
    tn = 256 if cout_pad % 256 == 0 else 128
    out_bytes = jnp.dtype(out_dtype).itemsize

    if instance_norm:
        # Per-sample resident OHW: needed so IN statistics are computed on the
        # f32 accumulator without an extra HBM round trip.
        grid = (N, cout_pad // tn, k_steps)
        cost = pl.CostEstimate(
            flops=2 * N * OHW * K * cout_pad,
            transcendentals=0,
            bytes_accessed=(N * OHW * K * 2 * (cout_pad // tn)
                            + K * cout_pad * 2 * N
                            + N * OHW * cout_pad * out_bytes),
        )
        out = pl.pallas_call(
            _matmul_in_lrelu_kernel,
            out_shape=jax.ShapeDtypeStruct((N, OHW, cout_pad), out_dtype),
            grid=grid,
            in_specs=[
                pl.BlockSpec((1, OHW, tk), lambda n, j, k: (n, 0, k)),
                pl.BlockSpec((tk, tn), lambda n, j, k: (k, j)),
                pl.BlockSpec((1, tn), lambda n, j, k: (0, j)),
            ],
            out_specs=pl.BlockSpec((1, OHW, tn), lambda n, j, k: (n, 0, j)),
            scratch_shapes=[pltpu.VMEM((OHW, tn), jnp.float32)],
            compiler_params=pltpu.CompilerParams(
                dimension_semantics=("parallel", "parallel", "arbitrary")),
            cost_estimate=cost,
        )(patches, w2, b2)
        out = out[:, :, :cout]
        return out.reshape(N, OH, OW, cout)

    # No InstanceNorm: fold N into M and tile the spatial axis (small f32 acc,
    # fits scoped VMEM on all generations at real resolutions; gives the MXU a
    # non-trivial M for the tiny final conv).
    M = N * OHW
    p2 = patches.reshape(M, K)
    tm = min(512, _round_up(M, 8))
    M_pad = _round_up(M, tm)
    if M_pad != M:
        p2 = jnp.pad(p2, ((0, M_pad - M), (0, 0)))

    grid = (M_pad // tm, cout_pad // tn, k_steps)
    cost = pl.CostEstimate(
        flops=2 * M_pad * K * cout_pad,
        transcendentals=0,
        bytes_accessed=(M_pad * K * 2 * (cout_pad // tn)
                        + K * cout_pad * 2 * (M_pad // tm)
                        + M_pad * cout_pad * out_bytes),
    )
    out = pl.pallas_call(
        functools.partial(_matmul_bias_act_kernel, leaky=leaky),
        out_shape=jax.ShapeDtypeStruct((M_pad, cout_pad), out_dtype),
        grid=grid,
        in_specs=[
            pl.BlockSpec((tm, tk), lambda i, j, k: (i, k)),
            pl.BlockSpec((tk, tn), lambda i, j, k: (k, j)),
            pl.BlockSpec((1, tn), lambda i, j, k: (0, j)),
        ],
        out_specs=pl.BlockSpec((tm, tn), lambda i, j, k: (i, j)),
        scratch_shapes=[pltpu.VMEM((tm, tn), jnp.float32)],
        compiler_params=pltpu.CompilerParams(
            dimension_semantics=("parallel", "parallel", "arbitrary")),
        cost_estimate=cost,
    )(p2, w2, b2)
    out = out[:M, :cout]
    return out.reshape(N, OH, OW, cout)


# ---------------------------------------------------------------------------
# DiscriminatorResnet forward
# ---------------------------------------------------------------------------
def init_params(key, channels):
    """Deterministic synthetic parameters (PyTorch conv weight layout)."""
    dims = [(channels, 64), (64, 128), (128, 256), (256, 512)]
    params = []
    for cin, cout in dims:
        key, k1, k2 = jax.random.split(key, 3)
        w = 0.05 * jax.random.normal(k1, (cout, cin, 4, 4), jnp.float32)
        b = 0.01 * jax.random.normal(k2, (cout,), jnp.float32)
        params.append((w, b))
    key, k1, k2 = jax.random.split(key, 3)
    wf = 0.05 * jax.random.normal(k1, (1, 512, 4, 4), jnp.float32)
    bf = 0.01 * jax.random.normal(k2, (1,), jnp.float32)
    params.append((wf, bf))
    return params


def discriminator_resnet_forward(img_nchw, params):
    # NCHW (PyTorch) -> NHWC (kernel layout)
    x = jnp.transpose(img_nchw, (0, 2, 3, 1)).astype(jnp.float32)

    # Block 1: Conv(C,64,k4,s2,p1) + LeakyReLU(0.2)  (no normalization, M-tiled, bf16 out)
    w, b = params[0]
    x = _conv2d_fused(x, w, b, stride=2, pad=((1, 1), (1, 1)),
                      leaky=True, instance_norm=False, out_dtype=jnp.bfloat16)

    # Blocks 2-4: Conv(k4,s2,p1) -> InstanceNorm2d -> LeakyReLU(0.2), fully fused, bf16 out.
    for w, b in params[1:4]:
        x = _conv2d_fused(x, w, b, stride=2, pad=((1, 1), (1, 1)),
                          leaky=True, instance_norm=True, out_dtype=jnp.bfloat16)

    # ZeroPad2d((left=1, right=0, top=1, bottom=0)) then Conv(512,1,k4,p1):
    # fold both paddings: ((top=2, bottom=1), (left=2, right=1)).  f32 output.
    w, b = params[4]
    x = _conv2d_fused(x, w, b, stride=1, pad=((2, 1), (2, 1)),
                      leaky=False, instance_norm=False, out_dtype=jnp.float32)

    # NHWC -> NCHW: (N, 1, H//16, W//16)
    return jnp.transpose(x, (0, 3, 1, 2))


if __name__ == "__main__":
    key = jax.random.PRNGKey(0)
    kx, kp = jax.random.split(key)

    N, C, H, W = 2, 3, 32, 32
    x = jax.random.normal(kx, (N, C, H, W), jnp.float32)
    params = init_params(kp, C)

    fwd = jax.jit(discriminator_resnet_forward)
    out = jax.block_until_ready(fwd(x, params))

    expected = (N, 1, H // 16, W // 16)
    assert out.shape == expected, (out.shape, expected)
    assert out.dtype == jnp.float32
    assert bool(jnp.all(jnp.isfinite(out)))
    print("KERNEL_OK")
</pallas_src>

<mosaic_0001>
module attributes {stable_mosaic.version = 11 : i64} {
  func.func @_matmul_bias_act_kernel(%arg0: i32, %arg1: i32, %arg2: i32, %arg3: memref<512x48xbf16, #tpu.memory_space<vmem>>, %arg4: memref<48x128xbf16, #tpu.memory_space<vmem>>, %arg5: memref<1x128xf32, #tpu.memory_space<vmem>>, %arg6: memref<512x128xbf16, #tpu.memory_space<vmem>>, %arg7: memref<512x128xf32, #tpu.memory_space<vmem>>) attributes {dimension_semantics = [#tpu.dimension_semantics<parallel>, #tpu.dimension_semantics<parallel>, #tpu.dimension_semantics<arbitrary>], iteration_bounds = array<i64: 1, 1, 1>, scalar_prefetch = 0 : i64, scratch_operands = 1 : i64, tpu.core_type = #tpu.core_type<tc>, window_params = [{transform_indices = @transform_0, window_bounds = array<i64: 512, 48>}, {transform_indices = @transform_1, window_bounds = array<i64: 48, 128>}, {transform_indices = @transform_2, window_bounds = array<i64: 1, 128>}, {transform_indices = @transform_3, window_bounds = array<i64: 512, 128>}]} {
    %c0_i32 = arith.constant 0 : i32
    %0 = arith.cmpi eq, %arg2, %c0_i32 : i32
    %1 = arith.extui %0 : i1 to i32
    %c0_i32_0 = arith.constant 0 : i32
    %2 = arith.cmpi ne, %1, %c0_i32_0 : i32
    scf.if %2 {
      %cst_10 = arith.constant 0.000000e+00 : f32
      %12 = vector.broadcast %cst_10 : f32 to vector<512x128xf32>
      %c0_11 = arith.constant 0 : index
      %c0_12 = arith.constant 0 : index
      %13 = vector.load %arg7[%c0_11, %c0_12] : memref<512x128xf32, #tpu.memory_space<vmem>>, vector<512x128xf32>
      tpu.vector_store %arg7[%c0_11, %c0_12], %12 {strides = array<i32>} : memref<512x128xf32, #tpu.memory_space<vmem>>, vector<512x128xf32>,
    } else {
    }
    %c0 = arith.constant 0 : index
    %c0_1 = arith.constant 0 : index
    %3 = vector.load %arg7[%c0, %c0_1] : memref<512x128xf32, #tpu.memory_space<vmem>>, vector<512x128xf32>
    %c0_2 = arith.constant 0 : index
    %c0_3 = arith.constant 0 : index
    %4 = vector.load %arg3[%c0_2, %c0_3] : memref<512x48xbf16, #tpu.memory_space<vmem>>, vector<512x48xbf16>
    %c0_4 = arith.constant 0 : index
    %c0_5 = arith.constant 0 : index
    %5 = vector.load %arg4[%c0_4, %c0_5] : memref<48x128xbf16, #tpu.memory_space<vmem>>, vector<48x128xbf16>
    %cst = arith.constant dense<0.000000e+00> : vector<512x128xf32>
    %6 = tpu.matmul %4, %5, %cst {dimension_numbers = #tpu.dot_dimension_numbers<[1], [0], [0], [1], [0, 0, 1, 1], [], []>} : vector<512x48xbf16>, vector<48x128xbf16>, vector<512x128xf32> -> vector<512x128xf32>
    %7 = arith.addf %3, %6 : vector<512x128xf32>
    %c0_6 = arith.constant 0 : index
    %c0_7 = arith.constant 0 : index
    %8 = vector.load %arg7[%c0_6, %c0_7] : memref<512x128xf32, #tpu.memory_space<vmem>>, vector<512x128xf32>
    tpu.vector_store %arg7[%c0_6, %c0_7], %7 {strides = array<i32>} : memref<512x128xf32, #tpu.memory_space<vmem>>, vector<512x128xf32>,
    %c0_i32_8 = arith.constant 0 : i32
    %9 = arith.cmpi eq, %arg2, %c0_i32_8 : i32
    %10 = arith.extui %9 : i1 to i32
    %c0_i32_9 = arith.constant 0 : i32
    %11 = arith.cmpi ne, %10, %c0_i32_9 : i32
    scf.if %11 {
      %c0_10 = arith.constant 0 : index
      %c0_11 = arith.constant 0 : index
      %12 = vector.load %arg7[%c0_10, %c0_11] : memref<512x128xf32, #tpu.memory_space<vmem>>, vector<512x128xf32>
      %c0_12 = arith.constant 0 : index
      %c0_13 = arith.constant 0 : index
      %13 = vector.load %arg5[%c0_12, %c0_13] : memref<1x128xf32, #tpu.memory_space<vmem>>, vector<1x128xf32>
      %14 = vector.broadcast %13 : vector<1x128xf32> to vector<512x128xf32>
      %15 = arith.addf %12, %14 : vector<512x128xf32>
      %cst_14 = arith.constant 0.000000e+00 : f32
      %16 = vector.broadcast %cst_14 : f32 to vector<512x128xf32>
      %17 = arith.cmpf oge, %15, %16 : vector<512x128xf32>
      %cst_15 = arith.constant 2.000000e-01 : f32
      %18 = vector.broadcast %cst_15 : f32 to vector<512x128xf32>
      %19 = arith.mulf %18, %15 : vector<512x128xf32>
      %20 = arith.select %17, %15, %19 : vector<512x128xi1>, vector<512x128xf32>
      %21 = arith.truncf %20 : vector<512x128xf32> to vector<512x128xbf16>
      %c0_16 = arith.constant 0 : index
      %c0_17 = arith.constant 0 : index
      %22 = vector.load %arg6[%c0_16, %c0_17] : memref<512x128xbf16, #tpu.memory_space<vmem>>, vector<512x128xbf16>
      tpu.vector_store %arg6[%c0_16, %c0_17], %21 {strides = array<i32>} : memref<512x128xbf16, #tpu.memory_space<vmem>>, vector<512x128xbf16>,
    } else {
    }
    return
  }
  func.func @transform_0(%arg0: i32, %arg1: i32, %arg2: i32) -> (i32, i32) {
    %c0_i32 = arith.constant 0 : i32
    return %arg0, %arg2 : i32, i32
  }
  func.func @transform_1(%arg0: i32, %arg1: i32, %arg2: i32) -> (i32, i32) {
    %c0_i32 = arith.constant 0 : i32
    return %arg2, %arg1 : i32, i32
  }
  func.func @transform_2(%arg0: i32, %arg1: i32, %arg2: i32) -> (i32, i32) {
    %c0_i32 = arith.constant 0 : i32
    %c0_i32_0 = arith.constant 0 : i32
    return %c0_i32, %arg1 : i32, i32
  }
  func.func @transform_3(%arg0: i32, %arg1: i32, %arg2: i32) -> (i32, i32) {
    %c0_i32 = arith.constant 0 : i32
    return %arg0, %arg1 : i32, i32
  }
}

module attributes {stable_mosaic.version = 11 : i64} {
  func.func @_matmul_in_lrelu_kernel(%arg0: i32, %arg1: i32, %arg2: i32, %arg3: memref<1x64x512xbf16, #tpu.memory_space<vmem>>, %arg4: memref<512x128xbf16, #tpu.memory_space<vmem>>, %arg5: memref<1x128xf32, #tpu.memory_space<vmem>>, %arg6: memref<1x64x128xbf16, #tpu.memory_space<vmem>>, %arg7: memref<64x128xf32, #tpu.memory_space<vmem>>) attributes {dimension_semantics = [#tpu.dimension_semantics<parallel>, #tpu.dimension_semantics<parallel>, #tpu.dimension_semantics<arbitrary>], iteration_bounds = array<i64: 2, 1, 2>, scalar_prefetch = 0 : i64, scratch_operands = 1 : i64, tpu.core_type = #tpu.core_type<tc>, window_params = [{transform_indices = @transform_0, window_bounds = array<i64: 1, 64, 512>}, {transform_indices = @transform_1, window_bounds = array<i64: 512, 128>}, {transform_indices = @transform_2, window_bounds = array<i64: 1, 128>}, {transform_indices = @transform_3, window_bounds = array<i64: 1, 64, 128>}]} {
    %c0_i32 = arith.constant 0 : i32
    %0 = arith.cmpi eq, %arg2, %c0_i32 : i32
    %1 = arith.extui %0 : i1 to i32
    %c0_i32_0 = arith.constant 0 : i32
    %2 = arith.cmpi ne, %1, %c0_i32_0 : i32
    scf.if %2 {
      %cst_10 = arith.constant 0.000000e+00 : f32
      %13 = vector.broadcast %cst_10 : f32 to vector<64x128xf32>
      %c0_11 = arith.constant 0 : index
      %c0_12 = arith.constant 0 : index
      %14 = vector.load %arg7[%c0_11, %c0_12] : memref<64x128xf32, #tpu.memory_space<vmem>>, vector<64x128xf32>
      tpu.vector_store %arg7[%c0_11, %c0_12], %13 {strides = array<i32>} : memref<64x128xf32, #tpu.memory_space<vmem>>, vector<64x128xf32>,
    } else {
    }
    %c0 = arith.constant 0 : index
    %c0_1 = arith.constant 0 : index
    %3 = vector.load %arg7[%c0, %c0_1] : memref<64x128xf32, #tpu.memory_space<vmem>>, vector<64x128xf32>
    %c0_2 = arith.constant 0 : index
    %c0_3 = arith.constant 0 : index
    %c0_4 = arith.constant 0 : index
    %4 = vector.load %arg3[%c0_2, %c0_3, %c0_4] : memref<1x64x512xbf16, #tpu.memory_space<vmem>>, vector<1x64x512xbf16>
    %5 = vector.shape_cast %4 : vector<1x64x512xbf16> to vector<64x512xbf16>
    %c0_5 = arith.constant 0 : index
    %c0_6 = arith.constant 0 : index
    %6 = vector.load %arg4[%c0_5, %c0_6] : memref<512x128xbf16, #tpu.memory_space<vmem>>, vector<512x128xbf16>
    %cst = arith.constant dense<0.000000e+00> : vector<64x128xf32>
    %7 = tpu.matmul %5, %6, %cst {dimension_numbers = #tpu.dot_dimension_numbers<[1], [0], [0], [1], [0, 0, 1, 1], [], []>} : vector<64x512xbf16>, vector<512x128xbf16>, vector<64x128xf32> -> vector<64x128xf32>
    %8 = arith.addf %3, %7 : vector<64x128xf32>
    %c0_7 = arith.constant 0 : index
    %c0_8 = arith.constant 0 : index
    %9 = vector.load %arg7[%c0_7, %c0_8] : memref<64x128xf32, #tpu.memory_space<vmem>>, vector<64x128xf32>
    tpu.vector_store %arg7[%c0_7, %c0_8], %8 {strides = array<i32>} : memref<64x128xf32, #tpu.memory_space<vmem>>, vector<64x128xf32>,
    %c1_i32 = arith.constant 1 : i32
    %10 = arith.cmpi eq, %arg2, %c1_i32 : i32
    %11 = arith.extui %10 : i1 to i32
    %c0_i32_9 = arith.constant 0 : i32
    %12 = arith.cmpi ne, %11, %c0_i32_9 : i32
    scf.if %12 {
      %c0_10 = arith.constant 0 : index
      %c0_11 = arith.constant 0 : index
      %13 = vector.load %arg7[%c0_10, %c0_11] : memref<64x128xf32, #tpu.memory_space<vmem>>, vector<64x128xf32>
      %c0_12 = arith.constant 0 : index
      %c0_13 = arith.constant 0 : index
      %14 = vector.load %arg5[%c0_12, %c0_13] : memref<1x128xf32, #tpu.memory_space<vmem>>, vector<1x128xf32>
      %15 = vector.broadcast %14 : vector<1x128xf32> to vector<64x128xf32>
      %16 = arith.addf %13, %15 : vector<64x128xf32>
      %cst_14 = arith.constant dense<0.000000e+00> : vector<128xf32>
      %17 = vector.multi_reduction <add>, %16, %cst_14 [0] : vector<64x128xf32> to vector<128xf32>
      %18 = vector.shape_cast %17 : vector<128xf32> to vector<1x128xf32>
      %cst_15 = arith.constant 6.400000e+01 : f32
      %19 = vector.broadcast %cst_15 : f32 to vector<1x128xf32>
      %20 = arith.divf %18, %19 : vector<1x128xf32>
      %21 = vector.broadcast %20 : vector<1x128xf32> to vector<64x128xf32>
      %22 = arith.subf %16, %21 : vector<64x128xf32>
      %23 = arith.mulf %22, %22 : vector<64x128xf32>
      %cst_16 = arith.constant dense<0.000000e+00> : vector<128xf32>
      %24 = vector.multi_reduction <add>, %23, %cst_16 [0] : vector<64x128xf32> to vector<128xf32>
      %25 = vector.shape_cast %24 : vector<128xf32> to vector<1x128xf32>
      %cst_17 = arith.constant 6.400000e+01 : f32
      %26 = vector.broadcast %cst_17 : f32 to vector<1x128xf32>
      %27 = arith.divf %25, %26 : vector<1x128xf32>
      %cst_18 = arith.constant 9.99999974E-6 : f32
      %28 = vector.broadcast %cst_18 : f32 to vector<1x128xf32>
      %29 = arith.addf %27, %28 : vector<1x128xf32>
      %30 = math.rsqrt %29 : vector<1x128xf32>
      %31 = vector.broadcast %30 : vector<1x128xf32> to vector<64x128xf32>
      %32 = arith.mulf %22, %31 : vector<64x128xf32>
      %cst_19 = arith.constant 0.000000e+00 : f32
      %33 = vector.broadcast %cst_19 : f32 to vector<64x128xf32>
      %34 = arith.cmpf oge, %32, %33 : vector<64x128xf32>
      %cst_20 = arith.constant 2.000000e-01 : f32
      %35 = vector.broadcast %cst_20 : f32 to vector<64x128xf32>
      %36 = arith.mulf %35, %32 : vector<64x128xf32>
      %37 = arith.select %34, %32, %36 : vector<64x128xi1>, vector<64x128xf32>
      %38 = arith.truncf %37 : vector<64x128xf32> to vector<64x128xbf16>
      %c0_21 = arith.constant 0 : index
      %c0_22 = arith.constant 0 : index
      %c0_23 = arith.constant 0 : index
      %39 = vector.load %arg6[%c0_21, %c0_22, %c0_23] : memref<1x64x128xbf16, #tpu.memory_space<vmem>>, vector<1x64x128xbf16>
      %40 = vector.shape_cast %39 : vector<1x64x128xbf16> to vector<64x128xbf16>
      %41 = vector.shape_cast %38 : vector<64x128xbf16> to vector<1x64x128xbf16>
      tpu.vector_store %arg6[%c0_21, %c0_22, %c0_23], %41 {strides = array<i32>} : memref<1x64x128xbf16, #tpu.memory_space<vmem>>, vector<1x64x128xbf16>,
    } else {
    }
    return
  }
  func.func @transform_0(%arg0: i32, %arg1: i32, %arg2: i32) -> (i32, i32, i32) {
    %c0_i32 = arith.constant 0 : i32
    %c0_i32_0 = arith.constant 0 : i32
    return %arg0, %c0_i32, %arg2 : i32, i32, i32
  }
  func.func @transform_1(%arg0: i32, %arg1: i32, %arg2: i32) -> (i32, i32) {
    %c0_i32 = arith.constant 0 : i32
    return %arg2, %arg1 : i32, i32
  }
  func.func @transform_2(%arg0: i32, %arg1: i32, %arg2: i32) -> (i32, i32) {
    %c0_i32 = arith.constant 0 : i32
    %c0_i32_0 = arith.constant 0 : i32
    return %c0_i32, %arg1 : i32, i32
  }
  func.func @transform_3(%arg0: i32, %arg1: i32, %arg2: i32) -> (i32, i32, i32) {
    %c0_i32 = arith.constant 0 : i32
    %c0_i32_0 = arith.constant 0 : i32
    return %arg0, %c0_i32, %arg1 : i32, i32, i32
  }
}

module attributes {stable_mosaic.version = 11 : i64} {
  func.func @_matmul_in_lrelu_kernel(%arg0: i32, %arg1: i32, %arg2: i32, %arg3: memref<1x16x512xbf16, #tpu.memory_space<vmem>>, %arg4: memref<512x256xbf16, #tpu.memory_space<vmem>>, %arg5: memref<1x256xf32, #tpu.memory_space<vmem>>, %arg6: memref<1x16x256xbf16, #tpu.memory_space<vmem>>, %arg7: memref<16x256xf32, #tpu.memory_space<vmem>>) attributes {dimension_semantics = [#tpu.dimension_semantics<parallel>, #tpu.dimension_semantics<parallel>, #tpu.dimension_semantics<arbitrary>], iteration_bounds = array<i64: 2, 1, 4>, scalar_prefetch = 0 : i64, scratch_operands = 1 : i64, tpu.core_type = #tpu.core_type<tc>, window_params = [{transform_indices = @transform_0, window_bounds = array<i64: 1, 16, 512>}, {transform_indices = @transform_1, window_bounds = array<i64: 512, 256>}, {transform_indices = @transform_2, window_bounds = array<i64: 1, 256>}, {transform_indices = @transform_3, window_bounds = array<i64: 1, 16, 256>}]} {
    %c0_i32 = arith.constant 0 : i32
    %0 = arith.cmpi eq, %arg2, %c0_i32 : i32
    %1 = arith.extui %0 : i1 to i32
    %c0_i32_0 = arith.constant 0 : i32
    %2 = arith.cmpi ne, %1, %c0_i32_0 : i32
    scf.if %2 {
      %cst_10 = arith.constant 0.000000e+00 : f32
      %13 = vector.broadcast %cst_10 : f32 to vector<16x256xf32>
      %c0_11 = arith.constant 0 : index
      %c0_12 = arith.constant 0 : index
      %14 = vector.load %arg7[%c0_11, %c0_12] : memref<16x256xf32, #tpu.memory_space<vmem>>, vector<16x256xf32>
      tpu.vector_store %arg7[%c0_11, %c0_12], %13 {strides = array<i32>} : memref<16x256xf32, #tpu.memory_space<vmem>>, vector<16x256xf32>,
    } else {
    }
    %c0 = arith.constant 0 : index
    %c0_1 = arith.constant 0 : index
    %3 = vector.load %arg7[%c0, %c0_1] : memref<16x256xf32, #tpu.memory_space<vmem>>, vector<16x256xf32>
    %c0_2 = arith.constant 0 : index
    %c0_3 = arith.constant 0 : index
    %c0_4 = arith.constant 0 : index
    %4 = vector.load %arg3[%c0_2, %c0_3, %c0_4] : memref<1x16x512xbf16, #tpu.memory_space<vmem>>, vector<1x16x512xbf16>
    %5 = vector.shape_cast %4 : vector<1x16x512xbf16> to vector<16x512xbf16>
    %c0_5 = arith.constant 0 : index
    %c0_6 = arith.constant 0 : index
    %6 = vector.load %arg4[%c0_5, %c0_6] : memref<512x256xbf16, #tpu.memory_space<vmem>>, vector<512x256xbf16>
    %cst = arith.constant dense<0.000000e+00> : vector<16x256xf32>
    %7 = tpu.matmul %5, %6, %cst {dimension_numbers = #tpu.dot_dimension_numbers<[1], [0], [0], [1], [0, 0, 1, 1], [], []>} : vector<16x512xbf16>, vector<512x256xbf16>, vector<16x256xf32> -> vector<16x256xf32>
    %8 = arith.addf %3, %7 : vector<16x256xf32>
    %c0_7 = arith.constant 0 : index
    %c0_8 = arith.constant 0 : index
    %9 = vector.load %arg7[%c0_7, %c0_8] : memref<16x256xf32, #tpu.memory_space<vmem>>, vector<16x256xf32>
    tpu.vector_store %arg7[%c0_7, %c0_8], %8 {strides = array<i32>} : memref<16x256xf32, #tpu.memory_space<vmem>>, vector<16x256xf32>,
    %c3_i32 = arith.constant 3 : i32
    %10 = arith.cmpi eq, %arg2, %c3_i32 : i32
    %11 = arith.extui %10 : i1 to i32
    %c0_i32_9 = arith.constant 0 : i32
    %12 = arith.cmpi ne, %11, %c0_i32_9 : i32
    scf.if %12 {
      %c0_10 = arith.constant 0 : index
      %c0_11 = arith.constant 0 : index
      %13 = vector.load %arg7[%c0_10, %c0_11] : memref<16x256xf32, #tpu.memory_space<vmem>>, vector<16x256xf32>
      %c0_12 = arith.constant 0 : index
      %c0_13 = arith.constant 0 : index
      %14 = vector.load %arg5[%c0_12, %c0_13] : memref<1x256xf32, #tpu.memory_space<vmem>>, vector<1x256xf32>
      %15 = vector.broadcast %14 : vector<1x256xf32> to vector<16x256xf32>
      %16 = arith.addf %13, %15 : vector<16x256xf32>
      %cst_14 = arith.constant dense<0.000000e+00> : vector<256xf32>
      %17 = vector.multi_reduction <add>, %16, %cst_14 [0] : vector<16x256xf32> to vector<256xf32>
      %18 = vector.shape_cast %17 : vector<256xf32> to vector<1x256xf32>
      %cst_15 = arith.constant 1.600000e+01 : f32
      %19 = vector.broadcast %cst_15 : f32 to vector<1x256xf32>
      %20 = arith.divf %18, %19 : vector<1x256xf32>
      %21 = vector.broadcast %20 : vector<1x256xf32> to vector<16x256xf32>
      %22 = arith.subf %16, %21 : vector<16x256xf32>
      %23 = arith.mulf %22, %22 : vector<16x256xf32>
      %cst_16 = arith.constant dense<0.000000e+00> : vector<256xf32>
      %24 = vector.multi_reduction <add>, %23, %cst_16 [0] : vector<16x256xf32> to vector<256xf32>
      %25 = vector.shape_cast %24 : vector<256xf32> to vector<1x256xf32>
      %cst_17 = arith.constant 1.600000e+01 : f32
      %26 = vector.broadcast %cst_17 : f32 to vector<1x256xf32>
      %27 = arith.divf %25, %26 : vector<1x256xf32>
      %cst_18 = arith.constant 9.99999974E-6 : f32
      %28 = vector.broadcast %cst_18 : f32 to vector<1x256xf32>
      %29 = arith.addf %27, %28 : vector<1x256xf32>
      %30 = math.rsqrt %29 : vector<1x256xf32>
      %31 = vector.broadcast %30 : vector<1x256xf32> to vector<16x256xf32>
      %32 = arith.mulf %22, %31 : vector<16x256xf32>
      %cst_19 = arith.constant 0.000000e+00 : f32
      %33 = vector.broadcast %cst_19 : f32 to vector<16x256xf32>
      %34 = arith.cmpf oge, %32, %33 : vector<16x256xf32>
      %cst_20 = arith.constant 2.000000e-01 : f32
      %35 = vector.broadcast %cst_20 : f32 to vector<16x256xf32>
      %36 = arith.mulf %35, %32 : vector<16x256xf32>
      %37 = arith.select %34, %32, %36 : vector<16x256xi1>, vector<16x256xf32>
      %38 = arith.truncf %37 : vector<16x256xf32> to vector<16x256xbf16>
      %c0_21 = arith.constant 0 : index
      %c0_22 = arith.constant 0 : index
      %c0_23 = arith.constant 0 : index
      %39 = vector.load %arg6[%c0_21, %c0_22, %c0_23] : memref<1x16x256xbf16, #tpu.memory_space<vmem>>, vector<1x16x256xbf16>
      %40 = vector.shape_cast %39 : vector<1x16x256xbf16> to vector<16x256xbf16>
      %41 = vector.shape_cast %38 : vector<16x256xbf16> to vector<1x16x256xbf16>
      tpu.vector_store %arg6[%c0_21, %c0_22, %c0_23], %41 {strides = array<i32>} : memref<1x16x256xbf16, #tpu.memory_space<vmem>>, vector<1x16x256xbf16>,
    } else {
    }
    return
  }
  func.func @transform_0(%arg0: i32, %arg1: i32, %arg2: i32) -> (i32, i32, i32) {
    %c0_i32 = arith.constant 0 : i32
    %c0_i32_0 = arith.constant 0 : i32
    return %arg0, %c0_i32, %arg2 : i32, i32, i32
  }
  func.func @transform_1(%arg0: i32, %arg1: i32, %arg2: i32) -> (i32, i32) {
    %c0_i32 = arith.constant 0 : i32
    return %arg2, %arg1 : i32, i32
  }
  func.func @transform_2(%arg0: i32, %arg1: i32, %arg2: i32) -> (i32, i32) {
    %c0_i32 = arith.constant 0 : i32
    %c0_i32_0 = arith.constant 0 : i32
    return %c0_i32, %arg1 : i32, i32
  }
  func.func @transform_3(%arg0: i32, %arg1: i32, %arg2: i32) -> (i32, i32, i32) {
    %c0_i32 = arith.constant 0 : i32
    %c0_i32_0 = arith.constant 0 : i32
    return %arg0, %c0_i32, %arg1 : i32, i32, i32
  }
}

module attributes {stable_mosaic.version = 11 : i64} {
  func.func @_matmul_in_lrelu_kernel(%arg0: i32, %arg1: i32, %arg2: i32, %arg3: memref<1x4x512xbf16, #tpu.memory_space<vmem>>, %arg4: memref<512x256xbf16, #tpu.memory_space<vmem>>, %arg5: memref<1x256xf32, #tpu.memory_space<vmem>>, %arg6: memref<1x4x256xbf16, #tpu.memory_space<vmem>>, %arg7: memref<4x256xf32, #tpu.memory_space<vmem>>) attributes {dimension_semantics = [#tpu.dimension_semantics<parallel>, #tpu.dimension_semantics<parallel>, #tpu.dimension_semantics<arbitrary>], iteration_bounds = array<i64: 2, 2, 8>, scalar_prefetch = 0 : i64, scratch_operands = 1 : i64, tpu.core_type = #tpu.core_type<tc>, window_params = [{transform_indices = @transform_0, window_bounds = array<i64: 1, 4, 512>}, {transform_indices = @transform_1, window_bounds = array<i64: 512, 256>}, {transform_indices = @transform_2, window_bounds = array<i64: 1, 256>}, {transform_indices = @transform_3, window_bounds = array<i64: 1, 4, 256>}]} {
    %c0_i32 = arith.constant 0 : i32
    %0 = arith.cmpi eq, %arg2, %c0_i32 : i32
    %1 = arith.extui %0 : i1 to i32
    %c0_i32_0 = arith.constant 0 : i32
    %2 = arith.cmpi ne, %1, %c0_i32_0 : i32
    scf.if %2 {
      %cst_10 = arith.constant 0.000000e+00 : f32
      %13 = vector.broadcast %cst_10 : f32 to vector<4x256xf32>
      %c0_11 = arith.constant 0 : index
      %c0_12 = arith.constant 0 : index
      %14 = vector.load %arg7[%c0_11, %c0_12] : memref<4x256xf32, #tpu.memory_space<vmem>>, vector<4x256xf32>
      tpu.vector_store %arg7[%c0_11, %c0_12], %13 {strides = array<i32>} : memref<4x256xf32, #tpu.memory_space<vmem>>, vector<4x256xf32>,
    } else {
    }
    %c0 = arith.constant 0 : index
    %c0_1 = arith.constant 0 : index
    %3 = vector.load %arg7[%c0, %c0_1] : memref<4x256xf32, #tpu.memory_space<vmem>>, vector<4x256xf32>
    %c0_2 = arith.constant 0 : index
    %c0_3 = arith.constant 0 : index
    %c0_4 = arith.constant 0 : index
    %4 = vector.load %arg3[%c0_2, %c0_3, %c0_4] : memref<1x4x512xbf16, #tpu.memory_space<vmem>>, vector<1x4x512xbf16>
    %5 = vector.shape_cast %4 : vector<1x4x512xbf16> to vector<4x512xbf16>
    %c0_5 = arith.constant 0 : index
    %c0_6 = arith.constant 0 : index
    %6 = vector.load %arg4[%c0_5, %c0_6] : memref<512x256xbf16, #tpu.memory_space<vmem>>, vector<512x256xbf16>
    %cst = arith.constant dense<0.000000e+00> : vector<4x256xf32>
    %7 = tpu.matmul %5, %6, %cst {dimension_numbers = #tpu.dot_dimension_numbers<[1], [0], [0], [1], [0, 0, 1, 1], [], []>} : vector<4x512xbf16>, vector<512x256xbf16>, vector<4x256xf32> -> vector<4x256xf32>
    %8 = arith.addf %3, %7 : vector<4x256xf32>
    %c0_7 = arith.constant 0 : index
    %c0_8 = arith.constant 0 : index
    %9 = vector.load %arg7[%c0_7, %c0_8] : memref<4x256xf32, #tpu.memory_space<vmem>>, vector<4x256xf32>
    tpu.vector_store %arg7[%c0_7, %c0_8], %8 {strides = array<i32>} : memref<4x256xf32, #tpu.memory_space<vmem>>, vector<4x256xf32>,
    %c7_i32 = arith.constant 7 : i32
    %10 = arith.cmpi eq, %arg2, %c7_i32 : i32
    %11 = arith.extui %10 : i1 to i32
    %c0_i32_9 = arith.constant 0 : i32
    %12 = arith.cmpi ne, %11, %c0_i32_9 : i32
    scf.if %12 {
      %c0_10 = arith.constant 0 : index
      %c0_11 = arith.constant 0 : index
      %13 = vector.load %arg7[%c0_10, %c0_11] : memref<4x256xf32, #tpu.memory_space<vmem>>, vector<4x256xf32>
      %c0_12 = arith.constant 0 : index
      %c0_13 = arith.constant 0 : index
      %14 = vector.load %arg5[%c0_12, %c0_13] : memref<1x256xf32, #tpu.memory_space<vmem>>, vector<1x256xf32>
      %15 = vector.broadcast %14 : vector<1x256xf32> to vector<4x256xf32>
      %16 = arith.addf %13, %15 : vector<4x256xf32>
      %cst_14 = arith.constant dense<0.000000e+00> : vector<256xf32>
      %17 = vector.multi_reduction <add>, %16, %cst_14 [0] : vector<4x256xf32> to vector<256xf32>
      %18 = vector.shape_cast %17 : vector<256xf32> to vector<1x256xf32>
      %cst_15 = arith.constant 4.000000e+00 : f32
      %19 = vector.broadcast %cst_15 : f32 to vector<1x256xf32>
      %20 = arith.divf %18, %19 : vector<1x256xf32>
      %21 = vector.broadcast %20 : vector<1x256xf32> to vector<4x256xf32>
      %22 = arith.subf %16, %21 : vector<4x256xf32>
      %23 = arith.mulf %22, %22 : vector<4x256xf32>
      %cst_16 = arith.constant dense<0.000000e+00> : vector<256xf32>
      %24 = vector.multi_reduction <add>, %23, %cst_16 [0] : vector<4x256xf32> to vector<256xf32>
      %25 = vector.shape_cast %24 : vector<256xf32> to vector<1x256xf32>
      %cst_17 = arith.constant 4.000000e+00 : f32
      %26 = vector.broadcast %cst_17 : f32 to vector<1x256xf32>
      %27 = arith.divf %25, %26 : vector<1x256xf32>
      %cst_18 = arith.constant 9.99999974E-6 : f32
      %28 = vector.broadcast %cst_18 : f32 to vector<1x256xf32>
      %29 = arith.addf %27, %28 : vector<1x256xf32>
      %30 = math.rsqrt %29 : vector<1x256xf32>
      %31 = vector.broadcast %30 : vector<1x256xf32> to vector<4x256xf32>
      %32 = arith.mulf %22, %31 : vector<4x256xf32>
      %cst_19 = arith.constant 0.000000e+00 : f32
      %33 = vector.broadcast %cst_19 : f32 to vector<4x256xf32>
      %34 = arith.cmpf oge, %32, %33 : vector<4x256xf32>
      %cst_20 = arith.constant 2.000000e-01 : f32
      %35 = vector.broadcast %cst_20 : f32 to vector<4x256xf32>
      %36 = arith.mulf %35, %32 : vector<4x256xf32>
      %37 = arith.select %34, %32, %36 : vector<4x256xi1>, vector<4x256xf32>
      %38 = arith.truncf %37 : vector<4x256xf32> to vector<4x256xbf16>
      %c0_21 = arith.constant 0 : index
      %c0_22 = arith.constant 0 : index
      %c0_23 = arith.constant 0 : index
      %39 = vector.load %arg6[%c0_21, %c0_22, %c0_23] : memref<1x4x256xbf16, #tpu.memory_space<vmem>>, vector<1x4x256xbf16>
      %40 = vector.shape_cast %39 : vector<1x4x256xbf16> to vector<4x256xbf16>
      %41 = vector.shape_cast %38 : vector<4x256xbf16> to vector<1x4x256xbf16>
      tpu.vector_store %arg6[%c0_21, %c0_22, %c0_23], %41 {strides = array<i32>} : memref<1x4x256xbf16, #tpu.memory_space<vmem>>, vector<1x4x256xbf16>,
    } else {
    }
    return
  }
  func.func @transform_0(%arg0: i32, %arg1: i32, %arg2: i32) -> (i32, i32, i32) {
    %c0_i32 = arith.constant 0 : i32
    %c0_i32_0 = arith.constant 0 : i32
    return %arg0, %c0_i32, %arg2 : i32, i32, i32
  }
  func.func @transform_1(%arg0: i32, %arg1: i32, %arg2: i32) -> (i32, i32) {
    %c0_i32 = arith.constant 0 : i32
    return %arg2, %arg1 : i32, i32
  }
  func.func @transform_2(%arg0: i32, %arg1: i32, %arg2: i32) -> (i32, i32) {
    %c0_i32 = arith.constant 0 : i32
    %c0_i32_0 = arith.constant 0 : i32
    return %c0_i32, %arg1 : i32, i32
  }
  func.func @transform_3(%arg0: i32, %arg1: i32, %arg2: i32) -> (i32, i32, i32) {
    %c0_i32 = arith.constant 0 : i32
    %c0_i32_0 = arith.constant 0 : i32
    return %arg0, %c0_i32, %arg1 : i32, i32, i32
  }
}

module attributes {stable_mosaic.version = 11 : i64} {
  func.func @_matmul_bias_act_kernel(%arg0: i32, %arg1: i32, %arg2: i32, %arg3: memref<8x512xbf16, #tpu.memory_space<vmem>>, %arg4: memref<512x128xbf16, #tpu.memory_space<vmem>>, %arg5: memref<1x128xf32, #tpu.memory_space<vmem>>, %arg6: memref<8x128xf32, #tpu.memory_space<vmem>>, %arg7: memref<8x128xf32, #tpu.memory_space<vmem>>) attributes {dimension_semantics = [#tpu.dimension_semantics<parallel>, #tpu.dimension_semantics<parallel>, #tpu.dimension_semantics<arbitrary>], iteration_bounds = array<i64: 1, 1, 16>, scalar_prefetch = 0 : i64, scratch_operands = 1 : i64, tpu.core_type = #tpu.core_type<tc>, window_params = [{transform_indices = @transform_0, window_bounds = array<i64: 8, 512>}, {transform_indices = @transform_1, window_bounds = array<i64: 512, 128>}, {transform_indices = @transform_2, window_bounds = array<i64: 1, 128>}, {transform_indices = @transform_3, window_bounds = array<i64: 8, 128>}]} {
    %c0_i32 = arith.constant 0 : i32
    %0 = arith.cmpi eq, %arg2, %c0_i32 : i32
    %1 = arith.extui %0 : i1 to i32
    %c0_i32_0 = arith.constant 0 : i32
    %2 = arith.cmpi ne, %1, %c0_i32_0 : i32
    scf.if %2 {
      %cst_9 = arith.constant 0.000000e+00 : f32
      %12 = vector.broadcast %cst_9 : f32 to vector<8x128xf32>
      %c0_10 = arith.constant 0 : index
      %c0_11 = arith.constant 0 : index
      %13 = vector.load %arg7[%c0_10, %c0_11] : memref<8x128xf32, #tpu.memory_space<vmem>>, vector<8x128xf32>
      tpu.vector_store %arg7[%c0_10, %c0_11], %12 {strides = array<i32>} : memref<8x128xf32, #tpu.memory_space<vmem>>, vector<8x128xf32>,
    } else {
    }
    %c0 = arith.constant 0 : index
    %c0_1 = arith.constant 0 : index
    %3 = vector.load %arg7[%c0, %c0_1] : memref<8x128xf32, #tpu.memory_space<vmem>>, vector<8x128xf32>
    %c0_2 = arith.constant 0 : index
    %c0_3 = arith.constant 0 : index
    %4 = vector.load %arg3[%c0_2, %c0_3] : memref<8x512xbf16, #tpu.memory_space<vmem>>, vector<8x512xbf16>
    %c0_4 = arith.constant 0 : index
    %c0_5 = arith.constant 0 : index
    %5 = vector.load %arg4[%c0_4, %c0_5] : memref<512x128xbf16, #tpu.memory_space<vmem>>, vector<512x128xbf16>
    %cst = arith.constant dense<0.000000e+00> : vector<8x128xf32>
    %6 = tpu.matmul %4, %5, %cst {dimension_numbers = #tpu.dot_dimension_numbers<[1], [0], [0], [1], [0, 0, 1, 1], [], []>} : vector<8x512xbf16>, vector<512x128xbf16>, vector<8x128xf32> -> vector<8x128xf32>
    %7 = arith.addf %3, %6 : vector<8x128xf32>
    %c0_6 = arith.constant 0 : index
    %c0_7 = arith.constant 0 : index
    %8 = vector.load %arg7[%c0_6, %c0_7] : memref<8x128xf32, #tpu.memory_space<vmem>>, vector<8x128xf32>
    tpu.vector_store %arg7[%c0_6, %c0_7], %7 {strides = array<i32>} : memref<8x128xf32, #tpu.memory_space<vmem>>, vector<8x128xf32>,
    %c15_i32 = arith.constant 15 : i32
    %9 = arith.cmpi eq, %arg2, %c15_i32 : i32
    %10 = arith.extui %9 : i1 to i32
    %c0_i32_8 = arith.constant 0 : i32
    %11 = arith.cmpi ne, %10, %c0_i32_8 : i32
    scf.if %11 {
      %c0_9 = arith.constant 0 : index
      %c0_10 = arith.constant 0 : index
      %12 = vector.load %arg7[%c0_9, %c0_10] : memref<8x128xf32, #tpu.memory_space<vmem>>, vector<8x128xf32>
      %c0_11 = arith.constant 0 : index
      %c0_12 = arith.constant 0 : index
      %13 = vector.load %arg5[%c0_11, %c0_12] : memref<1x128xf32, #tpu.memory_space<vmem>>, vector<1x128xf32>
      %14 = vector.broadcast %13 : vector<1x128xf32> to vector<8x128xf32>
      %15 = arith.addf %12, %14 : vector<8x128xf32>
      %c0_13 = arith.constant 0 : index
      %c0_14 = arith.constant 0 : index
      %16 = vector.load %arg6[%c0_13, %c0_14] : memref<8x128xf32, #tpu.memory_space<vmem>>, vector<8x128xf32>
      tpu.vector_store %arg6[%c0_13, %c0_14], %15 {strides = array<i32>} : memref<8x128xf32, #tpu.memory_space<vmem>>, vector<8x128xf32>,
    } else {
    }
    return
  }
  func.func @transform_0(%arg0: i32, %arg1: i32, %arg2: i32) -> (i32, i32) {
    %c0_i32 = arith.constant 0 : i32
    return %arg0, %arg2 : i32, i32
  }
  func.func @transform_1(%arg0: i32, %arg1: i32, %arg2: i32) -> (i32, i32) {
    %c0_i32 = arith.constant 0 : i32
    return %arg2, %arg1 : i32, i32
  }
  func.func @transform_2(%arg0: i32, %arg1: i32, %arg2: i32) -> (i32, i32) {
    %c0_i32 = arith.constant 0 : i32
    %c0_i32_0 = arith.constant 0 : i32
    return %c0_i32, %arg1 : i32, i32
  }
  func.func @transform_3(%arg0: i32, %arg1: i32, %arg2: i32) -> (i32, i32) {
    %c0_i32 = arith.constant 0 : i32
    return %arg0, %arg1 : i32, i32
  }
}

</mosaic_0001>

<bundles_post_ra>
// kernel: discriminator_resnet_forward.5
= control target key start
LH: loop header
LB: loop body
LE: loop exit
PB: predicated region body
PF: predicated region fallthrough
CT: control target
= control target key end

     0   :  { %vm395_vm0 = vcmask 392192   ;;  %s2427_s1 = inlined_call_operand.vmem [shape: bf16[48,128], index: 1, kind: input, shape index: {}]   ;;  %s2428_s0 = inlined_call_operand.vmem [shape: bf16[512,48], index: 0, kind: input, shape index: {}]   ;;  %s2429_s2 = inlined_call_operand.vmem [shape: f32[1,128], index: 2, kind: input, shape index: {}]   ;;  %s2430_s3 = inlined_call_operand.vmem [shape: bf16[512,128], index: 3, kind: output, shape index: {}]  }
   0x1   :  { %v2061_v0 = vld [vmem:[%s2427_s1] sm:$0xff]   ;;  %v2062_v1 = vld [vmem:[%s2427_s1 + $0x8] sm:$0xff]   ;;  %v2063_v2 = vld [vmem:[%s2427_s1 + $0x10] sm:$0xff]  }
   0x2   :  { %1985 = vmatprep.subr.bf16.mxu0 %v2061_v0  ;;  %2055 = vmatprep.subr.bf16.mxu1 %v2061_v0  ;;  %v2064_v3 = vld [vmem:[%s2428_s0] sm:$0xff]   ;;  %v2066_v5 = vld [vmem:[%s2428_s0 + $0x8] sm:$0xff]   ;;  %v2068_v7 = vld [vmem:[%s2428_s0 + $0x10] sm:$0xff]  }
   0x3   :  { %1986 = vmatpush3.bf16.msra.mxu0 %v2061_v0  ;;  %2058 = vmatpush3.bf16.msra.mxu1 %v2061_v0  ;;  %v2065_v4 = vld [vmem:[%s2428_s0 + $0x80] sm:$0xff]   ;;  %v2067_v6 = vld [vmem:[%s2428_s0 + $0x88] sm:$0xff]   ;;  %v2069_v8 = vld [vmem:[%s2428_s0 + $0x90] sm:$0xff]  }
   0x4   :  { %1987 = vmatprep.subr.bf16.mxu0 %v2062_v1  ;;  %2056 = vmatprep.subr.bf16.mxu1 %v2062_v1  ;;  %v2070_v9 = vld [vmem:[%s2428_s0 + $0x18] sm:$0xff]   ;;  %v2072_v11 = vld [vmem:[%s2428_s0 + $0x20] sm:$0xff]   ;;  %v2074_v13 = vld [vmem:[%s2428_s0 + $0x28] sm:$0xff]  }
   0x5   :  { %1991 = vmatprep.mubr.msk.bf16.mxu0 %vm395_vm0, %v2064_v3  ;;  %2023 = vmatprep.mubr.msk.bf16.mxu1 %vm395_vm0, %v2065_v4  ;;  %v2071_v10 = vld [vmem:[%s2428_s0 + $0x98] sm:$0xff]   ;;  %v2073_v12 = vld [vmem:[%s2428_s0 + $0xa0] sm:$0xff]   ;;  %v2075_v14 = vld [vmem:[%s2428_s0 + $0xa8] sm:$0xff]  }
   0x6   :  { %v2076_v15 = vld [vmem:[%s2428_s0 + $0x30] sm:$0xff]   ;;  %v2078_v17 = vld [vmem:[%s2428_s0 + $0x38] sm:$0xff]   ;;  %v2080_v19 = vld [vmem:[%s2428_s0 + $0x40] sm:$0xff]  }
   0x7   :  { %1988 = vmatpush3.bf16.msra.mxu0 %v2062_v1  ;;  %2059 = vmatpush3.bf16.msra.mxu1 %v2062_v1  ;;  %v2077_v16 = vld [vmem:[%s2428_s0 + $0xb0] sm:$0xff]   ;;  %v2079_v18 = vld [vmem:[%s2428_s0 + $0xb8] sm:$0xff]   ;;  %v2081_v20 = vld [vmem:[%s2428_s0 + $0xc0] sm:$0xff]  }
   0x8   :  { %1989 = vmatprep.subr.bf16.mxu0 %v2063_v2  ;;  %2057 = vmatprep.subr.bf16.mxu1 %v2063_v2  ;;  %v2082_v21 = vld [vmem:[%s2428_s0 + $0x48] sm:$0xff]   ;;  %v2084_v23 = vld [vmem:[%s2428_s0 + $0x50] sm:$0xff]   ;;  %v2086_v25 = vld [vmem:[%s2428_s0 + $0x58] sm:$0xff]  }
   0x9   :  { %v2083_v22 = vld [vmem:[%s2428_s0 + $0xc8] sm:$0xff]   ;;  %v2085_v24 = vld [vmem:[%s2428_s0 + $0xd0] sm:$0xff]   ;;  %v2087_v26 = vld [vmem:[%s2428_s0 + $0xd8] sm:$0xff]  }
   0xa   :  { %v2088_v27 = vld [vmem:[%s2428_s0 + $0x60] sm:$0xff]   ;;  %v2090_v29 = vld [vmem:[%s2428_s0 + $0x68] sm:$0xff]   ;;  %v2092_v31 = vld [vmem:[%s2428_s0 + $0x70] sm:$0xff]  }
   0xb   :  { %1990 = vmatpush3.bf16.msra.mxu0 %v2063_v2  ;;  %2060 = vmatpush3.bf16.msra.mxu1 %v2063_v2  ;;  %v2089_v28 = vld [vmem:[%s2428_s0 + $0xe0] sm:$0xff]   ;;  %v2091_v30 = vld [vmem:[%s2428_s0 + $0xe8] sm:$0xff]   ;;  %v2093_v32 = vld [vmem:[%s2428_s0 + $0xf0] sm:$0xff]  }
   0xc   :  { %v2094_v33 = vld [vmem:[%s2428_s0 + $0x78] sm:$0xff]   ;;  %v2256_v35 = vld [vmem:[%s2429_s2] ss:$0 sm:$0xff] }
   0xd   :  { %v2095_v34 = vld [vmem:[%s2428_s0 + $0xf8] sm:$0xff]  }
   0xe   :  { %1992 = vmatmul.mubr.msk.bf16.vlgmr.msra.gmra.mrb[0].mxu0 %vm395_vm0, %v2066_v5  ;;  %2024 = vmatmul.mubr.msk.bf16.vlgmr.msra.gmra.mrb[0].mxu1 %vm395_vm0, %v2067_v6 }
   0xf   :  { %1995 = vmatprep.mubr.msk.bf16.mxu0 %vm395_vm0, %v2068_v7  ;;  %2027 = vmatprep.mubr.msk.bf16.mxu1 %vm395_vm0, %v2069_v8 }
  0x16   :  { %1996 = vmatmul.mubr.msk.bf16.gmra.mrb[4].mxu0 %vm395_vm0, %v2070_v9  ;;  %2028 = vmatmul.mubr.msk.bf16.gmra.mrb[4].mxu1 %vm395_vm0, %v2071_v10 }
  0x17   :  { %1999 = vmatprep.mubr.msk.bf16.mxu0 %vm395_vm0, %v2072_v11  ;;  %2031 = vmatprep.mubr.msk.bf16.mxu1 %vm395_vm0, %v2073_v12 }
  0x1e   :  { %2000 = vmatmul.mubr.msk.bf16.gmra.mrb[8].mxu0 %vm395_vm0, %v2074_v13  ;;  %2032 = vmatmul.mubr.msk.bf16.gmra.mrb[8].mxu1 %vm395_vm0, %v2075_v14 }
  0x1f   :  { %2003 = vmatprep.mubr.msk.bf16.mxu0 %vm395_vm0, %v2076_v15  ;;  %2035 = vmatprep.mubr.msk.bf16.mxu1 %vm395_vm0, %v2077_v16 }
  0x26   :  { %2004 = vmatmul.mubr.msk.bf16.gmra.mrb[12].mxu0 %vm395_vm0, %v2078_v17  ;;  %2036 = vmatmul.mubr.msk.bf16.gmra.mrb[12].mxu1 %vm395_vm0, %v2079_v18 }
  0x27   :  { %2007 = vmatprep.mubr.msk.bf16.mxu0 %vm395_vm0, %v2080_v19  ;;  %2039 = vmatprep.mubr.msk.bf16.mxu1 %vm395_vm0, %v2081_v20 }
  0x2e   :  { %2008 = vmatmul.mubr.msk.bf16.gmra.mrb[16].mxu0 %vm395_vm0, %v2082_v21  ;;  %2040 = vmatmul.mubr.msk.bf16.gmra.mrb[16].mxu1 %vm395_vm0, %v2083_v22 }
  0x2f   :  { %2011 = vmatprep.mubr.msk.bf16.mxu0 %vm395_vm0, %v2084_v23  ;;  %2043 = vmatprep.mubr.msk.bf16.mxu1 %vm395_vm0, %v2085_v24 }
  0x36   :  { %2012 = vmatmul.mubr.msk.bf16.gmra.mrb[20].mxu0 %vm395_vm0, %v2086_v25  ;;  %2044 = vmatmul.mubr.msk.bf16.gmra.mrb[20].mxu1 %vm395_vm0, %v2087_v26 }
  0x37   :  { %2015 = vmatprep.mubr.msk.bf16.mxu0 %vm395_vm0, %v2088_v27  ;;  %2047 = vmatprep.mubr.msk.bf16.mxu1 %vm395_vm0, %v2089_v28 }
  0x3e   :  { %2016 = vmatmul.mubr.msk.bf16.gmra.mrb[24].mxu0 %vm395_vm0, %v2090_v29  ;;  %2048 = vmatmul.mubr.msk.bf16.gmra.mrb[24].mxu1 %vm395_vm0, %v2091_v30 }
  0x3f   :  { %2019 = vmatprep.mubr.msk.bf16.mxu0 %vm395_vm0, %v2092_v31  ;;  %2051 = vmatprep.mubr.msk.bf16.mxu1 %vm395_vm0, %v2093_v32 }
  0x46   :  { %2020 = vmatmul.mubr.msk.bf16.gmra.mrb[28].mxu0 %vm395_vm0, %v2094_v33  ;;  %2052 = vmatmul.mubr.msk.bf16.gmra.mrb[28].mxu1 %vm395_vm0, %v2095_v34 }
  0xe1   :  { %v1993_v36 = vpop.f32.mrb[0].mxu0  ;;  %v2025_v37 = vpop.f32.mrb[0].mxu1 }
  0xe2   :  { %v985_v38 = vadd.f32 %v1993_v36, %v2256_v35  ;;  %v1017_v39 = vadd.f32 %v2025_v37, %v2256_v35  ;;  %v526_v40 = vpop.f32.mrb[1].mxu0  ;;  %v654_v41 = vpop.f32.mrb[1].mxu1 }
  0xe3   :  { %v983_v42 = vadd.f32 %v2256_v35, %v526_v40  ;;  %v1015_v43 = vadd.f32 %v2256_v35, %v654_v41  ;;  %v1994_v44 = vpop.f32.mrb[2].mxu0  ;;  %v2026_v45 = vpop.f32.mrb[2].mxu1 }
  0xe4   :  { %vm1049_vm1 = vcmp.ge.f32.partialorder %v985_v38, 0.0  ;;  %v1113_v46 = vmul.f32 0.2, %v985_v38  ;;  %vm1081_vm2 = vcmp.ge.f32.partialorder %v1017_v39, 0.0  ;;  %v1145_v47 = vmul.f32 0.2, %v1017_v39 }
  0xe5   :  { %vm1047_vm3 = vcmp.ge.f32.partialorder %v983_v42, 0.0  ;;  %v1111_v48 = vmul.f32 0.2, %v983_v42  ;;  %vm1079_vm4 = vcmp.ge.f32.partialorder %v1015_v43, 0.0  ;;  %v1143_v49 = vmul.f32 0.2, %v1015_v43 }
  0xe6   :  { %v986_v50 = vadd.f32 %v1994_v44, %v2256_v35  ;;  %v1018_v51 = vadd.f32 %v2026_v45, %v2256_v35  ;;  %v529_v52 = vpop.f32.mrb[3].mxu0  ;;  %v657_v53 = vpop.f32.mrb[3].mxu1  ;;  %v1177_v54 = vsel %vm1049_vm1, %v985_v38, %v1113_v46  ;;  %v1209_v55 = vsel %vm1081_vm2, %v1017_v39, %v1145_v47 }
  0xe7   :  { %v984_v56 = vadd.f32 %v2256_v35, %v529_v52  ;;  %v1016_v57 = vadd.f32 %v2256_v35, %v657_v53  ;;  %v1175_v62 = vsel %vm1047_vm3, %v983_v42, %v1111_v48  ;;  %v1207_v63 = vsel %vm1079_vm4, %v1015_v43, %v1143_v49 }
  0xe8   :  { %vm1050_vm5 = vcmp.ge.f32.partialorder %v986_v50, 0.0  ;;  %v1114_v58 = vmul.f32 0.2, %v986_v50  ;;  %vm1082_vm6 = vcmp.ge.f32.partialorder %v1018_v51, 0.0  ;;  %v1146_v59 = vmul.f32 0.2, %v1018_v51 }
  0xe9   :  { %vm1048_vm7 = vcmp.ge.f32.partialorder %v984_v56, 0.0  ;;  %v1112_v60 = vmul.f32 0.2, %v984_v56  ;;  %vm1080_vm8 = vcmp.ge.f32.partialorder %v1016_v57, 0.0  ;;  %v1144_v61 = vmul.f32 0.2, %v1016_v57 }
  0xea   :  { %v1178_v0 = vsel %vm1050_vm5, %v986_v50, %v1114_v58  ;;  %v1210_v1 = vsel %vm1082_vm6, %v1018_v51, %v1146_v59  ;;  %v1997_v2 = vpop.f32.mrb[4].mxu0  ;;  %v2029_v3 = vpop.f32.mrb[4].mxu1 }
  0xeb   :  { %v1767_v4 = vpack.c.bf16 %v1178_v0, %v1177_v54  ;;  %v1847_v5 = vpack.c.bf16 %v1210_v1, %v1209_v55  ;;  %v1176_v6 = vsel %vm1048_vm7, %v984_v56, %v1112_v60  ;;  %v1208_v7 = vsel %vm1080_vm8, %v1016_v57, %v1144_v61  ;;  %v542_v8 = vpop.f32.mrb[5].mxu0  ;;  %v670_v9 = vpop.f32.mrb[5].mxu1 }
  0xec   :  { %v1762_v10 = vpack.c.bf16 %v1176_v6, %v1175_v62  ;;  %v1842_v11 = vpack.c.bf16 %v1208_v7, %v1207_v63  ;;  %v989_v12 = vadd.f32 %v1997_v2, %v2256_v35  ;;  %v1021_v13 = vadd.f32 %v2029_v3, %v2256_v35  ;;  %v1998_v14 = vpop.f32.mrb[6].mxu0  ;;  %v2030_v15 = vpop.f32.mrb[6].mxu1 }
  0xed   :  { %1919 = vst [vmem:[%s2430_s3 + $0x8] sm:$0xff] %v1767_v4   ;;  %1935 = vst [vmem:[%s2430_s3 + $0x88] sm:$0xff] %v1847_v5   ;;  %v987_v16 = vadd.f32 %v2256_v35, %v542_v8  ;;  %v1019_v17 = vadd.f32 %v2256_v35, %v670_v9  ;;  %v990_v18 = vadd.f32 %v1998_v14, %v2256_v35  ;;  %v545_v20 = vpop.f32.mrb[7].mxu0  ;;  %v673_v21 = vpop.f32.mrb[7].mxu1 }
  0xee   :  { %v1022_v19 = vadd.f32 %v2030_v15, %v2256_v35  ;;  %1763 = vst [vmem:[%s2430_s3] sm:$0xff] %v1762_v10   ;;  %1934 = vst [vmem:[%s2430_s3 + $0x80] sm:$0xff] %v1842_v11   ;;  %vm1053_vm9 = vcmp.ge.f32.partialorder %v989_v12, 0.0  ;;  %v1117_v22 = vmul.f32 0.2, %v989_v12  ;;  %vm1085_vm10 = vcmp.ge.f32.partialorder %v1021_v13, 0.0 }
  0xef   :  { %v1149_v23 = vmul.f32 0.2, %v1021_v13  ;;  %vm1051_vm11 = vcmp.ge.f32.partialorder %v987_v16, 0.0  ;;  %v1115_v24 = vmul.f32 0.2, %v987_v16  ;;  %vm1083_vm12 = vcmp.ge.f32.partialorder %v1019_v17, 0.0 }
  0xf0   :  { %v1147_v25 = vmul.f32 0.2, %v1019_v17  ;;  %v1181_v26 = vsel %vm1053_vm9, %v989_v12, %v1117_v22  ;;  %vm1054_vm13 = vcmp.ge.f32.partialorder %v990_v18, 0.0  ;;  %v1118_v28 = vmul.f32 0.2, %v990_v18 }
  0xf1   :  { %v1213_v27 = vsel %vm1085_vm10, %v1021_v13, %v1149_v23  ;;  %v1179_v29 = vsel %vm1051_vm11, %v987_v16, %v1115_v24  ;;  %vm1086_vm14 = vcmp.ge.f32.partialorder %v1022_v19, 0.0  ;;  %v1150_v31 = vmul.f32 0.2, %v1022_v19  ;;  %v2001_v32 = vpop.f32.mrb[8].mxu0  ;;  %v2033_v33 = vpop.f32.mrb[8].mxu1 }
  0xf2   :  { %v1211_v30 = vsel %vm1083_vm12, %v1019_v17, %v1147_v25  ;;  %v1182_v34 = vsel %vm1054_vm13, %v990_v18, %v1118_v28  ;;  %v988_v36 = vadd.f32 %v2256_v35, %v545_v20  ;;  %v1020_v37 = vadd.f32 %v2256_v35, %v673_v21  ;;  %v558_v39 = vpop.f32.mrb[9].mxu0  ;;  %v686_v40 = vpop.f32.mrb[9].mxu1 }
  0xf3   :  { %v993_v38 = vadd.f32 %v2001_v32, %v2256_v35  ;;  %v1777_v41 = vpack.c.bf16 %v1182_v34, %v1181_v26  ;;  %v1214_v42 = vsel %vm1086_vm14, %v1022_v19, %v1150_v31  ;;  %v1025_v43 = vadd.f32 %v2033_v33, %v2256_v35  ;;  %v2002_v45 = vpop.f32.mrb[10].mxu0  ;;  %v2034_v46 = vpop.f32.mrb[10].mxu1 }
  0xf4   :  { %v991_v44 = vadd.f32 %v2256_v35, %v558_v39  ;;  %v1857_v47 = vpack.c.bf16 %v1214_v42, %v1213_v27  ;;  %vm1052_vm15 = vcmp.ge.f32.partialorder %v988_v36, 0.0  ;;  %v1116_v48 = vmul.f32 0.2, %v988_v36  ;;  %v561_v49 = vpop.f32.mrb[11].mxu0  ;;  %v689_v50 = vpop.f32.mrb[11].mxu1 }
  0xf5   :  { %vm1084_vm0 = vcmp.ge.f32.partialorder %v1020_v37, 0.0  ;;  %1921 = vst [vmem:[%s2430_s3 + $0x18] sm:$0xff] %v1777_v41   ;;  %v1148_v51 = vmul.f32 0.2, %v1020_v37  ;;  %vm1057_vm1 = vcmp.ge.f32.partialorder %v993_v38, 0.0  ;;  %vm1089_vm2 = vcmp.ge.f32.partialorder %v1025_v43, 0.0 }
  0xf6   :  { %v1121_v52 = vmul.f32 0.2, %v993_v38  ;;  %1937 = vst [vmem:[%s2430_s3 + $0x98] sm:$0xff] %v1857_v47   ;;  %v1180_v53 = vsel %vm1052_vm15, %v988_v36, %v1116_v48  ;;  %v1153_v54 = vmul.f32 0.2, %v1025_v43  ;;  %vm1055_vm3 = vcmp.ge.f32.partialorder %v991_v44, 0.0 }
  0xf7   :  { %v1119_v55 = vmul.f32 0.2, %v991_v44  ;;  %v1772_v56 = vpack.c.bf16 %v1180_v53, %v1179_v29  ;;  %v1212_v57 = vsel %vm1084_vm0, %v1020_v37, %v1148_v51  ;;  %v1023_v59 = vadd.f32 %v2256_v35, %v686_v40 }
  0xf8   :  { %v1185_v58 = vsel %vm1057_vm1, %v993_v38, %v1121_v52  ;;  %v1852_v60 = vpack.c.bf16 %v1212_v57, %v1211_v30  ;;  %v1217_v61 = vsel %vm1089_vm2, %v1025_v43, %v1153_v54  ;;  %v994_v63 = vadd.f32 %v2002_v45, %v2256_v35 }
  0xf9   :  { %v1183_v62 = vsel %vm1055_vm3, %v991_v44, %v1119_v55  ;;  %1920 = vst [vmem:[%s2430_s3 + $0x10] sm:$0xff] %v1772_v56   ;;  %vm1087_vm4 = vcmp.ge.f32.partialorder %v1023_v59, 0.0  ;;  %v1151_v0 = vmul.f32 0.2, %v1023_v59  ;;  %v1026_v1 = vadd.f32 %v2034_v46, %v2256_v35  ;;  %v2005_v3 = vpop.f32.mrb[12].mxu0  ;;  %v2037_v4 = vpop.f32.mrb[12].mxu1 }
  0xfa   :  { %v992_v2 = vadd.f32 %v2256_v35, %v561_v49  ;;  %1936 = vst [vmem:[%s2430_s3 + $0x90] sm:$0xff] %v1852_v60   ;;  %vm1058_vm5 = vcmp.ge.f32.partialorder %v994_v63, 0.0  ;;  %v1122_v5 = vmul.f32 0.2, %v994_v63  ;;  %v1024_v6 = vadd.f32 %v2256_v35, %v689_v50  ;;  %v574_v8 = vpop.f32.mrb[13].mxu0  ;;  %v702_v9 = vpop.f32.mrb[13].mxu1 }
  0xfb   :  { %v997_v7 = vadd.f32 %v2005_v3, %v2256_v35  ;;  %v1215_v10 = vsel %vm1087_vm4, %v1023_v59, %v1151_v0  ;;  %vm1090_vm6 = vcmp.ge.f32.partialorder %v1026_v1, 0.0  ;;  %v1154_v11 = vmul.f32 0.2, %v1026_v1  ;;  %v2006_v12 = vpop.f32.mrb[14].mxu0  ;;  %v2038_v13 = vpop.f32.mrb[14].mxu1 }
  0xfc   :  { %vm1056_vm7 = vcmp.ge.f32.partialorder %v992_v2, 0.0  ;;  %v1186_v14 = vsel %vm1058_vm5, %v994_v63, %v1122_v5  ;;  %v1120_v15 = vmul.f32 0.2, %v992_v2  ;;  %vm1088_vm8 = vcmp.ge.f32.partialorder %v1024_v6, 0.0  ;;  %v577_v17 = vpop.f32.mrb[15].mxu0  ;;  %v705_v21 = vpop.f32.mrb[15].mxu1 }
  0xfd   :  { %v1152_v16 = vmul.f32 0.2, %v1024_v6  ;;  %v1787_v18 = vpack.c.bf16 %v1186_v14, %v1185_v58  ;;  %v1218_v19 = vsel %vm1090_vm6, %v1026_v1, %v1154_v11  ;;  %vm1061_vm9 = vcmp.ge.f32.partialorder %v997_v7, 0.0 }
  0xfe   :  { %v1125_v20 = vmul.f32 0.2, %v997_v7  ;;  %v1867_v22 = vpack.c.bf16 %v1218_v19, %v1217_v61  ;;  %v1184_v23 = vsel %vm1056_vm7, %v992_v2, %v1120_v15  ;;  %v1029_v25 = vadd.f32 %v2037_v4, %v2256_v35 }
  0xff   :  { %v1216_v24 = vsel %vm1088_vm8, %v1024_v6, %v1152_v16  ;;  %1923 = vst [vmem:[%s2430_s3 + $0x28] sm:$0xff] %v1787_v18   ;;  %v1782_v26 = vpack.c.bf16 %v1184_v23, %v1183_v62  ;;  %v995_v29 = vadd.f32 %v2256_v35, %v574_v8  ;;  %v1027_v31 = vadd.f32 %v2256_v35, %v702_v9 }
 0x100   :  { %v1862_v27 = vpack.c.bf16 %v1216_v24, %v1215_v10  ;;  %v1189_v28 = vsel %vm1061_vm9, %v997_v7, %v1125_v20  ;;  %1939 = vst [vmem:[%s2430_s3 + $0xa8] sm:$0xff] %v1867_v22   ;;  %vm1093_vm10 = vcmp.ge.f32.partialorder %v1029_v25, 0.0  ;;  %v1157_v30 = vmul.f32 0.2, %v1029_v25 }
 0x101   :  { %v998_v32 = vadd.f32 %v2006_v12, %v2256_v35  ;;  %1922 = vst [vmem:[%s2430_s3 + $0x20] sm:$0xff] %v1782_v26   ;;  %vm1059_vm11 = vcmp.ge.f32.partialorder %v995_v29, 0.0  ;;  %v1123_v33 = vmul.f32 0.2, %v995_v29  ;;  %v1030_v34 = vadd.f32 %v2038_v13, %v2256_v35  ;;  %v2009_v37 = vpop.f32.mrb[16].mxu0  ;;  %v2041_v38 = vpop.f32.mrb[16].mxu1 }
 0x102   :  { %1938 = vst [vmem:[%s2430_s3 + $0xa0] sm:$0xff] %v1862_v27   ;;  %v996_v36 = vadd.f32 %v2256_v35, %v577_v17  ;;  %v1221_v39 = vsel %vm1093_vm10, %v1029_v25, %v1157_v30  ;;  %vm1091_vm12 = vcmp.ge.f32.partialorder %v1027_v31, 0.0  ;;  %v1155_v40 = vmul.f32 0.2, %v1027_v31  ;;  %v590_v41 = vpop.f32.mrb[17].mxu0  ;;  %v718_v42 = vpop.f32.mrb[17].mxu1 }
 0x103   :  { %vm1062_vm13 = vcmp.ge.f32.partialorder %v998_v32, 0.0  ;;  %v1187_v43 = vsel %vm1059_vm11, %v995_v29, %v1123_v33  ;;  %v1126_v44 = vmul.f32 0.2, %v998_v32  ;;  %vm1094_vm14 = vcmp.ge.f32.partialorder %v1030_v34, 0.0  ;;  %v2010_v46 = vpop.f32.mrb[18].mxu0  ;;  %v2042_v50 = vpop.f32.mrb[18].mxu1 }
 0x104   :  { %v1158_v45 = vmul.f32 0.2, %v1030_v34  ;;  %v1219_v47 = vsel %vm1091_vm12, %v1027_v31, %v1155_v40  ;;  %vm1060_vm15 = vcmp.ge.f32.partialorder %v996_v36, 0.0  ;;  %v1124_v48 = vmul.f32 0.2, %v996_v36  ;;  %v593_v51 = vpop.f32.mrb[19].mxu0 }
 0x105   :  { %v1028_v49 = vadd.f32 %v2256_v35, %v705_v21  ;;  %v1190_v52 = vsel %vm1062_vm13, %v998_v32, %v1126_v44  ;;  %v1001_v54 = vadd.f32 %v2009_v37, %v2256_v35  ;;  %v1033_v55 = vadd.f32 %v2041_v38, %v2256_v35  ;;  %v721_v56 = vpop.f32.mrb[19].mxu1 }
 0x106   :  { %v1222_v53 = vsel %vm1094_vm14, %v1030_v34, %v1158_v45  ;;  %v1797_v57 = vpack.c.bf16 %v1190_v52, %v1189_v28  ;;  %v1188_v59 = vsel %vm1060_vm15, %v996_v36, %v1124_v48  ;;  %v999_v0 = vadd.f32 %v2256_v35, %v590_v41 }
 0x107   :  { %v1877_v58 = vpack.c.bf16 %v1222_v53, %v1221_v39  ;;  %vm1092_vm0 = vcmp.ge.f32.partialorder %v1028_v49, 0.0  ;;  %v1792_v60 = vpack.c.bf16 %v1188_v59, %v1187_v43  ;;  %v1156_v61 = vmul.f32 0.2, %v1028_v49 }
 0x108   :  { %vm1065_vm1 = vcmp.ge.f32.partialorder %v1001_v54, 0.0  ;;  %v1129_v62 = vmul.f32 0.2, %v1001_v54  ;;  %1925 = vst [vmem:[%s2430_s3 + $0x38] sm:$0xff] %v1797_v57   ;;  %vm1097_vm2 = vcmp.ge.f32.partialorder %v1033_v55, 0.0  ;;  %v1031_v1 = vadd.f32 %v2256_v35, %v718_v42 }
 0x109   :  { %1941 = vst [vmem:[%s2430_s3 + $0xb8] sm:$0xff] %v1877_v58   ;;  %v1161_v63 = vmul.f32 0.2, %v1033_v55  ;;  %1924 = vst [vmem:[%s2430_s3 + $0x30] sm:$0xff] %v1792_v60   ;;  %v1220_v2 = vsel %vm1092_vm0, %v1028_v49, %v1156_v61  ;;  %v1002_v4 = vadd.f32 %v2010_v46, %v2256_v35  ;;  %v1034_v5 = vadd.f32 %v2042_v50, %v2256_v35  ;;  %v2013_v6 = vpop.f32.mrb[20].mxu0  ;;  %v2045_v7 = vpop.f32.mrb[20].mxu1 }
 0x10a   :  { %v1193_v3 = vsel %vm1065_vm1, %v1001_v54, %v1129_v62  ;;  %v1872_v8 = vpack.c.bf16 %v1220_v2, %v1219_v47  ;;  %vm1063_vm3 = vcmp.ge.f32.partialorder %v999_v0, 0.0  ;;  %v1127_v10 = vmul.f32 0.2, %v999_v0  ;;  %v606_v11 = vpop.f32.mrb[21].mxu0  ;;  %v734_v12 = vpop.f32.mrb[21].mxu1 }
 0x10b   :  { %v1225_v9 = vsel %vm1097_vm2, %v1033_v55, %v1161_v63  ;;  %vm1095_vm4 = vcmp.ge.f32.partialorder %v1031_v1, 0.0  ;;  %v1159_v13 = vmul.f32 0.2, %v1031_v1  ;;  %vm1066_vm5 = vcmp.ge.f32.partialorder %v1002_v4, 0.0  ;;  %v2014_v18 = vpop.f32.mrb[22].mxu0  ;;  %v2046_v19 = vpop.f32.mrb[22].mxu1 }
 0x10c   :  { %v1130_v14 = vmul.f32 0.2, %v1002_v4  ;;  %1940 = vst [vmem:[%s2430_s3 + $0xb0] sm:$0xff] %v1872_v8   ;;  %v1191_v15 = vsel %vm1063_vm3, %v999_v0, %v1127_v10  ;;  %vm1098_vm6 = vcmp.ge.f32.partialorder %v1034_v5, 0.0  ;;  %v1162_v16 = vmul.f32 0.2, %v1034_v5 }
 0x10d   :  { %v1000_v17 = vadd.f32 %v2256_v35, %v593_v51  ;;  %v1223_v20 = vsel %vm1095_vm4, %v1031_v1, %v1159_v13  ;;  %v1032_v22 = vadd.f32 %v2256_v35, %v721_v56  ;;  %v1005_v23 = vadd.f32 %v2013_v6, %v2256_v35  ;;  %v609_v24 = vpop.f32.mrb[23].mxu0  ;;  %v737_v25 = vpop.f32.mrb[23].mxu1 }
 0x10e   :  { %v1194_v21 = vsel %vm1066_vm5, %v1002_v4, %v1130_v14  ;;  %v1226_v27 = vsel %vm1098_vm6, %v1034_v5, %v1162_v16  ;;  %v1037_v33 = vadd.f32 %v2045_v7, %v2256_v35  ;;  %v1003_v34 = vadd.f32 %v2256_v35, %v606_v11 }
 0x10f   :  { %v1807_v26 = vpack.c.bf16 %v1194_v21, %v1193_v3  ;;  %vm1064_vm7 = vcmp.ge.f32.partialorder %v1000_v17, 0.0  ;;  %v1128_v28 = vmul.f32 0.2, %v1000_v17  ;;  %v1887_v29 = vpack.c.bf16 %v1226_v27, %v1225_v9 }
 0x110   :  { %vm1096_vm8 = vcmp.ge.f32.partialorder %v1032_v22, 0.0  ;;  %v1160_v30 = vmul.f32 0.2, %v1032_v22  ;;  %vm1069_vm9 = vcmp.ge.f32.partialorder %v1005_v23, 0.0  ;;  %v1133_v32 = vmul.f32 0.2, %v1005_v23 }
 0x111   :  { %1927 = vst [vmem:[%s2430_s3 + $0x48] sm:$0xff] %v1807_v26   ;;  %v1192_v31 = vsel %vm1064_vm7, %v1000_v17, %v1128_v28  ;;  %1943 = vst [vmem:[%s2430_s3 + $0xc8] sm:$0xff] %v1887_v29   ;;  %v1035_v38 = vadd.f32 %v2256_v35, %v734_v12  ;;  %v1006_v39 = vadd.f32 %v2014_v18, %v2256_v35  ;;  %v2017_v40 = vpop.f32.mrb[24].mxu0  ;;  %v2049_v41 = vpop.f32.mrb[24].mxu1  ;;  %vm1101_vm10 = vcmp.ge.f32.partialorder %v1037_v33, 0.0 }
 0x112   :  { %v1802_v36 = vpack.c.bf16 %v1192_v31, %v1191_v15  ;;  %v1224_v37 = vsel %vm1096_vm8, %v1032_v22, %v1160_v30  ;;  %v1165_v43 = vmul.f32 0.2, %v1037_v33  ;;  %v622_v44 = vpop.f32.mrb[25].mxu0  ;;  %v750_v45 = vpop.f32.mrb[25].mxu1  ;;  %v1197_v46 = vsel %vm1069_vm9, %v1005_v23, %v1133_v32 }
 0x113   :  { %v1882_v42 = vpack.c.bf16 %v1224_v37, %v1223_v20  ;;  %vm1067_vm11 = vcmp.ge.f32.partialorder %v1003_v34, 0.0  ;;  %v1131_v47 = vmul.f32 0.2, %v1003_v34  ;;  %v1163_v48 = vmul.f32 0.2, %v1035_v38  ;;  %v2018_v51 = vpop.f32.mrb[26].mxu0 }
 0x114   :  { %1926 = vst [vmem:[%s2430_s3 + $0x40] sm:$0xff] %v1802_v36   ;;  %vm1099_vm12 = vcmp.ge.f32.partialorder %v1035_v38, 0.0  ;;  %vm1070_vm13 = vcmp.ge.f32.partialorder %v1006_v39, 0.0  ;;  %v1134_v49 = vmul.f32 0.2, %v1006_v39  ;;  %v1038_v50 = vadd.f32 %v2046_v19, %v2256_v35  ;;  %v2050_v52 = vpop.f32.mrb[26].mxu1 }
 0x115   :  { %1942 = vst [vmem:[%s2430_s3 + $0xc0] sm:$0xff] %v1882_v42   ;;  %v1229_v53 = vsel %vm1101_vm10, %v1037_v33, %v1165_v43  ;;  %v1195_v54 = vsel %vm1067_vm11, %v1003_v34, %v1131_v47  ;;  %v1004_v55 = vadd.f32 %v2256_v35, %v609_v24  ;;  %v1036_v56 = vadd.f32 %v2256_v35, %v737_v25  ;;  %v625_v57 = vpop.f32.mrb[27].mxu0  ;;  %v753_v58 = vpop.f32.mrb[27].mxu1 }
 0x116   :  { %v1198_v59 = vsel %vm1070_vm13, %v1006_v39, %v1134_v49  ;;  %vm1102_vm14 = vcmp.ge.f32.partialorder %v1038_v50, 0.0  ;;  %v1166_v60 = vmul.f32 0.2, %v1038_v50  ;;  %v1009_v61 = vadd.f32 %v2017_v40, %v2256_v35 }
 0x117   :  { %v1817_v62 = vpack.c.bf16 %v1198_v59, %v1197_v46  ;;  %vm1068_vm15 = vcmp.ge.f32.partialorder %v1004_v55, 0.0  ;;  %v1132_v63 = vmul.f32 0.2, %v1004_v55  ;;  %vm1100_vm0 = vcmp.ge.f32.partialorder %v1036_v56, 0.0 }
 0x118   :  { %v1230_v0 = vsel %vm1102_vm14, %v1038_v50, %v1166_v60  ;;  %v1164_v1 = vmul.f32 0.2, %v1036_v56  ;;  %vm1073_vm1 = vcmp.ge.f32.partialorder %v1009_v61, 0.0  ;;  %v1137_v2 = vmul.f32 0.2, %v1009_v61 }
 0x119   :  { %1929 = vst [vmem:[%s2430_s3 + $0x58] sm:$0xff] %v1817_v62   ;;  %v1897_v3 = vpack.c.bf16 %v1230_v0, %v1229_v53  ;;  %v1196_v4 = vsel %vm1068_vm15, %v1004_v55, %v1132_v63  ;;  %v1041_v5 = vadd.f32 %v2049_v41, %v2256_v35  ;;  %v1007_v6 = vadd.f32 %v2256_v35, %v622_v44  ;;  %v2021_v7 = vpop.f32.mrb[28].mxu0  ;;  %v2053_v8 = vpop.f32.mrb[28].mxu1 }
 0x11a   :  { %v1227_v9 = vsel %vm1099_vm12, %v1035_v38, %v1163_v48  ;;  %v1812_v10 = vpack.c.bf16 %v1196_v4, %v1195_v54  ;;  %v1228_v11 = vsel %vm1100_vm0, %v1036_v56, %v1164_v1  ;;  %v1039_v12 = vadd.f32 %v2256_v35, %v750_v45  ;;  %v638_v13 = vpop.f32.mrb[29].mxu0  ;;  %v766_v14 = vpop.f32.mrb[29].mxu1 }
 0x11b   :  { %1945 = vst [vmem:[%s2430_s3 + $0xd8] sm:$0xff] %v1897_v3   ;;  %v1892_v15 = vpack.c.bf16 %v1228_v11, %v1227_v9  ;;  %vm1105_vm2 = vcmp.ge.f32.partialorder %v1041_v5, 0.0  ;;  %v1169_v16 = vmul.f32 0.2, %v1041_v5  ;;  %vm1071_vm3 = vcmp.ge.f32.partialorder %v1007_v6, 0.0  ;;  %v2022_v17 = vpop.f32.mrb[30].mxu0 }
 0x11c   :  { %v2054_v18 = vpop.f32.mrb[30].mxu1  ;;  %1928 = vst [vmem:[%s2430_s3 + $0x50] sm:$0xff] %v1812_v10   ;;  %v1201_v19 = vsel %vm1073_vm1, %v1009_v61, %v1137_v2  ;;  %v1135_v20 = vmul.f32 0.2, %v1007_v6  ;;  %vm1103_vm4 = vcmp.ge.f32.partialorder %v1039_v12, 0.0  ;;  %v1010_v21 = vadd.f32 %v2018_v51, %v2256_v35  ;;  %v641_v22 = vpop.f32.mrb[31].mxu0 }
 0x11d   :  { %1944 = vst [vmem:[%s2430_s3 + $0xd0] sm:$0xff] %v1892_v15   ;;  %v1167_v23 = vmul.f32 0.2, %v1039_v12  ;;  %v1042_v24 = vadd.f32 %v2050_v52, %v2256_v35  ;;  %v1008_v25 = vadd.f32 %v2256_v35, %v625_v57  ;;  %v1040_v26 = vadd.f32 %v2256_v35, %v753_v58  ;;  %v769_v27 = vpop.f32.mrb[31].mxu1 }
 0x11e   :  { %v1233_v28 = vsel %vm1105_vm2, %v1041_v5, %v1169_v16  ;;  %v1199_v29 = vsel %vm1071_vm3, %v1007_v6, %v1135_v20  ;;  %vm1074_vm5 = vcmp.ge.f32.partialorder %v1010_v21, 0.0  ;;  %v1138_v30 = vmul.f32 0.2, %v1010_v21 }
 0x11f   :  { %vm1106_vm6 = vcmp.ge.f32.partialorder %v1042_v24, 0.0  ;;  %v1170_v31 = vmul.f32 0.2, %v1042_v24  ;;  %vm1072_vm7 = vcmp.ge.f32.partialorder %v1008_v25, 0.0  ;;  %v1136_v32 = vmul.f32 0.2, %v1008_v25 }
 0x120   :  { %v1202_v33 = vsel %vm1074_vm5, %v1010_v21, %v1138_v30  ;;  %vm1104_vm8 = vcmp.ge.f32.partialorder %v1040_v26, 0.0  ;;  %v1168_v34 = vmul.f32 0.2, %v1040_v26  ;;  %v1013_v36 = vadd.f32 %v2021_v7, %v2256_v35 }
 0x121   :  { %v1827_v37 = vpack.c.bf16 %v1202_v33, %v1201_v19  ;;  %v1234_v38 = vsel %vm1106_vm6, %v1042_v24, %v1170_v31  ;;  %v1200_v39 = vsel %vm1072_vm7, %v1008_v25, %v1136_v32  ;;  %v1045_v40 = vadd.f32 %v2053_v8, %v2256_v35 }
 0x122   :  { %v1231_v41 = vsel %vm1103_vm4, %v1039_v12, %v1167_v23  ;;  %v1907_v42 = vpack.c.bf16 %v1234_v38, %v1233_v28  ;;  %v1822_v43 = vpack.c.bf16 %v1200_v39, %v1199_v29  ;;  %v1232_v44 = vsel %vm1104_vm8, %v1040_v26, %v1168_v34 }
 0x123   :  { %1931 = vst [vmem:[%s2430_s3 + $0x68] sm:$0xff] %v1827_v37   ;;  %v1902_v45 = vpack.c.bf16 %v1232_v44, %v1231_v41  ;;  %vm1077_vm9 = vcmp.ge.f32.partialorder %v1013_v36, 0.0  ;;  %v1141_v46 = vmul.f32 0.2, %v1013_v36  ;;  %v1173_v47 = vmul.f32 0.2, %v1045_v40 }
 0x124   :  { %1947 = vst [vmem:[%s2430_s3 + $0xe8] sm:$0xff] %v1907_v42   ;;  %1930 = vst [vmem:[%s2430_s3 + $0x60] sm:$0xff] %v1822_v43   ;;  %v1011_v48 = vadd.f32 %v2256_v35, %v638_v13  ;;  %v1043_v49 = vadd.f32 %v2256_v35, %v766_v14  ;;  %v1014_v50 = vadd.f32 %v2022_v17, %v2256_v35  ;;  %vm1109_vm10 = vcmp.ge.f32.partialorder %v1045_v40, 0.0 }
 0x125   :  { %v1046_v51 = vadd.f32 %v2054_v18, %v2256_v35  ;;  %1946 = vst [vmem:[%s2430_s3 + $0xe0] sm:$0xff] %v1902_v45   ;;  %v1012_v52 = vadd.f32 %v2256_v35, %v641_v22  ;;  %v1044_v53 = vadd.f32 %v2256_v35, %v769_v27  ;;  %v1205_v54 = vsel %vm1077_vm9, %v1013_v36, %v1141_v46 }
 0x126   :  { %vm1075_vm11 = vcmp.ge.f32.partialorder %v1011_v48, 0.0  ;;  %v1139_v55 = vmul.f32 0.2, %v1011_v48  ;;  %v1171_v56 = vmul.f32 0.2, %v1043_v49  ;;  %vm1078_vm12 = vcmp.ge.f32.partialorder %v1014_v50, 0.0 }
 0x127   :  { %v1142_v57 = vmul.f32 0.2, %v1014_v50  ;;  %vm1110_vm13 = vcmp.ge.f32.partialorder %v1046_v51, 0.0  ;;  %v1174_v58 = vmul.f32 0.2, %v1046_v51  ;;  %v1237_v59 = vsel %vm1109_vm10, %v1045_v40, %v1173_v47 }
 0x128   :  { %vm1107_vm14 = vcmp.ge.f32.partialorder %v1043_v49, 0.0  ;;  %vm1076_vm15 = vcmp.ge.f32.partialorder %v1012_v52, 0.0  ;;  %v1140_v60 = vmul.f32 0.2, %v1012_v52  ;;  %vm1108_vm0 = vcmp.ge.f32.partialorder %v1044_v53, 0.0 }
 0x129   :  { %v1206_v61 = vsel %vm1078_vm12, %v1014_v50, %v1142_v57  ;;  %v1238_v62 = vsel %vm1110_vm13, %v1046_v51, %v1174_v58  ;;  %v1172_v63 = vmul.f32 0.2, %v1044_v53  ;;  %v1203_v0 = vsel %vm1075_vm11, %v1011_v48, %v1139_v55 }
 0x12a   :  { %v1837_v1 = vpack.c.bf16 %v1206_v61, %v1205_v54  ;;  %v1917_v2 = vpack.c.bf16 %v1238_v62, %v1237_v59  ;;  %v1204_v35 = vsel %vm1076_vm15, %v1012_v52, %v1140_v60  ;;  %v1235_v3 = vsel %vm1107_vm14, %v1043_v49, %v1171_v56 }
 0x12b   :  { %v1832_v4 = vpack.c.bf16 %v1204_v35, %v1203_v0  ;;  %v1236_v5 = vsel %vm1108_vm0, %v1044_v53, %v1172_v63 }
 0x12c   :  { %1933 = vst [vmem:[%s2430_s3 + $0x78] sm:$0xff] %v1837_v1   ;;  %1949 = vst [vmem:[%s2430_s3 + $0xf8] sm:$0xff] %v1917_v2   ;;  %v1912_v6 = vpack.c.bf16 %v1236_v5, %v1235_v3 }
 0x12d   :  { %1932 = vst [vmem:[%s2430_s3 + $0x70] sm:$0xff] %v1832_v4  }
 0x12e   :  { %1948 = vst [vmem:[%s2430_s3 + $0xf0] sm:$0xff] %v1912_v6  }

// kernel: discriminator_resnet_forward.6
= control target key start
LH: loop header
LB: loop body
LE: loop exit
PB: predicated region body
PF: predicated region fallthrough
CT: control target
= control target key end

     0   :  { %s1465_s12 = smov 0   ;;  %s1467_s13 = smov 0   ;;  %s1639_s0 = inlined_call_operand.vmem [shape: bf16[2,64,1024], index: 0, kind: input, shape index: {}]   ;;  %s1640_s1 = inlined_call_operand.vmem [shape: bf16[1024,128], index: 1, kind: input, shape index: {}]   ;;  %s1641_s2 = inlined_call_operand.vmem [shape: f32[1,128], index: 2, kind: input, shape index: {}]   ;;  %s1642_s3 = inlined_call_operand.vmem [shape: bf16[2,64,128], index: 3, kind: output, shape index: {}]  }
   0x1   :  { %s1469_s14 = smov 0   ;;  %s1471_s15 = smov 0  }
   0x2   :  { %s1473_s16 = smov 0   ;;  %s1475_s17 = smov 0  }
   0x3   :  { %s1477_s18 = smov 0  }
   0x4 LB: > { %s25_s19 = sadd.s32 1, %s1434_s16  ;;  %s32_s20 = sadd.s32 1, %s1438_s17  ;;  %s1442_s18 = sphi %s1477_s18, %s13_s18   ;;  %s1438_s17 = sphi %s1475_s17, %s1648_s17   ;;  %s1434_s16 = sphi %s1473_s16, %s1647_s16   ;;  %s1430_s15 = sphi %s1471_s15, %s1646_s15   ;;  %s1426_s14 = sphi %s1469_s14, %s1645_s14   ;;  %s1422_s13 = sphi %s1467_s13, %s1644_s13   ;;  %s1418_s12 = sphi %s1465_s12, %s1643_s12  }
   0x5   : > { %p26_p0 = scmp.ge.s32.totalorder %s25_s19, 2  ;;  %p48_p1 = scmp.ne.s32.totalorder %s1422_s13, %s1418_s12 }
   0x6   : > { %p49_p2 = scmp.eq.s32.totalorder %s1442_s18, 0  ;;  %s41_s24 = sadd.s32 1, %s1422_s13 }
   0x7   : > { %s1650_s19 = smov (%p26_p0, %s25_s19), 0  ;;  %s1652_s20 = smov (!%p26_p0, %s32_s20), %s1438_s17 }
   0x8   : > { %p50_p3 = por %p49_p2, %p48_p1  ;;  %p34_p4 = scmp.ge.s32.totalorder %s1652_s20, 2 }
   0x9   : > { %s37_s21 = ssub.s32 %s1434_s16, %s1650_s19  ;;  %p1089_p6 = scmp.ge.s32.totalorder %s1442_s18, 4 }
   0xa   : > { %s1654_s20 = smov (%p34_p4, %s1652_s20), 0 }
   0xb   : > { %s36_s22 = ssub.s32 %s1438_s17, %s1654_s20  ;;  %162 = sbr.rel (%p1089_p6) target bundleno = 33 (0x21), region = 20 }
   0xc   : > { %s38_s23 = sor.u32 %s37_s21, %s36_s22 }
   0xd   : > { %p39_p5 = scmp.eq.s32.totalorder %s38_s23, 0 }
   0xf   : > { %s1516_s25 = scalar_select %p39_p5, %s1422_s13, %s41_s24  }
  0x12   : > { %165 = sbr.rel (!%p50_p3) target bundleno = 33 (0x21), region = 24  ;;  %s167_s26 = sand.u32 (%p50_p3), 1, %s1422_s13  }
  0x13   : > { %s1091_s27 = sshll.u32 (%p50_p3), %s1434_s16, 2  ;;  %s1090_s28 = sshll.u32 (%p50_p3), %s167_s26, 7 }
  0x14   : > { %s1092_s29 = sshll.u32 (%p50_p3), %s1438_s17, 6  ;;  %s169_s8 = scalar_lea.vmem (%p50_p3), [#allocation3], %s1090_s28 }
  0x15   : > { %s172_s30 = sadd.s32 (%p50_p3), %s1092_s29, %s1091_s27 }
  0x16   : > { %s1093_s4 = sshll.u32 (%p50_p3), %s172_s30, 2 }
  0x17   : > { %s1525_s7 = scalar_lea.vmem (%p50_p3), %s1639_s0, %s1093_s4 }
  0x18   : > { %v187_v0 = vld [vmem:[%s1525_s7] sm:$0xff] (%p50_p3)  ;;  %v189_v1 = vld [vmem:[%s1525_s7 + $0x8] sm:$0xff] (%p50_p3) }
  0x19   : > { %v191_v2 = vld [vmem:[%s1525_s7 + $0x20] sm:$0xff]  ;;  %188 = vst [vmem:[%s169_s8] sm:$0xff] %v187_v0  ;;  %190 = vst [vmem:[%s169_s8 + $0x8] sm:$0xff] %v189_v1  ;;  %v193_v3 = vld [vmem:[%s1525_s7 + $0x28] sm:$0xff] }
  0x1a   : > { %192 = vst [vmem:[%s169_s8 + $0x10] sm:$0xff] %v191_v2  ;;  %v195_v4 = vld [vmem:[%s1525_s7 + $0x40] sm:$0xff]  ;;  %v197_v5 = vld [vmem:[%s1525_s7 + $0x48] sm:$0xff]  ;;  %194 = vst [vmem:[%s169_s8 + $0x18] sm:$0xff] %v193_v3 }
  0x1b   : > { %196 = vst [vmem:[%s169_s8 + $0x20] sm:$0xff] %v195_v4  ;;  %198 = vst [vmem:[%s169_s8 + $0x28] sm:$0xff] %v197_v5  ;;  %v199_v6 = vld [vmem:[%s1525_s7 + $0x60] sm:$0xff]  ;;  %v201_v7 = vld [vmem:[%s1525_s7 + $0x68] sm:$0xff] }
  0x1c   : > { %v203_v8 = vld [vmem:[%s1525_s7 + $0x80] sm:$0xff]  ;;  %200 = vst [vmem:[%s169_s8 + $0x30] sm:$0xff] %v199_v6  ;;  %202 = vst [vmem:[%s169_s8 + $0x38] sm:$0xff] %v201_v7  ;;  %v205_v9 = vld [vmem:[%s1525_s7 + $0x88] sm:$0xff] }
  0x1d   : > { %204 = vst [vmem:[%s169_s8 + $0x40] sm:$0xff] %v203_v8  ;;  %v207_v10 = vld [vmem:[%s1525_s7 + $0xa0] sm:$0xff]  ;;  %v209_v11 = vld [vmem:[%s1525_s7 + $0xa8] sm:$0xff]  ;;  %206 = vst [vmem:[%s169_s8 + $0x48] sm:$0xff] %v205_v9 }
  0x1e   : > { %208 = vst [vmem:[%s169_s8 + $0x50] sm:$0xff] %v207_v10  ;;  %210 = vst [vmem:[%s169_s8 + $0x58] sm:$0xff] %v209_v11  ;;  %v211_v12 = vld [vmem:[%s1525_s7 + $0xc0] sm:$0xff]  ;;  %v213_v13 = vld [vmem:[%s1525_s7 + $0xc8] sm:$0xff] }
  0x1f   : > { %v215_v14 = vld [vmem:[%s1525_s7 + $0xe0] sm:$0xff]  ;;  %212 = vst [vmem:[%s169_s8 + $0x60] sm:$0xff] %v211_v12  ;;  %214 = vst [vmem:[%s169_s8 + $0x68] sm:$0xff] %v213_v13  ;;  %v217_v15 = vld [vmem:[%s1525_s7 + $0xe8] sm:$0xff] }
  0x20   : > { %216 = vst [vmem:[%s169_s8 + $0x70] sm:$0xff] %v215_v14  ;;  %218 = vst [vmem:[%s169_s8 + $0x78] sm:$0xff] %v217_v15 }
  0x21 PF: > { %p1094_p7 = scmp.ge.s32.totalorder %s1442_s18, 1  ;;  %p235_p8 = scmp.lt.s32.totalorder %s1442_s18, 5 }
  0x23   : > { %p236_p9 = pnand %p1094_p7, %p235_p8 }
  0x24   : > { %s242_s9 = sand.u32 (!%p236_p9), 1, %s1418_s12   ;;  %s1096_s10 = sshll.u32 (!%p236_p9), %s1426_s14, 6 }
  0x25   : > { %239 = sbr.rel (%p236_p9) target bundleno = 418 (0x1a2), region = 51  ;;  %s1095_s11 = sshll.u32 (!%p236_p9), %s242_s9, 7 }
  0x26   : > { %p281_p10 = scmp.lt.s32.totalorder (!%p236_p9), %s1096_s10, 127  ;;  %p292_p11 = scmp.lt.s32.totalorder (!%p236_p9), %s1430_s15, 1 }
  0x27   : > { %s1559_s30 = scalar_lea.vmem (!%p236_p9), [#allocation3], %s1095_s11  ;;  %p1100_p12 = scmp.ne.s32.totalorder (!%p236_p9), %s1426_s14, 0 }
  0x2c   : > { %s1656_s10 = smov (!%p281_p10, %s1096_s10), 127  ;;  %s1658_s15 = smov (!%p292_p11, %s1430_s15), 1 }
  0x2d   : > { %s1097_s21 = sshll.u32 %s1656_s10, 2  ;;  %s1161_s26 = sshll.u32 %s1658_s15, 5  ;;  %v1444_v16 = vmov (!%p1100_p12), 0.0  }
  0x2e   : > { %s1552_s24 = scalar_lea.vmem %s1640_s1, %s1097_s21  ;;  %s1557_s29 = scalar_lea.vmem %s1642_s3, %s1161_s26  ;;  %305 = vst [vmem:[#allocation2] sm:$0xff] (!%p1100_p12), %v1444_v16  ;;  %306 = vst [vmem:[#allocation2 + $0x8] sm:$0xff] (!%p1100_p12), %v1444_v16 }
  0x2f   : > { %304 = sbr.rel (%p1100_p12) target bundleno = 54 (0x36), region = 59  ;;  %307 = vst [vmem:[#allocation2 + $0x10] sm:$0xff] (!%p1100_p12), %v1444_v16  ;;  %308 = vst [vmem:[#allocation2 + $0x18] sm:$0xff] (!%p1100_p12), %v1444_v16 }
  0x30   : > { %309 = vst [vmem:[#allocation2 + $0x20] sm:$0xff] (!%p1100_p12), %v1444_v16  ;;  %310 = vst [vmem:[#allocation2 + $0x28] sm:$0xff] (!%p1100_p12), %v1444_v16 }
  0x31   : > { %311 = vst [vmem:[#allocation2 + $0x30] sm:$0xff] (!%p1100_p12), %v1444_v16  ;;  %312 = vst [vmem:[#allocation2 + $0x38] sm:$0xff] (!%p1100_p12), %v1444_v16 }
  0x36 PF: > { %v1330_v17 = vld [vmem:[%s1552_s24 + $0x40] sm:$0xff]   ;;  %v1334_v21 = vld [vmem:[%s1552_s24 + $0x48] sm:$0xff]   ;;  %v1338_v25 = vld [vmem:[%s1552_s24 + $0x50] sm:$0xff]   ;;  %p1149_p13 = scmp.ne.s32.totalorder %s1426_s14, 1 }
  0x37   : > { %v1331_v18 = vld [vmem:[%s1552_s24 + $0xc0] sm:$0xff]   ;;  %1193 = vmatprep.subr.bf16.mxu0 %v1330_v17  ;;  %v1335_v22 = vld [vmem:[%s1552_s24 + $0xc8] sm:$0xff]   ;;  %v1339_v26 = vld [vmem:[%s1552_s24 + $0xd0] sm:$0xff]  }
  0x38   : > { %v1332_v19 = vld [vmem:[%s1552_s24] sm:$0xff]   ;;  %1233 = vmatprep.subr.bf16.mxu1 %v1331_v18  ;;  %v1336_v23 = vld [vmem:[%s1552_s24 + $0x8] sm:$0xff]   ;;  %v1340_v27 = vld [vmem:[%s1552_s24 + $0x10] sm:$0xff]  }
  0x39   : > { %v1333_v20 = vld [vmem:[%s1552_s24 + $0x80] sm:$0xff]   ;;  %1194 = vmatpush3.bf16.msra.mxu0 %v1332_v19  ;;  %v1337_v24 = vld [vmem:[%s1552_s24 + $0x88] sm:$0xff]   ;;  %v1341_v28 = vld [vmem:[%s1552_s24 + $0x90] sm:$0xff]  }
  0x3a   : > { %1234 = vmatpush3.bf16.msra.mxu1 %v1333_v20  ;;  %1195 = vmatprep.subr.bf16.mxu0 %v1334_v21  ;;  %v1342_v29 = vld [vmem:[%s1552_s24 + $0x58] sm:$0xff]   ;;  %v1346_v33 = vld [vmem:[%s1552_s24 + $0x60] sm:$0xff]   ;;  %v1350_v37 = vld [vmem:[%s1552_s24 + $0x68] sm:$0xff]  }
  0x3b   : > { %1235 = vmatprep.subr.bf16.mxu1 %v1335_v22  ;;  %v1343_v30 = vld [vmem:[%s1552_s24 + $0xd8] sm:$0xff]   ;;  %v1347_v34 = vld [vmem:[%s1552_s24 + $0xe0] sm:$0xff]   ;;  %v1351_v38 = vld [vmem:[%s1552_s24 + $0xe8] sm:$0xff]  }
  0x3c   : > { %v1344_v31 = vld [vmem:[%s1552_s24 + $0x18] sm:$0xff]   ;;  %v1348_v35 = vld [vmem:[%s1552_s24 + $0x20] sm:$0xff]   ;;  %v1352_v39 = vld [vmem:[%s1552_s24 + $0x28] sm:$0xff]  }
  0x3d   : > { %1196 = vmatpush3.bf16.msra.mxu0 %v1336_v23  ;;  %v1345_v32 = vld [vmem:[%s1552_s24 + $0x98] sm:$0xff]   ;;  %v1349_v36 = vld [vmem:[%s1552_s24 + $0xa0] sm:$0xff]   ;;  %v1353_v40 = vld [vmem:[%s1552_s24 + $0xa8] sm:$0xff]  }
  0x3e   : > { %1236 = vmatpush3.bf16.msra.mxu1 %v1337_v24  ;;  %1197 = vmatprep.subr.bf16.mxu0 %v1338_v25  ;;  %v1354_v41 = vld [vmem:[%s1552_s24 + $0x70] sm:$0xff]   ;;  %v1358_v45 = vld [vmem:[%s1552_s24 + $0x78] sm:$0xff]   ;;  %v313_v10 = vld [vmem:[#allocation2] sm:$0xff] }
  0x3f   : > { %1237 = vmatprep.subr.bf16.mxu1 %v1339_v26  ;;  %v1355_v42 = vld [vmem:[%s1552_s24 + $0xf0] sm:$0xff]   ;;  %v1359_v46 = vld [vmem:[%s1552_s24 + $0xf8] sm:$0xff]   ;;  %v314_v15 = vld [vmem:[#allocation2 + $0x8] sm:$0xff] }
  0x40   : > { %v1356_v43 = vld [vmem:[%s1552_s24 + $0x30] sm:$0xff]   ;;  %v1360_v47 = vld [vmem:[%s1552_s24 + $0x38] sm:$0xff]  }
  0x41   : > { %1198 = vmatpush3.bf16.msra.mxu0 %v1340_v27  ;;  %v1357_v44 = vld [vmem:[%s1552_s24 + $0xb0] sm:$0xff]   ;;  %v1361_v48 = vld [vmem:[%s1552_s24 + $0xb8] sm:$0xff]  }
  0x42   : > { %1238 = vmatpush3.bf16.msra.mxu1 %v1341_v28  ;;  %1199 = vmatprep.subr.bf16.mxu0 %v1342_v29  ;;  %v1362_v49 = vld [vmem:[%s1559_s30] ss:$16 sps:$4 sm:$0xff]   ;;  %v1364_v50 = vld [vmem:[%s1559_s30 + $0x4] ss:$16 sps:$4 sm:$0xff]   ;;  %v1365_v51 = vld [vmem:[%s1559_s30 + $0x8] ss:$16 sps:$4 sm:$0xff]  }
  0x43   : > { %1239 = vmatprep.subr.bf16.mxu1 %v1343_v30  ;;  %v1367_v52 = vld [vmem:[%s1559_s30 + $0xc] ss:$16 sps:$4 sm:$0xff]   ;;  %705 = vmatprep.mubr.bf16.mxu0 %v1364_v50  ;;  %v1368_v53 = vld [vmem:[%s1559_s30 + $0x24] ss:$16 sps:$4 sm:$0xff]   ;;  %v1372_v55 = vld [vmem:[%s1559_s30 + $0x20] ss:$16 sps:$4 sm:$0xff]  }
  0x44   : > { %770 = vmatprep.mubr.bf16.mxu1 %v1367_v52  ;;  %v1370_v54 = vld [vmem:[%s1559_s30 + $0x2c] ss:$16 sps:$4 sm:$0xff]   ;;  %v1373_v56 = vld [vmem:[%s1559_s30 + $0x28] ss:$16 sps:$4 sm:$0xff]   ;;  %v1374_v57 = vld [vmem:[%s1559_s30 + $0x44] ss:$16 sps:$4 sm:$0xff]  }
  0x45   : > { %1200 = vmatpush3.bf16.msra.mxu0 %v1344_v31  ;;  %v1376_v58 = vld [vmem:[%s1559_s30 + $0x4c] ss:$16 sps:$4 sm:$0xff]   ;;  %v1378_v59 = vld [vmem:[%s1559_s30 + $0x40] ss:$16 sps:$4 sm:$0xff]   ;;  %v1379_v60 = vld [vmem:[%s1559_s30 + $0x48] ss:$16 sps:$4 sm:$0xff]  }
  0x46   : > { %1240 = vmatpush3.bf16.msra.mxu1 %v1345_v32  ;;  %1201 = vmatprep.subr.bf16.mxu0 %v1346_v33  ;;  %v1380_v61 = vld [vmem:[%s1559_s30 + $0x64] ss:$16 sps:$4 sm:$0xff]   ;;  %v1382_v62 = vld [vmem:[%s1559_s30 + $0x6c] ss:$16 sps:$4 sm:$0xff]   ;;  %v1384_v63 = vld [vmem:[%s1559_s30 + $0x60] ss:$16 sps:$4 sm:$0xff]  }
  0x47   : > { %1241 = vmatprep.subr.bf16.mxu1 %v1347_v34  ;;  %v1385_v0 = vld [vmem:[%s1559_s30 + $0x68] ss:$16 sps:$4 sm:$0xff]   ;;  %v315_v28 = vld [vmem:[#allocation2 + $0x10] sm:$0xff] }
  0x48   : > { %v316_v33 = vld [vmem:[#allocation2 + $0x18] sm:$0xff] }
  0x49   : > { %1202 = vmatpush3.bf16.msra.mxu0 %v1348_v35 }
  0x4a   : > { %1242 = vmatpush3.bf16.msra.mxu1 %v1349_v36  ;;  %1203 = vmatprep.subr.bf16.mxu0 %v1350_v37 }
  0x4b   : > { %1243 = vmatprep.subr.bf16.mxu1 %v1351_v38 }
  0x4d   : > { %1204 = vmatpush3.bf16.msra.mxu0 %v1352_v39 }
  0x4e   : > { %1244 = vmatpush3.bf16.msra.mxu1 %v1353_v40  ;;  %1205 = vmatprep.subr.bf16.mxu0 %v1354_v41 }
  0x4f   : > { %1245 = vmatprep.subr.bf16.mxu1 %v1355_v42 }
  0x51   : > { %1206 = vmatpush3.bf16.msra.mxu0 %v1356_v43 }
  0x52   : > { %1246 = vmatpush3.bf16.msra.mxu1 %v1357_v44  ;;  %1207 = vmatprep.subr.bf16.mxu0 %v1358_v45 }
  0x53   : > { %1247 = vmatprep.subr.bf16.mxu1 %v1359_v46  ;;  %v317_v46 = vld [vmem:[#allocation2 + $0x20] sm:$0xff] }
  0x55   : > { %1208 = vmatpush3.bf16.msra.mxu0 %v1360_v47 }
  0x56   : > { %1248 = vmatpush3.bf16.msra.mxu1 %v1361_v48 }
  0x58   : > { %706 = vmatmul.mubr.bf16.vlgmr.msra.gmra.mrb[0].mxu0 %v1362_v49 }
  0x59   : > { %771 = vmatmul.mubr.bf16.vlgmr.msra.gmra.mrb[0].mxu1 %v1365_v51  ;;  %713 = vmatprep.mubr.bf16.mxu0 %v1368_v53  ;;  %v318_v51 = vld [vmem:[#allocation2 + $0x28] sm:$0xff] }
  0x5a   : > { %778 = vmatprep.mubr.bf16.mxu1 %v1370_v54 }
  0x60   : > { %714 = vmatmul.mubr.bf16.gmra.mrb[4].mxu0 %v1372_v55 }
  0x61   : > { %779 = vmatmul.mubr.bf16.gmra.mrb[4].mxu1 %v1373_v56  ;;  %721 = vmatprep.mubr.bf16.mxu0 %v1374_v57 }
  0x62   : > { %786 = vmatprep.mubr.bf16.mxu1 %v1376_v58 }
  0x68   : > { %722 = vmatmul.mubr.bf16.gmra.mrb[8].mxu0 %v1378_v59 }
  0x69   : > { %787 = vmatmul.mubr.bf16.gmra.mrb[8].mxu1 %v1379_v60  ;;  %729 = vmatprep.mubr.bf16.mxu0 %v1380_v61 }
  0x6a   : > { %794 = vmatprep.mubr.bf16.mxu1 %v1382_v62 }
  0x70   : > { %730 = vmatmul.mubr.bf16.gmra.mrb[12].mxu0 %v1384_v63 }
  0x71   : > { %795 = vmatmul.mubr.bf16.gmra.mrb[12].mxu1 %v1385_v0  ;;  %v319_v0 = vld [vmem:[#allocation2 + $0x30] sm:$0xff] }
 0x12b   : > { %v1209_v1 = vpop.f32.mrb[0].mxu0 }
 0x12c   : > { %v1249_v2 = vpop.f32.mrb[0].mxu1  ;;  %v1210_v3 = vpop.f32.mrb[1].mxu0 }
 0x12d   : > { %v1211_v4 = vadd.f32 %v1210_v3, %v1209_v1  ;;  %v1250_v5 = vpop.f32.mrb[1].mxu1  ;;  %v1212_v6 = vpop.f32.mrb[2].mxu0 }
 0x12e   : > { %v1251_v7 = vadd.f32 %v1250_v5, %v1249_v2  ;;  %v1252_v8 = vpop.f32.mrb[2].mxu1  ;;  %v1213_v9 = vpop.f32.mrb[3].mxu0  ;;  %v320_v5 = vld [vmem:[#allocation2 + $0x38] sm:$0xff] }
 0x12f   : > { %v1214_v11 = vadd.f32 %v1213_v9, %v1212_v6  ;;  %v1253_v12 = vpop.f32.mrb[3].mxu1 }
 0x130   : > { %v773_v13 = vadd.f32 %v1251_v7, %v1211_v4  ;;  %v1254_v14 = vadd.f32 %v1253_v12, %v1252_v8 }
 0x132   : > { %v803_v16 = vadd.f32 %v773_v13, %v313_v10  ;;  %v776_v17 = vadd.f32 %v1254_v14, %v1214_v11  ;;  %v1150_v13 = vld [vmem:[%s1641_s2] ss:$0 sm:$0xff] (!%p1149_p13) }
 0x133   : > { %v1215_v18 = vpop.f32.mrb[4].mxu0 }
 0x134   : > { %811 = vst [vmem:[#allocation2] sm:$0xff] %v803_v16  ;;  %v804_v19 = vadd.f32 %v776_v17, %v314_v15  ;;  %v1255_v20 = vpop.f32.mrb[4].mxu1  ;;  %v1216_v21 = vpop.f32.mrb[5].mxu0 }
 0x135   : > { %v1217_v22 = vadd.f32 %v1216_v21, %v1215_v18  ;;  %v1256_v23 = vpop.f32.mrb[5].mxu1  ;;  %v1218_v24 = vpop.f32.mrb[6].mxu0 }
 0x136   : > { %812 = vst [vmem:[#allocation2 + $0x8] sm:$0xff] %v804_v19  ;;  %v1257_v25 = vadd.f32 %v1256_v23, %v1255_v20  ;;  %v1258_v26 = vpop.f32.mrb[6].mxu1  ;;  %v1219_v27 = vpop.f32.mrb[7].mxu0 }
 0x137   : > { %v1220_v29 = vadd.f32 %v1219_v27, %v1218_v24  ;;  %v1259_v30 = vpop.f32.mrb[7].mxu1 }
 0x138   : > { %v781_v31 = vadd.f32 %v1257_v25, %v1217_v22  ;;  %v1260_v32 = vadd.f32 %v1259_v30, %v1258_v26 }
 0x13a   : > { %v805_v34 = vadd.f32 %v781_v31, %v315_v28  ;;  %v784_v35 = vadd.f32 %v1260_v32, %v1220_v29 }
 0x13b   : > { %v1221_v36 = vpop.f32.mrb[8].mxu0  ;;  %v823_v9 = vld [vmem:[#allocation2] sm:$0xff] (!%p1149_p13) }
 0x13c   : > { %813 = vst [vmem:[#allocation2 + $0x10] sm:$0xff] %v805_v34  ;;  %v806_v37 = vadd.f32 %v784_v35, %v316_v33  ;;  %v1261_v38 = vpop.f32.mrb[8].mxu1  ;;  %v1222_v39 = vpop.f32.mrb[9].mxu0  ;;  %v838_v14 = vadd.f32 (!%p1149_p13), %v1150_v13, %v823_v9 }
 0x13d   : > { %v1223_v40 = vadd.f32 %v1222_v39, %v1221_v36  ;;  %v1262_v41 = vpop.f32.mrb[9].mxu1  ;;  %v1224_v42 = vpop.f32.mrb[10].mxu0  ;;  %v824_v10 = vld [vmem:[#allocation2 + $0x8] sm:$0xff] (!%p1149_p13) }
 0x13e   : > { %814 = vst [vmem:[#allocation2 + $0x18] sm:$0xff] %v806_v37  ;;  %v1263_v43 = vadd.f32 %v1262_v41, %v1261_v38  ;;  %v1264_v44 = vpop.f32.mrb[10].mxu1  ;;  %v1225_v45 = vpop.f32.mrb[11].mxu0  ;;  %v839_v15 = vadd.f32 (!%p1149_p13), %v1150_v13, %v824_v10 }
 0x13f   : > { %v1226_v47 = vadd.f32 %v1225_v45, %v1224_v42  ;;  %v1265_v48 = vpop.f32.mrb[11].mxu1 }
 0x140   : > { %v789_v49 = vadd.f32 %v1263_v43, %v1223_v40  ;;  %v1266_v50 = vadd.f32 %v1265_v48, %v1264_v44  ;;  %v846_v19 = vadd.f32 (!%p1149_p13), %v839_v15, %v838_v14 }
 0x142   : > { %v807_v52 = vadd.f32 %v789_v49, %v317_v46  ;;  %v792_v53 = vadd.f32 %v1266_v50, %v1226_v47 }
 0x143   : > { %v1227_v54 = vpop.f32.mrb[12].mxu0  ;;  %v825_v11 = vld [vmem:[#allocation2 + $0x10] sm:$0xff] (!%p1149_p13) }
 0x144   : > { %815 = vst [vmem:[#allocation2 + $0x20] sm:$0xff] %v807_v52  ;;  %v808_v55 = vadd.f32 %v792_v53, %v318_v51  ;;  %v1267_v56 = vpop.f32.mrb[12].mxu1  ;;  %v1228_v57 = vpop.f32.mrb[13].mxu0  ;;  %v840_v16 = vadd.f32 (!%p1149_p13), %v1150_v13, %v825_v11 }
 0x145   : > { %v1229_v58 = vadd.f32 %v1228_v57, %v1227_v54  ;;  %v1268_v59 = vpop.f32.mrb[13].mxu1  ;;  %v1230_v60 = vpop.f32.mrb[14].mxu0  ;;  %v826_v12 = vld [vmem:[#allocation2 + $0x18] sm:$0xff] (!%p1149_p13) }
 0x146   : > { %816 = vst [vmem:[#allocation2 + $0x28] sm:$0xff] %v808_v55  ;;  %v1269_v61 = vadd.f32 %v1268_v59, %v1267_v56  ;;  %v1270_v62 = vpop.f32.mrb[14].mxu1  ;;  %v1231_v63 = vpop.f32.mrb[15].mxu0  ;;  %v841_v18 = vadd.f32 (!%p1149_p13), %v1150_v13, %v826_v12  ;;  %v847_v22 = vadd.f32 (!%p1149_p13), %v846_v19, %v840_v16 }
 0x147   : > { %v1232_v1 = vadd.f32 %v1231_v63, %v1230_v60  ;;  %v1271_v2 = vpop.f32.mrb[15].mxu1 }
 0x148   : > { %v797_v3 = vadd.f32 %v1269_v61, %v1229_v58  ;;  %v1272_v4 = vadd.f32 %v1271_v2, %v1270_v62  ;;  %822 = sbr.rel (%p1149_p13) target bundleno = 418 (0x1a2), region = 63  ;;  %v848_v25 = vadd.f32 (!%p1149_p13), %v847_v22, %v841_v18 }
 0x14a   : > { %v809_v6 = vadd.f32 %v797_v3, %v319_v0  ;;  %v800_v7 = vadd.f32 %v1272_v4, %v1232_v1 }
 0x14b   : > { %v827_v17 = vld [vmem:[#allocation2 + $0x20] sm:$0xff] (!%p1149_p13) }
 0x14c   : > { %817 = vst [vmem:[#allocation2 + $0x30] sm:$0xff] %v809_v6  ;;  %v810_v8 = vadd.f32 %v800_v7, %v320_v5  ;;  %v842_v21 = vadd.f32 (!%p1149_p13), %v1150_v13, %v827_v17 }
 0x14d   : > { %v828_v20 = vld [vmem:[#allocation2 + $0x28] sm:$0xff] (!%p1149_p13) }
 0x14e   : > { %818 = vst [vmem:[#allocation2 + $0x38] sm:$0xff] %v810_v8  ;;  %v843_v24 = vadd.f32 (!%p1149_p13), %v1150_v13, %v828_v20  ;;  %v849_v28 = vadd.f32 (!%p1149_p13), %v848_v25, %v842_v21 }
 0x150   : > { %v850_v30 = vadd.f32 %v849_v28, %v843_v24 }
 0x153   : > { %v829_v23 = vld [vmem:[#allocation2 + $0x30] sm:$0xff] }
 0x154   : > { %v844_v27 = vadd.f32 %v1150_v13, %v829_v23 }
 0x155   : > { %v830_v26 = vld [vmem:[#allocation2 + $0x38] sm:$0xff] }
 0x156   : > { %v845_v29 = vadd.f32 %v1150_v13, %v830_v26  ;;  %v851_v31 = vadd.f32 %v850_v30, %v844_v27 }
 0x158   : > { %v852_v32 = vadd.f32 %v851_v31, %v845_v29 }
 0x15a   : > { %v853_v33 = vrot.slane %v852_v32, 4 }
 0x15c   : > { %v854_v34 = vadd.f32 %v853_v33, %v852_v32 }
 0x15e   : > { %v855_v35 = vrot.slane %v854_v34, 2 }
 0x160   : > { %v856_v36 = vadd.f32 %v855_v35, %v854_v34 }
 0x162   : > { %v857_v37 = vrot.slane %v856_v36, 1 }
 0x164   : > { %v858_v38 = vadd.f32 %v857_v37, %v856_v36 }
 0x166   : > { %v860_v39 = vmul.f32 0.015625, %v858_v38 }
 0x168   : > { %v861_v40 = vsub.f32 %v838_v14, %v860_v39  ;;  %v862_v41 = vsub.f32 %v839_v15, %v860_v39  ;;  %v863_v42 = vsub.f32 %v840_v16, %v860_v39  ;;  %v864_v43 = vsub.f32 %v841_v18, %v860_v39 }
 0x169   : > { %v865_v44 = vsub.f32 %v842_v21, %v860_v39  ;;  %v866_v48 = vsub.f32 %v843_v24, %v860_v39  ;;  %v867_v51 = vsub.f32 %v844_v27, %v860_v39  ;;  %v868_v54 = vsub.f32 %v845_v29, %v860_v39 }
 0x16a   : > { %v869_v45 = vmul.f32 %v861_v40, %v861_v40  ;;  %v870_v46 = vmul.f32 %v862_v41, %v862_v41  ;;  %v871_v47 = vmul.f32 %v863_v42, %v863_v42  ;;  %v872_v49 = vmul.f32 %v864_v43, %v864_v43 }
 0x16b   : > { %v873_v52 = vmul.f32 %v865_v44, %v865_v44  ;;  %v874_v55 = vmul.f32 %v866_v48, %v866_v48  ;;  %v875_v57 = vmul.f32 %v867_v51, %v867_v51  ;;  %v876_v59 = vmul.f32 %v868_v54, %v868_v54 }
 0x16c   : > { %v877_v50 = vadd.f32 %v870_v46, %v869_v45 }
 0x16e   : > { %v878_v53 = vadd.f32 %v877_v50, %v871_v47 }
 0x170   : > { %v879_v56 = vadd.f32 %v878_v53, %v872_v49 }
 0x172   : > { %v880_v58 = vadd.f32 %v879_v56, %v873_v52 }
 0x174   : > { %v881_v60 = vadd.f32 %v880_v58, %v874_v55 }
 0x176   : > { %v882_v61 = vadd.f32 %v881_v60, %v875_v57 }
 0x178   : > { %v883_v62 = vadd.f32 %v882_v61, %v876_v59 }
 0x17a   : > { %v884_v63 = vrot.slane %v883_v62, 4 }
 0x17c   : > { %v885_v0 = vadd.f32 %v884_v63, %v883_v62 }
 0x17e   : > { %v886_v1 = vrot.slane %v885_v0, 2 }
 0x180   : > { %v887_v2 = vadd.f32 %v886_v1, %v885_v0 }
 0x182   : > { %v888_v3 = vrot.slane %v887_v2, 1 }
 0x184   : > { %v889_v4 = vadd.f32 %v888_v3, %v887_v2 }
 0x186   : > { %v890_v5 = vmul.f32 0.015625, %v889_v4 }
 0x188   : > { %v891_v6 = vadd.f32 1e-05, %v890_v5 }
 0x18a   : > { %1386 = vrsqrt.f32 %v891_v6 }
 0x194   : > { %v1387_v7 = vpop.eup %1386 }
 0x195   : > { %v893_v8 = vmul.f32 %v1387_v7, %v861_v40  ;;  %v894_v9 = vmul.f32 %v1387_v7, %v862_v41  ;;  %v895_v10 = vmul.f32 %v1387_v7, %v863_v42  ;;  %v896_v11 = vmul.f32 %v1387_v7, %v864_v43 }
 0x196   : > { %v897_v12 = vmul.f32 %v1387_v7, %v865_v44  ;;  %v898_v13 = vmul.f32 %v1387_v7, %v866_v48  ;;  %v899_v14 = vmul.f32 %v1387_v7, %v867_v51  ;;  %v900_v15 = vmul.f32 %v1387_v7, %v868_v54 }
 0x197   : > { %vm901_vm0 = vcmp.ge.f32.partialorder %v893_v8, 0.0  ;;  %vm902_vm1 = vcmp.ge.f32.partialorder %v894_v9, 0.0  ;;  %v909_v16 = vmul.f32 0.2, %v893_v8  ;;  %v910_v17 = vmul.f32 0.2, %v894_v9 }
 0x198   : > { %vm903_vm2 = vcmp.ge.f32.partialorder %v895_v10, 0.0  ;;  %vm904_vm3 = vcmp.ge.f32.partialorder %v896_v11, 0.0  ;;  %v911_v18 = vmul.f32 0.2, %v895_v10  ;;  %v912_v19 = vmul.f32 0.2, %v896_v11 }
 0x199   : > { %v917_v20 = vsel %vm901_vm0, %v893_v8, %v909_v16  ;;  %v918_v21 = vsel %vm902_vm1, %v894_v9, %v910_v17  ;;  %vm905_vm4 = vcmp.ge.f32.partialorder %v897_v12, 0.0  ;;  %vm906_vm5 = vcmp.ge.f32.partialorder %v898_v13, 0.0 }
 0x19a   : > { %v1173_v22 = vpack.c.bf16 %v918_v21, %v917_v20  ;;  %v919_v23 = vsel %vm903_vm2, %v895_v10, %v911_v18  ;;  %v920_v24 = vsel %vm904_vm3, %v896_v11, %v912_v19  ;;  %v913_v25 = vmul.f32 0.2, %v897_v12 }
 0x19b   : > { %v1178_v26 = vpack.c.bf16 %v920_v24, %v919_v23  ;;  %v914_v27 = vmul.f32 0.2, %v898_v13  ;;  %vm907_vm6 = vcmp.ge.f32.partialorder %v899_v14, 0.0  ;;  %vm908_vm7 = vcmp.ge.f32.partialorder %v900_v15, 0.0 }
 0x19c   : > { %1174 = vst [vmem:[%s1557_s29] sm:$0xff] %v1173_v22   ;;  %v921_v28 = vsel %vm905_vm4, %v897_v12, %v913_v25  ;;  %v915_v29 = vmul.f32 0.2, %v899_v14  ;;  %v916_v30 = vmul.f32 0.2, %v900_v15 }
 0x19d   : > { %1190 = vst [vmem:[%s1557_s29 + $0x8] sm:$0xff] %v1178_v26   ;;  %v922_v31 = vsel %vm906_vm5, %v898_v13, %v914_v27 }
 0x19e   : > { %v1183_v32 = vpack.c.bf16 %v922_v31, %v921_v28  ;;  %v923_v33 = vsel %vm907_vm6, %v899_v14, %v915_v29  ;;  %v924_v34 = vsel %vm908_vm7, %v900_v15, %v916_v30 }
 0x19f   : > { %v1188_v35 = vpack.c.bf16 %v924_v34, %v923_v33 }
 0x1a0   : > { %1191 = vst [vmem:[%s1557_s29 + $0x10] sm:$0xff] %v1183_v32  }
 0x1a1   : > { %1192 = vst [vmem:[%s1557_s29 + $0x18] sm:$0xff] %v1188_v35  }
 0x1a2 PF: > { %s13_s18 = sadd.s32 1, %s1442_s18   ;;  %s1643_s12 = smov %s1422_s13 }
 0x1a3   : > { %p10_p0 = scmp.ge.s32.totalorder %s13_s18, 6   ;;  %s1644_s13 = smov %s1516_s25 }
 0x1a4   : > { %s1645_s14 = smov %s1434_s16  ;;  %s1646_s15 = smov %s1438_s17 }
 0x1a5   : > { %s1647_s16 = smov %s1650_s19  ;;  %s1648_s17 = smov %s1654_s20 }
 0x1a6   :  { %12 = sbr.rel (!%p10_p0) target bundleno = 4 (0x4), region = 104 }

// kernel: discriminator_resnet_forward.7
= control target key start
LH: loop header
LB: loop body
LE: loop exit
PB: predicated region body
PF: predicated region fallthrough
CT: control target
= control target key end

     0   :  { %s1369_s12 = smov 0   ;;  %s1371_s13 = smov 0   ;;  %s1543_s0 = inlined_call_operand.vmem [shape: bf16[2,16,2048], index: 0, kind: input, shape index: {}]   ;;  %s1544_s1 = inlined_call_operand.vmem [shape: bf16[2048,256], index: 1, kind: input, shape index: {}]   ;;  %s1545_s2 = inlined_call_operand.vmem [shape: f32[1,256], index: 2, kind: input, shape index: {}]   ;;  %s1546_s3 = inlined_call_operand.vmem [shape: bf16[2,16,256], index: 3, kind: output, shape index: {}]  }
   0x1   :  { %s1373_s14 = smov 0   ;;  %s1375_s15 = smov 0  }
   0x2   :  { %s1377_s16 = smov 0   ;;  %s1379_s17 = smov 0  }
   0x3   :  { %s1381_s18 = smov 0  }
   0x4 LB: > { %s25_s19 = sadd.s32 1, %s1338_s16  ;;  %s32_s20 = sadd.s32 1, %s1342_s17  ;;  %s1346_s18 = sphi %s1381_s18, %s13_s18   ;;  %s1342_s17 = sphi %s1379_s17, %s1552_s17   ;;  %s1338_s16 = sphi %s1377_s16, %s1551_s16   ;;  %s1334_s15 = sphi %s1375_s15, %s1550_s15   ;;  %s1330_s14 = sphi %s1373_s14, %s1549_s14   ;;  %s1326_s13 = sphi %s1371_s13, %s1548_s13   ;;  %s1322_s12 = sphi %s1369_s12, %s1547_s12  }
   0x5   : > { %p26_p0 = scmp.ge.s32.totalorder %s25_s19, 4  ;;  %p48_p1 = scmp.ne.s32.totalorder %s1326_s13, %s1322_s12 }
   0x6   : > { %p49_p2 = scmp.eq.s32.totalorder %s1346_s18, 0  ;;  %s41_s24 = sadd.s32 1, %s1326_s13 }
   0x7   : > { %s1554_s19 = smov (%p26_p0, %s25_s19), 0  ;;  %s1556_s20 = smov (!%p26_p0, %s32_s20), %s1342_s17 }
   0x8   : > { %p50_p3 = por %p49_p2, %p48_p1  ;;  %p34_p4 = scmp.ge.s32.totalorder %s1556_s20, 2 }
   0x9   : > { %s37_s21 = ssub.s32 %s1338_s16, %s1554_s19  ;;  %p1035_p6 = scmp.ge.s32.totalorder %s1346_s18, 8 }
   0xa   : > { %s1558_s20 = smov (%p34_p4, %s1556_s20), 0 }
   0xb   : > { %s36_s22 = ssub.s32 %s1342_s17, %s1558_s20  ;;  %164 = sbr.rel (%p1035_p6) target bundleno = 27 (0x1b), region = 20 }
   0xc   : > { %s38_s23 = sor.u32 %s37_s21, %s36_s22 }
   0xd   : > { %p39_p5 = scmp.eq.s32.totalorder %s38_s23, 0 }
   0xf   : > { %s1420_s25 = scalar_select %p39_p5, %s1326_s13, %s41_s24  }
  0x12   : > { %167 = sbr.rel (!%p50_p3) target bundleno = 27 (0x1b), region = 24  ;;  %s169_s26 = sand.u32 (%p50_p3), 1, %s1326_s13  }
  0x13   : > { %s1037_s27 = sshll.u32 (%p50_p3), %s1338_s16, 2  ;;  %s1036_s28 = sshll.u32 (%p50_p3), %s169_s26, 5 }
  0x14   : > { %s1038_s29 = sshll.u32 (%p50_p3), %s1342_s17, 5  ;;  %s171_s8 = scalar_lea.vmem (%p50_p3), [#allocation3], %s1036_s28 }
  0x15   : > { %s174_s30 = sadd.s32 (%p50_p3), %s1038_s29, %s1037_s27 }
  0x16   : > { %s1039_s4 = sshll.u32 (%p50_p3), %s174_s30, 2 }
  0x17   : > { %s176_s7 = scalar_lea.vmem (%p50_p3), %s1543_s0, %s1039_s4 }
  0x18   : > { %v189_v0 = vld [vmem:[%s176_s7] sm:$0xff] (%p50_p3)  ;;  %v191_v1 = vld [vmem:[%s176_s7 + $0x8] sm:$0xff] (%p50_p3) }
  0x19   : > { %v193_v2 = vld [vmem:[%s176_s7 + $0x40] sm:$0xff]  ;;  %190 = vst [vmem:[%s171_s8] sm:$0xff] %v189_v0  ;;  %192 = vst [vmem:[%s171_s8 + $0x8] sm:$0xff] %v191_v1  ;;  %v195_v3 = vld [vmem:[%s176_s7 + $0x48] sm:$0xff] }
  0x1a   : > { %194 = vst [vmem:[%s171_s8 + $0x10] sm:$0xff] %v193_v2  ;;  %196 = vst [vmem:[%s171_s8 + $0x18] sm:$0xff] %v195_v3 }
  0x1b PF: > { %p1040_p7 = scmp.ge.s32.totalorder %s1346_s18, 1  ;;  %p216_p8 = scmp.lt.s32.totalorder %s1346_s18, 9 }
  0x1d   : > { %p217_p9 = pnand %p1040_p7, %p216_p8 }
  0x1e   : > { %s223_s9 = sand.u32 (!%p217_p9), 1, %s1322_s12   ;;  %s1042_s10 = sshll.u32 (!%p217_p9), %s1330_s14, 6 }
  0x1f   : > { %220 = sbr.rel (%p217_p9) target bundleno = 400 (0x190), region = 51  ;;  %s1041_s11 = sshll.u32 (!%p217_p9), %s223_s9, 5 }
  0x20   : > { %p267_p10 = scmp.lt.s32.totalorder (!%p217_p9), %s1042_s10, 255  ;;  %p283_p11 = scmp.lt.s32.totalorder (!%p217_p9), %s1334_s15, 1 }
  0x21   : > { %s1445_s30 = scalar_lea.vmem (!%p217_p9), [#allocation3], %s1041_s11  ;;  %p1047_p12 = scmp.ne.s32.totalorder (!%p217_p9), %s1330_s14, 0 }
  0x26   : > { %s1560_s10 = smov (!%p267_p10, %s1042_s10), 255  ;;  %s1562_s15 = smov (!%p283_p11, %s1334_s15), 1 }
  0x27   : > { %s1121_s21 = sshll.u32 %s1560_s10, 3  ;;  %s1122_s26 = sshll.u32 %s1562_s15, 4  ;;  %v1348_v4 = vmov (!%p1047_p12), 0.0  }
  0x28   : > { %s1438_s24 = scalar_lea.vmem %s1544_s1, %s1121_s21  ;;  %s1443_s29 = scalar_lea.vmem %s1546_s3, %s1122_s26  ;;  %296 = vst [vmem:[#allocation2] sm:$0xff] (!%p1047_p12), %v1348_v4  ;;  %297 = vst [vmem:[#allocation2 + $0x8] sm:$0xff] (!%p1047_p12), %v1348_v4 }
  0x29   : > { %295 = sbr.rel (%p1047_p12) target bundleno = 48 (0x30), region = 59  ;;  %298 = vst [vmem:[#allocation2 + $0x10] sm:$0xff] (!%p1047_p12), %v1348_v4  ;;  %299 = vst [vmem:[#allocation2 + $0x18] sm:$0xff] (!%p1047_p12), %v1348_v4 }
  0x30 PF: > { %v1186_v5 = vld [vmem:[%s1438_s24 + $0x4] ss:$8 sps:$4 sm:$0xff]   ;;  %v1190_v7 = vld [vmem:[%s1438_s24] ss:$8 sps:$4 sm:$0xff]   ;;  %v1192_v9 = vld [vmem:[%s1438_s24 + $0x14] ss:$8 sps:$4 sm:$0xff]  }
  0x31   : > { %v1188_v6 = vld [vmem:[%s1438_s24 + $0x104] ss:$8 sps:$4 sm:$0xff]   ;;  %712 = vmatprep.subr.bf16.mxu1 %v1186_v5  ;;  %v1191_v8 = vld [vmem:[%s1438_s24 + $0x100] ss:$8 sps:$4 sm:$0xff]   ;;  %v1194_v10 = vld [vmem:[%s1438_s24 + $0x114] ss:$8 sps:$4 sm:$0xff]  }
  0x32   : > { %755 = vmatprep.subr.bf16.mxu0 %v1188_v6  ;;  %713 = vmatpush1.bf16.msra.mxu1 %v1190_v7  ;;  %v1196_v11 = vld [vmem:[%s1438_s24 + $0x10] ss:$8 sps:$4 sm:$0xff]   ;;  %v1198_v13 = vld [vmem:[%s1438_s24 + $0x24] ss:$8 sps:$4 sm:$0xff]   ;;  %v1202_v15 = vld [vmem:[%s1438_s24 + $0x20] ss:$8 sps:$4 sm:$0xff]  }
  0x33   : > { %756 = vmatpush1.bf16.msra.mxu0 %v1191_v8  ;;  %714 = vmatprep.subr.bf16.mxu1 %v1192_v9  ;;  %v1197_v12 = vld [vmem:[%s1438_s24 + $0x110] ss:$8 sps:$4 sm:$0xff]   ;;  %v1200_v14 = vld [vmem:[%s1438_s24 + $0x124] ss:$8 sps:$4 sm:$0xff]   ;;  %v1203_v16 = vld [vmem:[%s1438_s24 + $0x120] ss:$8 sps:$4 sm:$0xff]  }
  0x34   : > { %757 = vmatprep.subr.bf16.mxu0 %v1194_v10  ;;  %v1204_v17 = vld [vmem:[%s1438_s24 + $0x34] ss:$8 sps:$4 sm:$0xff]   ;;  %v1208_v19 = vld [vmem:[%s1438_s24 + $0x30] ss:$8 sps:$4 sm:$0xff]   ;;  %v1210_v21 = vld [vmem:[%s1438_s24 + $0x44] ss:$8 sps:$4 sm:$0xff]  }
  0x35   : > { %v1206_v18 = vld [vmem:[%s1438_s24 + $0x134] ss:$8 sps:$4 sm:$0xff]   ;;  %v1209_v20 = vld [vmem:[%s1438_s24 + $0x130] ss:$8 sps:$4 sm:$0xff]   ;;  %v1212_v22 = vld [vmem:[%s1438_s24 + $0x144] ss:$8 sps:$4 sm:$0xff]  }
  0x36   : > { %715 = vmatpush1.bf16.msra.mxu1 %v1196_v11  ;;  %v1214_v23 = vld [vmem:[%s1438_s24 + $0x40] ss:$8 sps:$4 sm:$0xff]   ;;  %v1216_v25 = vld [vmem:[%s1438_s24 + $0x54] ss:$8 sps:$4 sm:$0xff]   ;;  %v1220_v27 = vld [vmem:[%s1438_s24 + $0x50] ss:$8 sps:$4 sm:$0xff]  }
  0x37   : > { %758 = vmatpush1.bf16.msra.mxu0 %v1197_v12  ;;  %716 = vmatprep.subr.bf16.mxu1 %v1198_v13  ;;  %v1215_v24 = vld [vmem:[%s1438_s24 + $0x140] ss:$8 sps:$4 sm:$0xff]   ;;  %v1218_v26 = vld [vmem:[%s1438_s24 + $0x154] ss:$8 sps:$4 sm:$0xff]   ;;  %v1221_v28 = vld [vmem:[%s1438_s24 + $0x150] ss:$8 sps:$4 sm:$0xff]  }
  0x38   : > { %759 = vmatprep.subr.bf16.mxu0 %v1200_v14  ;;  %v1222_v29 = vld [vmem:[%s1438_s24 + $0x64] ss:$8 sps:$4 sm:$0xff]   ;;  %v1226_v31 = vld [vmem:[%s1438_s24 + $0x60] ss:$8 sps:$4 sm:$0xff]   ;;  %v1228_v33 = vld [vmem:[%s1438_s24 + $0x74] ss:$8 sps:$4 sm:$0xff]  }
  0x39   : > { %v1224_v30 = vld [vmem:[%s1438_s24 + $0x164] ss:$8 sps:$4 sm:$0xff]   ;;  %v1227_v32 = vld [vmem:[%s1438_s24 + $0x160] ss:$8 sps:$4 sm:$0xff]   ;;  %v1230_v34 = vld [vmem:[%s1438_s24 + $0x174] ss:$8 sps:$4 sm:$0xff]  }
  0x3a   : > { %717 = vmatpush1.bf16.msra.mxu1 %v1202_v15  ;;  %v1232_v35 = vld [vmem:[%s1438_s24 + $0x70] ss:$8 sps:$4 sm:$0xff]   ;;  %v1234_v37 = vld [vmem:[%s1438_s24 + $0x84] ss:$8 sps:$4 sm:$0xff]   ;;  %v1238_v39 = vld [vmem:[%s1438_s24 + $0x80] ss:$8 sps:$4 sm:$0xff]  }
  0x3b   : > { %760 = vmatpush1.bf16.msra.mxu0 %v1203_v16  ;;  %718 = vmatprep.subr.bf16.mxu1 %v1204_v17  ;;  %v1233_v36 = vld [vmem:[%s1438_s24 + $0x170] ss:$8 sps:$4 sm:$0xff]   ;;  %v1236_v38 = vld [vmem:[%s1438_s24 + $0x184] ss:$8 sps:$4 sm:$0xff]   ;;  %v1239_v40 = vld [vmem:[%s1438_s24 + $0x180] ss:$8 sps:$4 sm:$0xff]  }
  0x3c   : > { %761 = vmatprep.subr.bf16.mxu0 %v1206_v18  ;;  %v1240_v41 = vld [vmem:[%s1438_s24 + $0x94] ss:$8 sps:$4 sm:$0xff]   ;;  %v1244_v43 = vld [vmem:[%s1438_s24 + $0x90] ss:$8 sps:$4 sm:$0xff]   ;;  %v1246_v45 = vld [vmem:[%s1438_s24 + $0xa4] ss:$8 sps:$4 sm:$0xff]  }
  0x3d   : > { %v1242_v42 = vld [vmem:[%s1438_s24 + $0x194] ss:$8 sps:$4 sm:$0xff]   ;;  %v1245_v44 = vld [vmem:[%s1438_s24 + $0x190] ss:$8 sps:$4 sm:$0xff]   ;;  %v1248_v46 = vld [vmem:[%s1438_s24 + $0x1a4] ss:$8 sps:$4 sm:$0xff]  }
  0x3e   : > { %719 = vmatpush1.bf16.msra.mxu1 %v1208_v19  ;;  %v1250_v47 = vld [vmem:[%s1438_s24 + $0xa0] ss:$8 sps:$4 sm:$0xff]   ;;  %v1252_v49 = vld [vmem:[%s1438_s24 + $0xb4] ss:$8 sps:$4 sm:$0xff]   ;;  %v1256_v51 = vld [vmem:[%s1438_s24 + $0xb0] ss:$8 sps:$4 sm:$0xff]  }
  0x3f   : > { %762 = vmatpush1.bf16.msra.mxu0 %v1209_v20  ;;  %720 = vmatprep.subr.bf16.mxu1 %v1210_v21  ;;  %v1251_v48 = vld [vmem:[%s1438_s24 + $0x1a0] ss:$8 sps:$4 sm:$0xff]   ;;  %v1254_v50 = vld [vmem:[%s1438_s24 + $0x1b4] ss:$8 sps:$4 sm:$0xff]   ;;  %v1257_v53 = vld [vmem:[%s1438_s24 + $0x1b0] ss:$8 sps:$4 sm:$0xff]  }
  0x40   : > { %763 = vmatprep.subr.bf16.mxu0 %v1212_v22  ;;  %v1284_v52 = vld [vmem:[%s1445_s30 + $0x4] ss:$16 sps:$4 sm:$0xff]   ;;  %v1287_v56 = vld [vmem:[%s1445_s30 + $0xc] ss:$16 sps:$4 sm:$0xff]   ;;  %v1262_v57 = vld [vmem:[%s1438_s24 + $0xc0] ss:$8 sps:$4 sm:$0xff]  }
  0x41   : > { %v1258_v54 = vld [vmem:[%s1438_s24 + $0xc4] ss:$8 sps:$4 sm:$0xff]   ;;  %744 = vmatprep.mubr.bf16.mxu1 %v1284_v52  ;;  %787 = vmatprep.mubr.bf16.mxu0 %v1287_v56  ;;  %v1263_v58 = vld [vmem:[%s1438_s24 + $0x1c0] ss:$8 sps:$4 sm:$0xff]   ;;  %v1264_v59 = vld [vmem:[%s1438_s24 + $0xd4] ss:$8 sps:$4 sm:$0xff]  }
  0x42   : > { %721 = vmatpush1.bf16.msra.mxu1 %v1214_v23  ;;  %v1260_v55 = vld [vmem:[%s1438_s24 + $0x1c4] ss:$8 sps:$4 sm:$0xff]   ;;  %v1266_v60 = vld [vmem:[%s1438_s24 + $0x1d4] ss:$8 sps:$4 sm:$0xff]   ;;  %v1268_v61 = vld [vmem:[%s1438_s24 + $0xd0] ss:$8 sps:$4 sm:$0xff]  }
  0x43   : > { %764 = vmatpush1.bf16.msra.mxu0 %v1215_v24  ;;  %722 = vmatprep.subr.bf16.mxu1 %v1216_v25  ;;  %v1269_v62 = vld [vmem:[%s1438_s24 + $0x1d0] ss:$8 sps:$4 sm:$0xff]   ;;  %v1270_v63 = vld [vmem:[%s1438_s24 + $0xe4] ss:$8 sps:$4 sm:$0xff]   ;;  %v1274_v1 = vld [vmem:[%s1438_s24 + $0xe0] ss:$8 sps:$4 sm:$0xff]  }
  0x44   : > { %765 = vmatprep.subr.bf16.mxu0 %v1218_v26  ;;  %v1272_v0 = vld [vmem:[%s1438_s24 + $0x1e4] ss:$8 sps:$4 sm:$0xff]   ;;  %v1275_v2 = vld [vmem:[%s1438_s24 + $0x1e0] ss:$8 sps:$4 sm:$0xff]   ;;  %v1276_v3 = vld [vmem:[%s1438_s24 + $0xf4] ss:$8 sps:$4 sm:$0xff]  }
  0x45   : > { %v1278_v4 = vld [vmem:[%s1438_s24 + $0x1f4] ss:$8 sps:$4 sm:$0xff]   ;;  %v1280_v5 = vld [vmem:[%s1438_s24 + $0xf0] ss:$8 sps:$4 sm:$0xff]   ;;  %v300_v10 = vld [vmem:[#allocation2] sm:$0xff]  ;;  %p1116_p13 = scmp.ne.s32.totalorder %s1330_s14, 3 }
  0x46   : > { %723 = vmatpush1.bf16.msra.mxu1 %v1220_v27  ;;  %v1281_v6 = vld [vmem:[%s1438_s24 + $0x1f0] ss:$8 sps:$4 sm:$0xff]   ;;  %v301_v14 = vld [vmem:[#allocation2 + $0x8] sm:$0xff] }
  0x47   : > { %766 = vmatpush1.bf16.msra.mxu0 %v1221_v28  ;;  %724 = vmatprep.subr.bf16.mxu1 %v1222_v29  ;;  %v1282_v7 = vld [vmem:[%s1445_s30] ss:$16 sps:$4 sm:$0xff]   ;;  %v1285_v8 = vld [vmem:[%s1445_s30 + $0x8] ss:$16 sps:$4 sm:$0xff]   ;;  %v816_v29 = vlaneseq (!%p1116_p13) }
  0x48   : > { %767 = vmatprep.subr.bf16.mxu0 %v1224_v30  ;;  %v302_v18 = vld [vmem:[#allocation2 + $0x10] sm:$0xff]  ;;  %v303_v23 = vld [vmem:[#allocation2 + $0x18] sm:$0xff] }
  0x49   : > { %v817_v30 = vshrl.u32 (!%p1116_p13), %v816_v29, 7 }
  0x4a   : > { %725 = vmatpush1.bf16.msra.mxu1 %v1226_v31  ;;  %v814_v31 = vld [vmem:[%s1545_s2] sm:$0x3] (!%p1116_p13) }
  0x4b   : > { %768 = vmatpush1.bf16.msra.mxu0 %v1227_v32  ;;  %726 = vmatprep.subr.bf16.mxu1 %v1228_v33  ;;  %v818_v33 = vsub.s32 (!%p1116_p13), 0, %v817_v30 }
  0x4c   : > { %769 = vmatprep.subr.bf16.mxu0 %v1230_v34  ;;  %v822_v34 = vsub.s32 (!%p1116_p13), 1, %v817_v30 }
  0x4e   : > { %727 = vmatpush1.bf16.msra.mxu1 %v1232_v35 }
  0x4f   : > { %770 = vmatpush1.bf16.msra.mxu0 %v1233_v36  ;;  %728 = vmatprep.subr.bf16.mxu1 %v1234_v37 }
  0x50   : > { %771 = vmatprep.subr.bf16.mxu0 %v1236_v38  ;;  %v819_v38 = vrot.slane (!%p1116_p13), %v814_v31, %v818_v33 }
  0x52   : > { %729 = vmatpush1.bf16.msra.mxu1 %v1238_v39  ;;  %v823_v39 = vrot.slane (!%p1116_p13), %v814_v31, %v822_v34 }
  0x53   : > { %772 = vmatpush1.bf16.msra.mxu0 %v1239_v40  ;;  %730 = vmatprep.subr.bf16.mxu1 %v1240_v41 }
  0x54   : > { %773 = vmatprep.subr.bf16.mxu0 %v1242_v42 }
  0x56   : > { %731 = vmatpush1.bf16.msra.mxu1 %v1244_v43 }
  0x57   : > { %774 = vmatpush1.bf16.msra.mxu0 %v1245_v44  ;;  %732 = vmatprep.subr.bf16.mxu1 %v1246_v45 }
  0x58   : > { %775 = vmatprep.subr.bf16.mxu0 %v1248_v46 }
  0x5a   : > { %733 = vmatpush1.bf16.msra.mxu1 %v1250_v47 }
  0x5b   : > { %776 = vmatpush1.bf16.msra.mxu0 %v1251_v48  ;;  %734 = vmatprep.subr.bf16.mxu1 %v1252_v49 }
  0x5c   : > { %777 = vmatprep.subr.bf16.mxu0 %v1254_v50 }
  0x5e   : > { %735 = vmatpush1.bf16.msra.mxu1 %v1256_v51 }
  0x5f   : > { %778 = vmatpush1.bf16.msra.mxu0 %v1257_v53  ;;  %736 = vmatprep.subr.bf16.mxu1 %v1258_v54 }
  0x60   : > { %779 = vmatprep.subr.bf16.mxu0 %v1260_v55 }
  0x62   : > { %737 = vmatpush1.bf16.msra.mxu1 %v1262_v57 }
  0x63   : > { %780 = vmatpush1.bf16.msra.mxu0 %v1263_v58  ;;  %738 = vmatprep.subr.bf16.mxu1 %v1264_v59 }
  0x64   : > { %781 = vmatprep.subr.bf16.mxu0 %v1266_v60 }
  0x66   : > { %739 = vmatpush1.bf16.msra.mxu1 %v1268_v61 }
  0x67   : > { %782 = vmatpush1.bf16.msra.mxu0 %v1269_v62  ;;  %740 = vmatprep.subr.bf16.mxu1 %v1270_v63 }
  0x68   : > { %783 = vmatprep.subr.bf16.mxu0 %v1272_v0 }
  0x6a   : > { %741 = vmatpush1.bf16.msra.mxu1 %v1274_v1 }
  0x6b   : > { %784 = vmatpush1.bf16.msra.mxu0 %v1275_v2  ;;  %742 = vmatprep.subr.bf16.mxu1 %v1276_v3 }
  0x6c   : > { %785 = vmatprep.subr.bf16.mxu0 %v1278_v4 }
  0x6e   : > { %743 = vmatpush1.bf16.msra.mxu1 %v1280_v5 }
  0x6f   : > { %786 = vmatpush1.bf16.msra.mxu0 %v1281_v6 }
  0x71   : > { %745 = vmatmul.mubr.bf16.vlgmr.msra.gmra.mrb[0].mxu1 %v1282_v7 }
  0x72   : > { %788 = vmatmul.mubr.bf16.vlgmr.msra.gmra.mrb[0].mxu0 %v1285_v8 }
 0x144   : > { %v746_v9 = vpop.f32.mrb[0].mxu1 }
 0x145   : > { %v789_v11 = vpop.f32.mrb[0].mxu0  ;;  %v748_v13 = vpop.f32.mrb[1].mxu1 }
 0x146   : > { %v790_v12 = vadd.f32 %v789_v11, %v746_v9  ;;  %v791_v15 = vpop.f32.mrb[1].mxu0  ;;  %v750_v17 = vpop.f32.mrb[2].mxu1 }
 0x147   : > { %v792_v16 = vadd.f32 %v791_v15, %v748_v13  ;;  %v793_v19 = vpop.f32.mrb[2].mxu0  ;;  %v752_v22 = vpop.f32.mrb[3].mxu1  ;;  %809 = sbr.rel (%p1116_p13) target bundleno = 400 (0x190), region = 63 }
 0x148   : > { %v798_v20 = vadd.f32 %v790_v12, %v300_v10  ;;  %v794_v21 = vadd.f32 %v793_v19, %v750_v17  ;;  %v795_v24 = vpop.f32.mrb[3].mxu0 }
 0x149   : > { %v799_v25 = vadd.f32 %v792_v16, %v301_v14  ;;  %v796_v26 = vadd.f32 %v795_v24, %v752_v22 }
 0x14a   : > { %802 = vst [vmem:[#allocation2] sm:$0xff] %v798_v20  ;;  %v800_v27 = vadd.f32 %v794_v21, %v302_v18 }
 0x14b   : > { %803 = vst [vmem:[#allocation2 + $0x8] sm:$0xff] %v799_v25  ;;  %v801_v28 = vadd.f32 %v796_v26, %v303_v23 }
 0x14c   : > { %804 = vst [vmem:[#allocation2 + $0x10] sm:$0xff] %v800_v27 }
 0x14d   : > { %805 = vst [vmem:[#allocation2 + $0x18] sm:$0xff] %v801_v28 }
 0x151   : > { %v810_v32 = vld [vmem:[#allocation2] sm:$0xff] }
 0x152   : > { %v811_v35 = vld [vmem:[#allocation2 + $0x8] sm:$0xff]  ;;  %v826_v40 = vadd.f32 %v819_v38, %v810_v32 }
 0x153   : > { %v812_v36 = vld [vmem:[#allocation2 + $0x10] sm:$0xff]  ;;  %v827_v41 = vadd.f32 %v823_v39, %v811_v35 }
 0x154   : > { %v813_v37 = vld [vmem:[#allocation2 + $0x18] sm:$0xff]  ;;  %v828_v42 = vadd.f32 %v819_v38, %v812_v36 }
 0x155   : > { %v829_v43 = vadd.f32 %v823_v39, %v813_v37 }
 0x156   : > { %v830_v44 = vadd.f32 %v828_v42, %v826_v40 }
 0x157   : > { %v837_v45 = vadd.f32 %v829_v43, %v827_v41 }
 0x158   : > { %v831_v46 = vrot.slane %v830_v44, 4 }
 0x159   : > { %v838_v47 = vrot.slane %v837_v45, 4 }
 0x15a   : > { %v832_v48 = vadd.f32 %v831_v46, %v830_v44 }
 0x15b   : > { %v839_v49 = vadd.f32 %v838_v47, %v837_v45 }
 0x15c   : > { %v833_v50 = vrot.slane %v832_v48, 2 }
 0x15d   : > { %v840_v51 = vrot.slane %v839_v49, 2 }
 0x15e   : > { %v834_v52 = vadd.f32 %v833_v50, %v832_v48 }
 0x15f   : > { %v841_v53 = vadd.f32 %v840_v51, %v839_v49 }
 0x160   : > { %v835_v54 = vrot.slane %v834_v52, 1 }
 0x161   : > { %v842_v55 = vrot.slane %v841_v53, 1 }
 0x162   : > { %v836_v56 = vadd.f32 %v835_v54, %v834_v52 }
 0x163   : > { %v843_v57 = vadd.f32 %v842_v55, %v841_v53 }
 0x164   : > { %v845_v58 = vmul.f32 0.0625, %v836_v56 }
 0x165   : > { %v846_v59 = vmul.f32 0.0625, %v843_v57 }
 0x166   : > { %v847_v60 = vsub.f32 %v826_v40, %v845_v58  ;;  %v849_v62 = vsub.f32 %v828_v42, %v845_v58 }
 0x167   : > { %v848_v61 = vsub.f32 %v827_v41, %v846_v59  ;;  %v850_v63 = vsub.f32 %v829_v43, %v846_v59 }
 0x168   : > { %v851_v0 = vmul.f32 %v847_v60, %v847_v60  ;;  %v853_v2 = vmul.f32 %v849_v62, %v849_v62 }
 0x169   : > { %v852_v1 = vmul.f32 %v848_v61, %v848_v61  ;;  %v854_v3 = vmul.f32 %v850_v63, %v850_v63 }
 0x16a   : > { %v855_v4 = vadd.f32 %v853_v2, %v851_v0 }
 0x16b   : > { %v862_v5 = vadd.f32 %v854_v3, %v852_v1 }
 0x16c   : > { %v856_v6 = vrot.slane %v855_v4, 4 }
 0x16d   : > { %v863_v7 = vrot.slane %v862_v5, 4 }
 0x16e   : > { %v857_v8 = vadd.f32 %v856_v6, %v855_v4 }
 0x16f   : > { %v864_v9 = vadd.f32 %v863_v7, %v862_v5 }
 0x170   : > { %v858_v10 = vrot.slane %v857_v8, 2 }
 0x171   : > { %v865_v11 = vrot.slane %v864_v9, 2 }
 0x172   : > { %v859_v12 = vadd.f32 %v858_v10, %v857_v8 }
 0x173   : > { %v866_v13 = vadd.f32 %v865_v11, %v864_v9 }
 0x174   : > { %v860_v14 = vrot.slane %v859_v12, 1 }
 0x175   : > { %v867_v15 = vrot.slane %v866_v13, 1 }
 0x176   : > { %v861_v16 = vadd.f32 %v860_v14, %v859_v12 }
 0x177   : > { %v868_v17 = vadd.f32 %v867_v15, %v866_v13 }
 0x178   : > { %v869_v18 = vmul.f32 0.0625, %v861_v16 }
 0x179   : > { %v870_v19 = vmul.f32 0.0625, %v868_v17 }
 0x17a   : > { %v871_v20 = vadd.f32 1e-05, %v869_v18 }
 0x17b   : > { %v872_v21 = vadd.f32 1e-05, %v870_v19 }
 0x17c   : > { %1288 = vrsqrt.f32 %v871_v20 }
 0x17d   : > { %1290 = vrsqrt.f32 %v872_v21 }
 0x186   : > { %v1289_v22 = vpop.eup %1288 }
 0x187   : > { %v1291_v23 = vpop.eup %1290  ;;  %v875_v24 = vmul.f32 %v1289_v22, %v847_v60  ;;  %v877_v25 = vmul.f32 %v1289_v22, %v849_v62 }
 0x188   : > { %v876_v26 = vmul.f32 %v1291_v23, %v848_v61  ;;  %v878_v27 = vmul.f32 %v1291_v23, %v850_v63 }
 0x189   : > { %vm879_vm0 = vcmp.ge.f32.partialorder %v875_v24, 0.0  ;;  %v883_v28 = vmul.f32 0.2, %v875_v24  ;;  %vm881_vm1 = vcmp.ge.f32.partialorder %v877_v25, 0.0  ;;  %v885_v29 = vmul.f32 0.2, %v877_v25 }
 0x18a   : > { %vm880_vm2 = vcmp.ge.f32.partialorder %v876_v26, 0.0  ;;  %v884_v30 = vmul.f32 0.2, %v876_v26  ;;  %vm882_vm3 = vcmp.ge.f32.partialorder %v878_v27, 0.0  ;;  %v886_v31 = vmul.f32 0.2, %v878_v27 }
 0x18b   : > { %v887_v32 = vsel %vm879_vm0, %v875_v24, %v883_v28  ;;  %v889_v33 = vsel %vm881_vm1, %v877_v25, %v885_v29 }
 0x18c   : > { %v888_v34 = vsel %vm880_vm2, %v876_v26, %v884_v30  ;;  %v890_v35 = vsel %vm882_vm3, %v878_v27, %v886_v31 }
 0x18d   : > { %v1123_v36 = vpack.c.bf16 %v888_v34, %v887_v32  ;;  %v1124_v37 = vpack.c.bf16 %v890_v35, %v889_v33 }
 0x18f   : > { %903 = vst [vmem:[%s1443_s29] sm:$0xff] %v1123_v36  ;;  %904 = vst [vmem:[%s1443_s29 + $0x8] sm:$0xff] %v1124_v37 }
 0x190 PF: > { %s13_s18 = sadd.s32 1, %s1346_s18   ;;  %s1547_s12 = smov %s1326_s13 }
 0x191   : > { %p10_p0 = scmp.ge.s32.totalorder %s13_s18, 10   ;;  %s1548_s13 = smov %s1420_s25 }
 0x192   : > { %s1549_s14 = smov %s1338_s16  ;;  %s1550_s15 = smov %s1342_s17 }
 0x193   : > { %s1551_s16 = smov %s1554_s19  ;;  %s1552_s17 = smov %s1558_s20 }
 0x194   :  { %12 = sbr.rel (!%p10_p0) target bundleno = 4 (0x4), region = 104 }

// kernel: discriminator_resnet_forward.8
= control target key start
LH: loop header
LB: loop body
LE: loop exit
PB: predicated region body
PF: predicated region fallthrough
CT: control target
= control target key end

     0   :  { %s1630_s12 = smov 0   ;;  %s1632_s13 = smov 0   ;;  %s1971_s0 = inlined_call_operand.vmem [shape: bf16[2,4,4096], index: 0, kind: input, shape index: {}]   ;;  %s1972_s1 = inlined_call_operand.vmem [shape: bf16[4096,512], index: 1, kind: input, shape index: {}]   ;;  %s1973_s2 = inlined_call_operand.vmem [shape: f32[1,512], index: 2, kind: input, shape index: {}]   ;;  %s1974_s3 = inlined_call_operand.vmem [shape: bf16[2,4,512], index: 3, kind: output, shape index: {}]  }
   0x1   :  { %s1634_s14 = smov 0   ;;  %s1636_s15 = smov 0  }
   0x2   :  { %s1638_s16 = smov 0   ;;  %s1640_s17 = smov 0  }
   0x3   :  { %s1642_s18 = smov 0   ;;  %s1644_s19 = smov 0  }
   0x4   :  { %s1646_s20 = smov 0  }
   0x5 LB: > { %s25_s21 = sadd.s32 1, %s1594_s17  ;;  %s28_s22 = sadd.s32 1, %s1598_s18  ;;  %s1606_s20 = sphi %s1646_s20, %s13_s20   ;;  %s1602_s19 = sphi %s1644_s19, %s1982_s19   ;;  %s1598_s18 = sphi %s1642_s18, %s1981_s18   ;;  %s1594_s17 = sphi %s1640_s17, %s1980_s17   ;;  %s1590_s16 = sphi %s1638_s16, %s1979_s16   ;;  %s1586_s15 = sphi %s1636_s15, %s1978_s15   ;;  %s1582_s14 = sphi %s1634_s14, %s1977_s14   ;;  %s1578_s13 = sphi %s1632_s13, %s1976_s13   ;;  %s1574_s12 = sphi %s1630_s12, %s1975_s12  }
   0x6   : > { %p26_p0 = scmp.ge.s32.totalorder %s25_s21, 8  ;;  %p76_p1 = scmp.ne.s32.totalorder %s1578_s13, %s1574_s12 }
   0x7   : > { %p77_p2 = scmp.eq.s32.totalorder %s1606_s20, 0  ;;  %s32_s23 = sadd.s32 1, %s1602_s19 }
   0x8   : > { %s1984_s21 = smov (%p26_p0, %s25_s21), 0  ;;  %s1986_s22 = smov (!%p26_p0, %s28_s22), %s1598_s18 }
   0x9   : > { %p30_p3 = scmp.ge.s32.totalorder %s1986_s22, 2  ;;  %s64_s24 = ssub.s32 %s1594_s17, %s1984_s21 }
   0xa   : > { %p78_p4 = por %p77_p2, %p76_p1  ;;  %s69_s26 = sadd.s32 1, %s1578_s13 }
   0xb   : > { %s1988_s22 = smov (%p30_p3, %s1986_s22), 0  ;;  %s1990_s23 = smov (!%p30_p3, %s32_s23), %s1602_s19 }
   0xc   : > { %s65_s25 = ssub.s32 %s1598_s18, %s1988_s22  ;;  %p34_p5 = scmp.ge.s32.totalorder %s1990_s23, 2 }
   0xd   : > { %s66_s27 = sor.u32 %s65_s25, %s64_s24  ;;  %p1273_p7 = scmp.ge.s32.totalorder %s1606_s20, 32 }
   0xe   : > { %p67_p6 = scmp.eq.s32.totalorder %s66_s27, 0  ;;  %s1992_s23 = smov (%p34_p5, %s1990_s23), 0 }
   0xf   : > { %156 = sbr.rel (%p1273_p7) target bundleno = 61 (0x3d), region = 16 }
  0x10   : > { %s1695_s28 = scalar_select %p67_p6, %s1578_s13, %s69_s26  }
  0x16   : > { %172 = sbr.rel (!%p78_p4) target bundleno = 61 (0x3d), region = 24  ;;  %s174_s29 = sand.u32 (%p78_p4), 1, %s1578_s13  }
  0x17   : > { %s1276_s30 = sshll.u32 (%p78_p4), %s1598_s18, 1  ;;  %s1274_s4 = sshll.u32 (%p78_p4), %s174_s29, 9 }
  0x18   : > { %s1358_s5 = sshll.u32 (%p78_p4), %s1594_s17, 8  ;;  %s1709_s11 = scalar_lea.vmem (%p78_p4), [#allocation3], %s1274_s4 }
  0x19   : > { %s180_s6 = sadd.s32 (%p78_p4), %s1358_s5, %s1276_s30 }
  0x1a   : > { %s1278_s7 = sshll.u32 (%p78_p4), %s180_s6, 2 }
  0x1b   : > { %s1704_s10 = scalar_lea.vmem (%p78_p4), %s1972_s1, %s1278_s7 }
  0x1c   : > { %v336_v0 = vld [vmem:[%s1704_s10] sm:$0xff] (%p78_p4)  ;;  %v338_v1 = vld [vmem:[%s1704_s10 + $0x10] sm:$0xff] (%p78_p4) }
  0x1d   : > { %v340_v2 = vld [vmem:[%s1704_s10 + $0x20] sm:$0xff]  ;;  %337 = vst [vmem:[%s1709_s11] sm:$0xff] %v336_v0  ;;  %339 = vst [vmem:[%s1709_s11 + $0x8] sm:$0xff] %v338_v1  ;;  %v342_v3 = vld [vmem:[%s1704_s10 + $0x30] sm:$0xff] }
  0x1e   : > { %341 = vst [vmem:[%s1709_s11 + $0x10] sm:$0xff] %v340_v2  ;;  %v344_v4 = vld [vmem:[%s1704_s10 + $0x40] sm:$0xff]  ;;  %v346_v5 = vld [vmem:[%s1704_s10 + $0x50] sm:$0xff]  ;;  %343 = vst [vmem:[%s1709_s11 + $0x18] sm:$0xff] %v342_v3 }
  0x1f   : > { %345 = vst [vmem:[%s1709_s11 + $0x20] sm:$0xff] %v344_v4  ;;  %347 = vst [vmem:[%s1709_s11 + $0x28] sm:$0xff] %v346_v5  ;;  %v348_v6 = vld [vmem:[%s1704_s10 + $0x60] sm:$0xff]  ;;  %v350_v7 = vld [vmem:[%s1704_s10 + $0x70] sm:$0xff] }
  0x20   : > { %v352_v8 = vld [vmem:[%s1704_s10 + $0x80] sm:$0xff]  ;;  %349 = vst [vmem:[%s1709_s11 + $0x30] sm:$0xff] %v348_v6  ;;  %351 = vst [vmem:[%s1709_s11 + $0x38] sm:$0xff] %v350_v7  ;;  %v354_v9 = vld [vmem:[%s1704_s10 + $0x90] sm:$0xff] }
  0x21   : > { %353 = vst [vmem:[%s1709_s11 + $0x40] sm:$0xff] %v352_v8  ;;  %v356_v10 = vld [vmem:[%s1704_s10 + $0xa0] sm:$0xff]  ;;  %v358_v11 = vld [vmem:[%s1704_s10 + $0xb0] sm:$0xff]  ;;  %355 = vst [vmem:[%s1709_s11 + $0x48] sm:$0xff] %v354_v9 }
  0x22   : > { %357 = vst [vmem:[%s1709_s11 + $0x50] sm:$0xff] %v356_v10  ;;  %359 = vst [vmem:[%s1709_s11 + $0x58] sm:$0xff] %v358_v11  ;;  %v360_v12 = vld [vmem:[%s1704_s10 + $0xc0] sm:$0xff]  ;;  %v362_v13 = vld [vmem:[%s1704_s10 + $0xd0] sm:$0xff] }
  0x23   : > { %v364_v14 = vld [vmem:[%s1704_s10 + $0xe0] sm:$0xff]  ;;  %361 = vst [vmem:[%s1709_s11 + $0x60] sm:$0xff] %v360_v12  ;;  %363 = vst [vmem:[%s1709_s11 + $0x68] sm:$0xff] %v362_v13  ;;  %v366_v15 = vld [vmem:[%s1704_s10 + $0xf0] sm:$0xff] }
  0x24   : > { %365 = vst [vmem:[%s1709_s11 + $0x70] sm:$0xff] %v364_v14  ;;  %v368_v16 = vld [vmem:[%s1704_s10 + $0x100] sm:$0xff]  ;;  %v370_v17 = vld [vmem:[%s1704_s10 + $0x110] sm:$0xff]  ;;  %367 = vst [vmem:[%s1709_s11 + $0x78] sm:$0xff] %v366_v15 }
  0x25   : > { %369 = vst [vmem:[%s1709_s11 + $0x80] sm:$0xff] %v368_v16  ;;  %371 = vst [vmem:[%s1709_s11 + $0x88] sm:$0xff] %v370_v17  ;;  %v372_v18 = vld [vmem:[%s1704_s10 + $0x120] sm:$0xff]  ;;  %v374_v19 = vld [vmem:[%s1704_s10 + $0x130] sm:$0xff] }
  0x26   : > { %v376_v20 = vld [vmem:[%s1704_s10 + $0x140] sm:$0xff]  ;;  %373 = vst [vmem:[%s1709_s11 + $0x90] sm:$0xff] %v372_v18  ;;  %375 = vst [vmem:[%s1709_s11 + $0x98] sm:$0xff] %v374_v19  ;;  %v378_v21 = vld [vmem:[%s1704_s10 + $0x150] sm:$0xff] }
  0x27   : > { %377 = vst [vmem:[%s1709_s11 + $0xa0] sm:$0xff] %v376_v20  ;;  %v380_v22 = vld [vmem:[%s1704_s10 + $0x160] sm:$0xff]  ;;  %v382_v23 = vld [vmem:[%s1704_s10 + $0x170] sm:$0xff]  ;;  %379 = vst [vmem:[%s1709_s11 + $0xa8] sm:$0xff] %v378_v21 }
  0x28   : > { %381 = vst [vmem:[%s1709_s11 + $0xb0] sm:$0xff] %v380_v22  ;;  %383 = vst [vmem:[%s1709_s11 + $0xb8] sm:$0xff] %v382_v23  ;;  %v384_v24 = vld [vmem:[%s1704_s10 + $0x180] sm:$0xff]  ;;  %v386_v25 = vld [vmem:[%s1704_s10 + $0x190] sm:$0xff] }
  0x29   : > { %v388_v26 = vld [vmem:[%s1704_s10 + $0x1a0] sm:$0xff]  ;;  %385 = vst [vmem:[%s1709_s11 + $0xc0] sm:$0xff] %v384_v24  ;;  %387 = vst [vmem:[%s1709_s11 + $0xc8] sm:$0xff] %v386_v25  ;;  %v390_v27 = vld [vmem:[%s1704_s10 + $0x1b0] sm:$0xff] }
  0x2a   : > { %389 = vst [vmem:[%s1709_s11 + $0xd0] sm:$0xff] %v388_v26  ;;  %v392_v28 = vld [vmem:[%s1704_s10 + $0x1c0] sm:$0xff]  ;;  %v394_v29 = vld [vmem:[%s1704_s10 + $0x1d0] sm:$0xff]  ;;  %391 = vst [vmem:[%s1709_s11 + $0xd8] sm:$0xff] %v390_v27 }
  0x2b   : > { %393 = vst [vmem:[%s1709_s11 + $0xe0] sm:$0xff] %v392_v28  ;;  %395 = vst [vmem:[%s1709_s11 + $0xe8] sm:$0xff] %v394_v29  ;;  %v396_v30 = vld [vmem:[%s1704_s10 + $0x1e0] sm:$0xff]  ;;  %v398_v31 = vld [vmem:[%s1704_s10 + $0x1f0] sm:$0xff] }
  0x2c   : > { %v400_v32 = vld [vmem:[%s1704_s10 + $0x200] sm:$0xff]  ;;  %397 = vst [vmem:[%s1709_s11 + $0xf0] sm:$0xff] %v396_v30  ;;  %399 = vst [vmem:[%s1709_s11 + $0xf8] sm:$0xff] %v398_v31  ;;  %v402_v33 = vld [vmem:[%s1704_s10 + $0x210] sm:$0xff] }
  0x2d   : > { %401 = vst [vmem:[%s1709_s11 + $0x100] sm:$0xff] %v400_v32  ;;  %v404_v34 = vld [vmem:[%s1704_s10 + $0x220] sm:$0xff]  ;;  %v406_v35 = vld [vmem:[%s1704_s10 + $0x230] sm:$0xff]  ;;  %403 = vst [vmem:[%s1709_s11 + $0x108] sm:$0xff] %v402_v33 }
  0x2e   : > { %405 = vst [vmem:[%s1709_s11 + $0x110] sm:$0xff] %v404_v34  ;;  %407 = vst [vmem:[%s1709_s11 + $0x118] sm:$0xff] %v406_v35  ;;  %v408_v36 = vld [vmem:[%s1704_s10 + $0x240] sm:$0xff]  ;;  %v410_v37 = vld [vmem:[%s1704_s10 + $0x250] sm:$0xff] }
  0x2f   : > { %v412_v38 = vld [vmem:[%s1704_s10 + $0x260] sm:$0xff]  ;;  %409 = vst [vmem:[%s1709_s11 + $0x120] sm:$0xff] %v408_v36  ;;  %411 = vst [vmem:[%s1709_s11 + $0x128] sm:$0xff] %v410_v37  ;;  %v414_v39 = vld [vmem:[%s1704_s10 + $0x270] sm:$0xff] }
  0x30   : > { %413 = vst [vmem:[%s1709_s11 + $0x130] sm:$0xff] %v412_v38  ;;  %v416_v40 = vld [vmem:[%s1704_s10 + $0x280] sm:$0xff]  ;;  %v418_v41 = vld [vmem:[%s1704_s10 + $0x290] sm:$0xff]  ;;  %415 = vst [vmem:[%s1709_s11 + $0x138] sm:$0xff] %v414_v39 }
  0x31   : > { %417 = vst [vmem:[%s1709_s11 + $0x140] sm:$0xff] %v416_v40  ;;  %419 = vst [vmem:[%s1709_s11 + $0x148] sm:$0xff] %v418_v41  ;;  %v420_v42 = vld [vmem:[%s1704_s10 + $0x2a0] sm:$0xff]  ;;  %v422_v43 = vld [vmem:[%s1704_s10 + $0x2b0] sm:$0xff] }
  0x32   : > { %v424_v44 = vld [vmem:[%s1704_s10 + $0x2c0] sm:$0xff]  ;;  %421 = vst [vmem:[%s1709_s11 + $0x150] sm:$0xff] %v420_v42  ;;  %423 = vst [vmem:[%s1709_s11 + $0x158] sm:$0xff] %v422_v43  ;;  %v426_v45 = vld [vmem:[%s1704_s10 + $0x2d0] sm:$0xff] }
  0x33   : > { %425 = vst [vmem:[%s1709_s11 + $0x160] sm:$0xff] %v424_v44  ;;  %v428_v46 = vld [vmem:[%s1704_s10 + $0x2e0] sm:$0xff]  ;;  %v430_v47 = vld [vmem:[%s1704_s10 + $0x2f0] sm:$0xff]  ;;  %427 = vst [vmem:[%s1709_s11 + $0x168] sm:$0xff] %v426_v45 }
  0x34   : > { %429 = vst [vmem:[%s1709_s11 + $0x170] sm:$0xff] %v428_v46  ;;  %431 = vst [vmem:[%s1709_s11 + $0x178] sm:$0xff] %v430_v47  ;;  %v432_v48 = vld [vmem:[%s1704_s10 + $0x300] sm:$0xff]  ;;  %v434_v49 = vld [vmem:[%s1704_s10 + $0x310] sm:$0xff] }
  0x35   : > { %v436_v50 = vld [vmem:[%s1704_s10 + $0x320] sm:$0xff]  ;;  %433 = vst [vmem:[%s1709_s11 + $0x180] sm:$0xff] %v432_v48  ;;  %435 = vst [vmem:[%s1709_s11 + $0x188] sm:$0xff] %v434_v49  ;;  %v438_v51 = vld [vmem:[%s1704_s10 + $0x330] sm:$0xff] }
  0x36   : > { %437 = vst [vmem:[%s1709_s11 + $0x190] sm:$0xff] %v436_v50  ;;  %v440_v52 = vld [vmem:[%s1704_s10 + $0x340] sm:$0xff]  ;;  %v442_v53 = vld [vmem:[%s1704_s10 + $0x350] sm:$0xff]  ;;  %439 = vst [vmem:[%s1709_s11 + $0x198] sm:$0xff] %v438_v51 }
  0x37   : > { %441 = vst [vmem:[%s1709_s11 + $0x1a0] sm:$0xff] %v440_v52  ;;  %443 = vst [vmem:[%s1709_s11 + $0x1a8] sm:$0xff] %v442_v53  ;;  %v444_v54 = vld [vmem:[%s1704_s10 + $0x360] sm:$0xff]  ;;  %v446_v55 = vld [vmem:[%s1704_s10 + $0x370] sm:$0xff] }
  0x38   : > { %v448_v56 = vld [vmem:[%s1704_s10 + $0x380] sm:$0xff]  ;;  %445 = vst [vmem:[%s1709_s11 + $0x1b0] sm:$0xff] %v444_v54  ;;  %447 = vst [vmem:[%s1709_s11 + $0x1b8] sm:$0xff] %v446_v55  ;;  %v450_v57 = vld [vmem:[%s1704_s10 + $0x390] sm:$0xff] }
  0x39   : > { %449 = vst [vmem:[%s1709_s11 + $0x1c0] sm:$0xff] %v448_v56  ;;  %v452_v58 = vld [vmem:[%s1704_s10 + $0x3a0] sm:$0xff]  ;;  %v454_v59 = vld [vmem:[%s1704_s10 + $0x3b0] sm:$0xff]  ;;  %451 = vst [vmem:[%s1709_s11 + $0x1c8] sm:$0xff] %v450_v57 }
  0x3a   : > { %453 = vst [vmem:[%s1709_s11 + $0x1d0] sm:$0xff] %v452_v58  ;;  %455 = vst [vmem:[%s1709_s11 + $0x1d8] sm:$0xff] %v454_v59  ;;  %v456_v60 = vld [vmem:[%s1704_s10 + $0x3c0] sm:$0xff]  ;;  %v458_v61 = vld [vmem:[%s1704_s10 + $0x3d0] sm:$0xff] }
  0x3b   : > { %v460_v62 = vld [vmem:[%s1704_s10 + $0x3e0] sm:$0xff]  ;;  %457 = vst [vmem:[%s1709_s11 + $0x1e0] sm:$0xff] %v456_v60  ;;  %459 = vst [vmem:[%s1709_s11 + $0x1e8] sm:$0xff] %v458_v61  ;;  %v462_v63 = vld [vmem:[%s1704_s10 + $0x3f0] sm:$0xff] }
  0x3c   : > { %461 = vst [vmem:[%s1709_s11 + $0x1f0] sm:$0xff] %v460_v62  ;;  %463 = vst [vmem:[%s1709_s11 + $0x1f8] sm:$0xff] %v462_v63 }
  0x3d PF: > { %p1279_p8 = scmp.ge.s32.totalorder %s1606_s20, 1  ;;  %p476_p9 = scmp.lt.s32.totalorder %s1606_s20, 33 }
  0x3f   : > { %p477_p10 = pnand %p1279_p8, %p476_p9 }
  0x40   : > { %s483_s24 = sand.u32 (!%p477_p10), 1, %s1574_s12   ;;  %s1281_s25 = sshll.u32 (!%p477_p10), %s1582_s14, 2 }
  0x41   : > { %480 = sbr.rel (%p477_p10) target bundleno = 445 (0x1bd), region = 66  ;;  %s1280_s26 = sshll.u32 (!%p477_p10), %s483_s24, 9 }
  0x42   : > { %p524_p11 = scmp.lt.s32.totalorder (!%p477_p10), %s1590_s16, 1  ;;  %p526_p12 = scmp.lt.s32.totalorder (!%p477_p10), %s1281_s25, 31 }
  0x43   : > { %s1284_s29 = sshll.u32 (!%p477_p10), %s1586_s15, 1  ;;  %p1288_p0 = scmp.ne.s32.totalorder (!%p477_p10), %s1582_s14, 0 }
  0x44   : > { %p536_p13 = scmp.lt.s32.totalorder (!%p477_p10), %s1284_s29, 3 }
  0x48   : > { %s1994_s16 = smov (!%p524_p11, %s1590_s16), 1  ;;  %s1996_s25 = smov (!%p526_p12, %s1281_s25), 31 }
  0x49   : > { %s1282_s27 = sshll.u32 %s1994_s16, 5  ;;  %s1286_s8 = sshll.u32 %s1994_s16, 2  ;;  %v1608_v0 = vmov (!%p1288_p0), 0.0  }
  0x4a   : > { %s529_s30 = sadd.s32 %s1282_s27, %s1996_s25  ;;  %s1998_s29 = smov (!%p536_p13, %s1284_s29), 3  ;;  %554 = vst [vmem:[#allocation2] sm:$0xff] (!%p1288_p0), %v1608_v0 }
  0x4b   : > { %s1283_s4 = sshll.u32 %s529_s30, 1  ;;  %s538_s10 = scalar_lea.vmem %s1973_s2, %s1998_s29 }
  0x4c   : > { %s1846_s7 = scalar_lea.vmem %s1971_s0, %s1283_s4  ;;  %s546_s11 = sadd.s32 %s1286_s8, %s1998_s29 }
  0x4d   : > { %s1287_s24 = sshll.u32 %s546_s11, 1  ;;  %s1860_s30 = scalar_lea.vmem [#allocation3], %s1280_s26 }
  0x4e   : > { %s1858_s27 = scalar_lea.vmem %s1974_s3, %s1287_s24  ;;  %553 = sbr.rel (%p1288_p0) target bundleno = 85 (0x55), region = 74 }
  0x55 PF: > { %v1435_v1 = vld [vmem:[%s1860_s30 + $0x4] ss:$8 sps:$4 sm:$0xff]   ;;  %v1439_v3 = vld [vmem:[%s1860_s30] ss:$8 sps:$4 sm:$0xff]   ;;  %v1441_v5 = vld [vmem:[%s1860_s30 + $0x14] ss:$8 sps:$4 sm:$0xff]   ;;  %v626_v39 = vlaneseq }
  0x56   : > { %v1437_v2 = vld [vmem:[%s1860_s30 + $0x104] ss:$8 sps:$4 sm:$0xff]   ;;  %963 = vmatprep.subr.bf16.mxu1 %v1435_v1  ;;  %v1440_v4 = vld [vmem:[%s1860_s30 + $0x100] ss:$8 sps:$4 sm:$0xff]   ;;  %v1443_v6 = vld [vmem:[%s1860_s30 + $0x114] ss:$8 sps:$4 sm:$0xff]  }
  0x57   : > { %1004 = vmatprep.subr.bf16.mxu0 %v1437_v2  ;;  %964 = vmatpush1.bf16.msra.mxu1 %v1439_v3  ;;  %v1445_v7 = vld [vmem:[%s1860_s30 + $0x10] ss:$8 sps:$4 sm:$0xff]   ;;  %v1447_v9 = vld [vmem:[%s1860_s30 + $0x24] ss:$8 sps:$4 sm:$0xff]   ;;  %v1451_v11 = vld [vmem:[%s1860_s30 + $0x20] ss:$8 sps:$4 sm:$0xff]  }
  0x58   : > { %1005 = vmatpush1.bf16.msra.mxu0 %v1440_v4  ;;  %965 = vmatprep.subr.bf16.mxu1 %v1441_v5  ;;  %v1446_v8 = vld [vmem:[%s1860_s30 + $0x110] ss:$8 sps:$4 sm:$0xff]   ;;  %v1449_v10 = vld [vmem:[%s1860_s30 + $0x124] ss:$8 sps:$4 sm:$0xff]   ;;  %v1452_v12 = vld [vmem:[%s1860_s30 + $0x120] ss:$8 sps:$4 sm:$0xff]  }
  0x59   : > { %1006 = vmatprep.subr.bf16.mxu0 %v1443_v6  ;;  %v1453_v13 = vld [vmem:[%s1860_s30 + $0x34] ss:$8 sps:$4 sm:$0xff]   ;;  %v1457_v15 = vld [vmem:[%s1860_s30 + $0x30] ss:$8 sps:$4 sm:$0xff]   ;;  %v1459_v17 = vld [vmem:[%s1860_s30 + $0x44] ss:$8 sps:$4 sm:$0xff]  }
  0x5a   : > { %v1455_v14 = vld [vmem:[%s1860_s30 + $0x134] ss:$8 sps:$4 sm:$0xff]   ;;  %v1458_v16 = vld [vmem:[%s1860_s30 + $0x130] ss:$8 sps:$4 sm:$0xff]   ;;  %v1461_v18 = vld [vmem:[%s1860_s30 + $0x144] ss:$8 sps:$4 sm:$0xff]  }
  0x5b   : > { %966 = vmatpush1.bf16.msra.mxu1 %v1445_v7  ;;  %v1463_v19 = vld [vmem:[%s1860_s30 + $0x40] ss:$8 sps:$4 sm:$0xff]   ;;  %v1465_v21 = vld [vmem:[%s1860_s30 + $0x54] ss:$8 sps:$4 sm:$0xff]   ;;  %v1469_v23 = vld [vmem:[%s1860_s30 + $0x50] ss:$8 sps:$4 sm:$0xff]  }
  0x5c   : > { %1007 = vmatpush1.bf16.msra.mxu0 %v1446_v8  ;;  %967 = vmatprep.subr.bf16.mxu1 %v1447_v9  ;;  %v1464_v20 = vld [vmem:[%s1860_s30 + $0x140] ss:$8 sps:$4 sm:$0xff]   ;;  %v1467_v22 = vld [vmem:[%s1860_s30 + $0x154] ss:$8 sps:$4 sm:$0xff]   ;;  %v1470_v24 = vld [vmem:[%s1860_s30 + $0x150] ss:$8 sps:$4 sm:$0xff]  }
  0x5d   : > { %1008 = vmatprep.subr.bf16.mxu0 %v1449_v10  ;;  %v1471_v25 = vld [vmem:[%s1860_s30 + $0x64] ss:$8 sps:$4 sm:$0xff]   ;;  %v1475_v27 = vld [vmem:[%s1860_s30 + $0x60] ss:$8 sps:$4 sm:$0xff]   ;;  %v1477_v29 = vld [vmem:[%s1860_s30 + $0x74] ss:$8 sps:$4 sm:$0xff]  }
  0x5e   : > { %v1473_v26 = vld [vmem:[%s1860_s30 + $0x164] ss:$8 sps:$4 sm:$0xff]   ;;  %v1476_v28 = vld [vmem:[%s1860_s30 + $0x160] ss:$8 sps:$4 sm:$0xff]   ;;  %v1479_v30 = vld [vmem:[%s1860_s30 + $0x174] ss:$8 sps:$4 sm:$0xff]  }
  0x5f   : > { %968 = vmatpush1.bf16.msra.mxu1 %v1451_v11  ;;  %v1481_v31 = vld [vmem:[%s1860_s30 + $0x70] ss:$8 sps:$4 sm:$0xff]   ;;  %v1483_v33 = vld [vmem:[%s1860_s30 + $0x84] ss:$8 sps:$4 sm:$0xff]   ;;  %v1487_v35 = vld [vmem:[%s1860_s30 + $0x80] ss:$8 sps:$4 sm:$0xff]  }
  0x60   : > { %1009 = vmatpush1.bf16.msra.mxu0 %v1452_v12  ;;  %969 = vmatprep.subr.bf16.mxu1 %v1453_v13  ;;  %v1482_v32 = vld [vmem:[%s1860_s30 + $0x170] ss:$8 sps:$4 sm:$0xff]   ;;  %v1485_v34 = vld [vmem:[%s1860_s30 + $0x184] ss:$8 sps:$4 sm:$0xff]   ;;  %v1488_v36 = vld [vmem:[%s1860_s30 + $0x180] ss:$8 sps:$4 sm:$0xff]  }
  0x61   : > { %1010 = vmatprep.subr.bf16.mxu0 %v1455_v14  ;;  %v1609_v37 = vmov 1983009808   ;;  %v1489_v40 = vld [vmem:[%s1860_s30 + $0x94] ss:$8 sps:$4 sm:$0xff]   ;;  %v1493_v42 = vld [vmem:[%s1860_s30 + $0x90] ss:$8 sps:$4 sm:$0xff]  }
  0x62   : > { %v624_v38 = vunpack.c.l.s4 %v1609_v37  ;;  %v1491_v41 = vld [vmem:[%s1860_s30 + $0x194] ss:$8 sps:$4 sm:$0xff]   ;;  %v1902_v44 = vshrl.u32 %v626_v39, 7  ;;  %v1494_v45 = vld [vmem:[%s1860_s30 + $0x190] ss:$8 sps:$4 sm:$0xff]   ;;  %p1353_p1 = scmp.ne.s32.totalorder %s1582_s14, 7 }
  0x63   : > { %970 = vmatpush1.bf16.msra.mxu1 %v1457_v15  ;;  %v1495_v46 = vld [vmem:[%s1860_s30 + $0xa4] ss:$8 sps:$4 sm:$0xff]   ;;  %v1499_v48 = vld [vmem:[%s1860_s30 + $0xa0] ss:$8 sps:$4 sm:$0xff]   ;;  %v1501_v51 = vld [vmem:[%s1860_s30 + $0xb4] ss:$8 sps:$4 sm:$0xff]  }
  0x64   : > { %1011 = vmatpush1.bf16.msra.mxu0 %v1458_v16  ;;  %971 = vmatprep.subr.bf16.mxu1 %v1459_v17  ;;  %v625_v43 = vunpack.c.0.s8 %v624_v38  ;;  %v1497_v47 = vld [vmem:[%s1860_s30 + $0x1a4] ss:$8 sps:$4 sm:$0xff]   ;;  %v1500_v49 = vld [vmem:[%s1860_s30 + $0x1a0] ss:$8 sps:$4 sm:$0xff]   ;;  %v1503_v52 = vld [vmem:[%s1860_s30 + $0x1b4] ss:$8 sps:$4 sm:$0xff]  }
  0x65   : > { %1012 = vmatprep.subr.bf16.mxu0 %v1461_v18  ;;  %v556_v53 = vld [vmem:[%s1846_s7] sm:$0xff]  ;;  %v1507_v58 = vld [vmem:[%s1860_s30 + $0xc4] ss:$8 sps:$4 sm:$0xff]   ;;  %v1511_v63 = vld [vmem:[%s1860_s30 + $0xc0] ss:$8 sps:$4 sm:$0xff]   ;;  %vm1072_vm0 = vcmask (!%p1353_p1), 1043456  }
  0x66   : > { %v628_v50 = vsub.s32 %v625_v43, %v1902_v44  ;;  %v622_v55 = vcombine.high %v556_v53, %v556_v53  ;;  %v1505_v56 = vld [vmem:[%s1860_s30 + $0xb0] ss:$8 sps:$4 sm:$0xff]   ;;  %v1509_v59 = vld [vmem:[%s1860_s30 + $0x1c4] ss:$8 sps:$4 sm:$0xff]   ;;  %v1512_v0 = vld [vmem:[%s1860_s30 + $0x1c0] ss:$8 sps:$4 sm:$0xff]  }
  0x67   : > { %972 = vmatpush1.bf16.msra.mxu1 %v1463_v19  ;;  %v1506_v57 = vld [vmem:[%s1860_s30 + $0x1b0] ss:$8 sps:$4 sm:$0xff]   ;;  %v1513_v1 = vld [vmem:[%s1860_s30 + $0xd4] ss:$8 sps:$4 sm:$0xff]   ;;  %v1519_v5 = vld [vmem:[%s1860_s30 + $0xe4] ss:$8 sps:$4 sm:$0xff]  }
  0x68   : > { %1013 = vmatpush1.bf16.msra.mxu0 %v1464_v20  ;;  %973 = vmatprep.subr.bf16.mxu1 %v1465_v21  ;;  %v629_v54 = vrot.slane %v556_v53, %v628_v50  ;;  %v636_v61 = vrot.slane %v622_v55, %v628_v50  ;;  %v1515_v2 = vld [vmem:[%s1860_s30 + $0x1d4] ss:$8 sps:$4 sm:$0xff]   ;;  %v1517_v3 = vld [vmem:[%s1860_s30 + $0xd0] ss:$8 sps:$4 sm:$0xff]   ;;  %v1521_v6 = vld [vmem:[%s1860_s30 + $0x1e4] ss:$8 sps:$4 sm:$0xff]  }
  0x69   : > { %1014 = vmatprep.subr.bf16.mxu0 %v1467_v22  ;;  %v1518_v4 = vld [vmem:[%s1860_s30 + $0x1d0] ss:$8 sps:$4 sm:$0xff]   ;;  %v1523_v7 = vld [vmem:[%s1860_s30 + $0xe0] ss:$8 sps:$4 sm:$0xff]   ;;  %v1525_v9 = vld [vmem:[%s1860_s30 + $0xf4] ss:$8 sps:$4 sm:$0xff]  }
  0x6a   : > { %v637_v60 = vcombine.high %v629_v54, %v629_v54  ;;  %v638_v62 = vcombine.high %v636_v61, %v636_v61  ;;  %v1524_v8 = vld [vmem:[%s1860_s30 + $0x1e0] ss:$8 sps:$4 sm:$0xff]   ;;  %v1527_v10 = vld [vmem:[%s1860_s30 + $0x1f4] ss:$8 sps:$4 sm:$0xff]   ;;  %v1529_v11 = vld [vmem:[%s1860_s30 + $0xf0] ss:$8 sps:$4 sm:$0xff]  }
  0x6b   : > { %974 = vmatpush1.bf16.msra.mxu1 %v1469_v23  ;;  %v1530_v12 = vld [vmem:[%s1860_s30 + $0x1f0] ss:$8 sps:$4 sm:$0xff]  }
  0x6c   : > { %1015 = vmatpush1.bf16.msra.mxu0 %v1470_v24  ;;  %975 = vmatprep.subr.bf16.mxu1 %v1471_v25  ;;  %v555_v21 = vld [vmem:[#allocation2] sm:$0xff] }
  0x6d   : > { %1016 = vmatprep.subr.bf16.mxu0 %v1473_v26  ;;  %995 = vmatprep.mubr.bf16.mxu1 %v637_v60  ;;  %v1056_v26 = vld [vmem:[%s538_s10] sm:$0x3] (!%p1353_p1) }
  0x6e   : > { %1036 = vmatprep.mubr.bf16.mxu0 %v638_v62 }
  0x6f   : > { %976 = vmatpush1.bf16.msra.mxu1 %v1475_v27  ;;  %v1060_v27 = vsub.s32 (!%p1353_p1), 0, %v1902_v44 }
  0x70   : > { %1017 = vmatpush1.bf16.msra.mxu0 %v1476_v28  ;;  %977 = vmatprep.subr.bf16.mxu1 %v1477_v29  ;;  %v1064_v28 = vsub.s32 (!%p1353_p1), 1, %v1902_v44 }
  0x71   : > { %1018 = vmatprep.subr.bf16.mxu0 %v1479_v30  ;;  %v1061_v29 = vrot.slane (!%p1353_p1), %v1056_v26, %v1060_v27 }
  0x72   : > { %v1065_v30 = vrot.slane (!%p1353_p1), %v1056_v26, %v1064_v28 }
  0x73   : > { %978 = vmatpush1.bf16.msra.mxu1 %v1481_v31 }
  0x74   : > { %1019 = vmatpush1.bf16.msra.mxu0 %v1482_v32  ;;  %979 = vmatprep.subr.bf16.mxu1 %v1483_v33  ;;  %v1066_v32 = vcombine.low (!%p1353_p1), %v1061_v29, %v1065_v30 }
  0x75   : > { %1020 = vmatprep.subr.bf16.mxu0 %v1485_v34 }
  0x77   : > { %980 = vmatpush1.bf16.msra.mxu1 %v1487_v35 }
  0x78   : > { %1021 = vmatpush1.bf16.msra.mxu0 %v1488_v36  ;;  %981 = vmatprep.subr.bf16.mxu1 %v1489_v40 }
  0x79   : > { %1022 = vmatprep.subr.bf16.mxu0 %v1491_v41 }
  0x7b   : > { %982 = vmatpush1.bf16.msra.mxu1 %v1493_v42 }
  0x7c   : > { %1023 = vmatpush1.bf16.msra.mxu0 %v1494_v45  ;;  %983 = vmatprep.subr.bf16.mxu1 %v1495_v46 }
  0x7d   : > { %1024 = vmatprep.subr.bf16.mxu0 %v1497_v47 }
  0x7f   : > { %984 = vmatpush1.bf16.msra.mxu1 %v1499_v48 }
  0x80   : > { %1025 = vmatpush1.bf16.msra.mxu0 %v1500_v49  ;;  %985 = vmatprep.subr.bf16.mxu1 %v1501_v51 }
  0x81   : > { %1026 = vmatprep.subr.bf16.mxu0 %v1503_v52 }
  0x83   : > { %986 = vmatpush1.bf16.msra.mxu1 %v1505_v56 }
  0x84   : > { %1027 = vmatpush1.bf16.msra.mxu0 %v1506_v57  ;;  %987 = vmatprep.subr.bf16.mxu1 %v1507_v58 }
  0x85   : > { %1028 = vmatprep.subr.bf16.mxu0 %v1509_v59 }
  0x87   : > { %988 = vmatpush1.bf16.msra.mxu1 %v1511_v63 }
  0x88   : > { %1029 = vmatpush1.bf16.msra.mxu0 %v1512_v0  ;;  %989 = vmatprep.subr.bf16.mxu1 %v1513_v1 }
  0x89   : > { %1030 = vmatprep.subr.bf16.mxu0 %v1515_v2 }
  0x8b   : > { %990 = vmatpush1.bf16.msra.mxu1 %v1517_v3 }
  0x8c   : > { %1031 = vmatpush1.bf16.msra.mxu0 %v1518_v4  ;;  %991 = vmatprep.subr.bf16.mxu1 %v1519_v5 }
  0x8d   : > { %1032 = vmatprep.subr.bf16.mxu0 %v1521_v6 }
  0x8f   : > { %992 = vmatpush1.bf16.msra.mxu1 %v1523_v7 }
  0x90   : > { %1033 = vmatpush1.bf16.msra.mxu0 %v1524_v8  ;;  %993 = vmatprep.subr.bf16.mxu1 %v1525_v9 }
  0x91   : > { %1034 = vmatprep.subr.bf16.mxu0 %v1527_v10 }
  0x93   : > { %994 = vmatpush1.bf16.msra.mxu1 %v1529_v11 }
  0x94   : > { %1035 = vmatpush1.bf16.msra.mxu0 %v1530_v12 }
  0x96   : > { %996 = vmatmul.mubr.bf16.vlgmr.msra.gmra.mrb[0].mxu1 %v629_v54 }
  0x97   : > { %1037 = vmatmul.mubr.bf16.vlgmr.msra.gmra.mrb[0].mxu0 %v636_v61 }
 0x169   : > { %v997_v13 = vpop.f32.mrb[0].mxu1 }
 0x16a   : > { %v1038_v14 = vpop.f32.mrb[0].mxu0  ;;  %v999_v16 = vpop.f32.mrb[1].mxu1 }
 0x16b   : > { %v1039_v15 = vadd.f32 %v1038_v14, %v997_v13  ;;  %v1040_v17 = vpop.f32.mrb[1].mxu0  ;;  %v1001_v19 = vpop.f32.mrb[2].mxu1 }
 0x16c   : > { %v1041_v18 = vadd.f32 %v1040_v17, %v999_v16  ;;  %v1042_v20 = vpop.f32.mrb[2].mxu0  ;;  %v1002_v22 = vpop.f32.mrb[3].mxu1  ;;  %1054 = sbr.rel (%p1353_p1) target bundleno = 445 (0x1bd), region = 78 }
 0x16d   : > { %v1043_v23 = vpop.f32.mrb[3].mxu0 }
 0x16e   : > { %v1047_v24 = vcombine.low %v1039_v15, %v1041_v18 }
 0x170   : > { %v1049_v25 = vadd.f32 %v1047_v24, %v555_v21 }
 0x172   : > { %1050 = vst [vmem:[#allocation2] sm:$0xff] %v1049_v25 }
 0x179   : > { %v1055_v31 = vld [vmem:[#allocation2] sm:$0xff] }
 0x17a   : > { %v1068_v33 = vadd.f32 %v1066_v32, %v1055_v31 }
 0x17c   : > { %v1070_v34 = vcombine.high %v1068_v33, %v1068_v33  ;;  %v1073_v35 = vsel %vm1072_vm0, %v1068_v33, 0.0 }
 0x17d   : > { %v1074_v36 = vrot.slane %v1073_v35, 4 }
 0x17e   : > { %v1080_v37 = vsel %vm1072_vm0, %v1070_v34, 0.0 }
 0x17f   : > { %v1075_v38 = vadd.f32 %v1074_v36, %v1073_v35  ;;  %v1081_v39 = vrot.slane %v1080_v37, 4 }
 0x181   : > { %v1076_v40 = vrot.slane %v1075_v38, 2  ;;  %v1082_v41 = vadd.f32 %v1081_v39, %v1080_v37 }
 0x183   : > { %v1077_v42 = vadd.f32 %v1076_v40, %v1075_v38  ;;  %v1083_v43 = vrot.slane %v1082_v41, 2 }
 0x185   : > { %v1078_v45 = vrot.slane %v1077_v42, 1  ;;  %v1084_v44 = vadd.f32 %v1083_v43, %v1082_v41 }
 0x187   : > { %v1079_v46 = vadd.f32 %v1078_v45, %v1077_v42  ;;  %v1085_v47 = vrot.slane %v1084_v44, 1 }
 0x189   : > { %v1086_v48 = vadd.f32 %v1085_v47, %v1084_v44  ;;  %v1088_v49 = vmul.f32 0.25, %v1079_v46 }
 0x18b   : > { %v1089_v50 = vmul.f32 0.25, %v1086_v48 }
 0x18d   : > { %v1092_v51 = vcombine.low %v1088_v49, %v1089_v50 }
 0x18f   : > { %v1094_v52 = vsub.f32 %v1068_v33, %v1092_v51 }
 0x191   : > { %v1095_v53 = vmul.f32 %v1094_v52, %v1094_v52 }
 0x193   : > { %v1097_v54 = vcombine.high %v1095_v53, %v1095_v53  ;;  %v1099_v55 = vsel %vm1072_vm0, %v1095_v53, 0.0 }
 0x194   : > { %v1100_v56 = vrot.slane %v1099_v55, 4 }
 0x195   : > { %v1106_v57 = vsel %vm1072_vm0, %v1097_v54, 0.0 }
 0x196   : > { %v1101_v58 = vadd.f32 %v1100_v56, %v1099_v55  ;;  %v1107_v59 = vrot.slane %v1106_v57, 4 }
 0x198   : > { %v1102_v60 = vrot.slane %v1101_v58, 2  ;;  %v1108_v61 = vadd.f32 %v1107_v59, %v1106_v57 }
 0x19a   : > { %v1103_v62 = vadd.f32 %v1102_v60, %v1101_v58  ;;  %v1109_v63 = vrot.slane %v1108_v61, 2 }
 0x19c   : > { %v1104_v0 = vrot.slane %v1103_v62, 1  ;;  %v1110_v1 = vadd.f32 %v1109_v63, %v1108_v61 }
 0x19e   : > { %v1105_v2 = vadd.f32 %v1104_v0, %v1103_v62  ;;  %v1111_v3 = vrot.slane %v1110_v1, 1 }
 0x1a0   : > { %v1112_v4 = vadd.f32 %v1111_v3, %v1110_v1  ;;  %v1113_v5 = vmul.f32 0.25, %v1105_v2 }
 0x1a2   : > { %v1114_v6 = vmul.f32 0.25, %v1112_v4  ;;  %v1115_v7 = vadd.f32 1e-05, %v1113_v5 }
 0x1a4   : > { %v1116_v8 = vadd.f32 1e-05, %v1114_v6  ;;  %1532 = vrsqrt.f32 %v1115_v7 }
 0x1a6   : > { %1534 = vrsqrt.f32 %v1116_v8 }
 0x1ae   : > { %v1533_v9 = vpop.eup %1532 }
 0x1b0   : > { %v1535_v10 = vpop.eup %1534 }
 0x1b1   : > { %v1121_v11 = vcombine.low %v1533_v9, %v1535_v10 }
 0x1b3   : > { %v1123_v12 = vmul.f32 %v1121_v11, %v1094_v52 }
 0x1b5   : > { %vm1124_vm1 = vcmp.ge.f32.partialorder %v1123_v12, 0.0  ;;  %v1125_v13 = vmul.f32 0.2, %v1123_v12 }
 0x1b7   : > { %v1126_v14 = vsel %vm1124_vm1, %v1123_v12, %v1125_v13 }
 0x1b8   : > { %v1128_v15 = vcombine.high %v1126_v14, %v1126_v14 }
 0x1ba   : > { %v1354_v16 = vpack.c.bf16 %v1128_v15, %v1126_v14 }
 0x1bc   : > { %1355 = vst.sshfl [vmem:[%s1858_s27] sm:$0x33 pattern:$0x76325410] %v1354_v16 }
 0x1bd PF: > { %s13_s20 = sadd.s32 1, %s1606_s20   ;;  %s1975_s12 = smov %s1578_s13 }
 0x1be   : > { %p10_p2 = scmp.ge.s32.totalorder %s13_s20, 34   ;;  %s1976_s13 = smov %s1695_s28 }
 0x1bf   : > { %s1977_s14 = smov %s1594_s17  ;;  %s1978_s15 = smov %s1598_s18 }
 0x1c0   : > { %s1979_s16 = smov %s1602_s19  ;;  %s1980_s17 = smov %s1984_s21 }
 0x1c1   : > { %s1981_s18 = smov %s1988_s22  ;;  %s1982_s19 = smov %s1992_s23 }
 0x1c2   :  { %12 = sbr.rel (!%p10_p2) target bundleno = 5 (0x5), region = 119 }

// kernel: discriminator_resnet_forward.9
= control target key start
LH: loop header
LB: loop body
LE: loop exit
PB: predicated region body
PF: predicated region fallthrough
CT: control target
= control target key end

     0   :  { %s940_s12 = smov 0   ;;  %s942_s13 = smov 0   ;;  %s1023_s0 = inlined_call_operand.vmem [shape: bf16[8,8192], index: 0, kind: input, shape index: {}]   ;;  %s1024_s1 = inlined_call_operand.vmem [shape: bf16[8192,128], index: 1, kind: input, shape index: {}]   ;;  %s1025_s2 = inlined_call_operand.vmem [shape: f32[1,128], index: 2, kind: input, shape index: {}]   ;;  %s1026_s3 = inlined_call_operand.vmem [shape: f32[8,128], index: 3, kind: output, shape index: {}]  }
   0x1   :  { %s944_s14 = smov 0  }
   0x2 LB: > { %s25_s15 = sadd.s32 1, %s913_s13  ;;  %p743_p0 = scmp.ge.s32.totalorder %s917_s14, 1  ;;  %s917_s14 = sphi %s944_s14, %s13_s14   ;;  %s913_s13 = sphi %s942_s13, %s1028_s13   ;;  %s909_s12 = sphi %s940_s12, %s1027_s12  }
   0x3   : > { %p26_p1 = scmp.ge.s32.totalorder %s25_s15, 16  ;;  %p189_p2 = scmp.lt.s32.totalorder %s917_s14, 17 }
   0x5   : > { %s1030_s15 = smov (%p26_p1, %s25_s15), 0  ;;  %p190_p3 = pnand %p743_p0, %p189_p2 }
   0x6   : > { %s744_s16 = sshll.u32 (!%p190_p3), %s909_s12, 2  ;;  %s746_s17 = sshll.u32 (!%p190_p3), %s909_s12, 6 }
   0x7   : > { %193 = sbr.rel (%p190_p3) target bundleno = 289 (0x121), region = 32  ;;  %p233_p4 = scmp.lt.s32.totalorder (!%p190_p3), %s744_s16, 63 }
   0x8   : > { %p241_p5 = scmp.lt.s32.totalorder (!%p190_p3), %s746_s17, 1023  ;;  %p748_p6 = scmp.ne.s32.totalorder (!%p190_p3), %s909_s12, 0 }
   0xe   : > { %s1032_s16 = smov (!%p233_p4, %s744_s16), 63  ;;  %s1034_s17 = smov (!%p241_p5, %s746_s17), 1023 }
   0xf   : > { %s745_s18 = sshll.u32 %s1032_s16, 2  ;;  %s747_s22 = sshll.u32 %s1034_s17, 2  ;;  %v919_v0 = vmov (!%p748_p6), 0.0  }
  0x10   : > { %s965_s21 = scalar_lea.vmem %s1023_s0, %s745_s18  ;;  %s970_s25 = scalar_lea.vmem %s1024_s1, %s747_s22  ;;  %264 = vst [vmem:[#allocation2] sm:$0xff] (!%p748_p6), %v919_v0 }
  0x11   : > { %263 = sbr.rel (%p748_p6) target bundleno = 24 (0x18), region = 36 }
  0x18 PF: > { %v859_v1 = vld [vmem:[%s970_s25 + $0x40] sm:$0xff]   ;;  %v863_v5 = vld [vmem:[%s970_s25 + $0x48] sm:$0xff]   ;;  %v867_v9 = vld [vmem:[%s970_s25 + $0x50] sm:$0xff]   ;;  %p785_p7 = scmp.ne.s32.totalorder %s909_s12, 15 }
  0x19   : > { %v860_v2 = vld [vmem:[%s970_s25 + $0xc0] sm:$0xff]   ;;  %790 = vmatprep.subr.bf16.mxu0 %v859_v1  ;;  %v864_v6 = vld [vmem:[%s970_s25 + $0xc8] sm:$0xff]   ;;  %v868_v10 = vld [vmem:[%s970_s25 + $0xd0] sm:$0xff]  }
  0x1a   : > { %v861_v3 = vld [vmem:[%s970_s25] sm:$0xff]   ;;  %812 = vmatprep.subr.bf16.mxu1 %v860_v2  ;;  %v865_v7 = vld [vmem:[%s970_s25 + $0x8] sm:$0xff]   ;;  %v869_v11 = vld [vmem:[%s970_s25 + $0x10] sm:$0xff]  }
  0x1b   : > { %v862_v4 = vld [vmem:[%s970_s25 + $0x80] sm:$0xff]   ;;  %791 = vmatpush3.bf16.msra.mxu0 %v861_v3  ;;  %v866_v8 = vld [vmem:[%s970_s25 + $0x88] sm:$0xff]   ;;  %v870_v12 = vld [vmem:[%s970_s25 + $0x90] sm:$0xff]  }
  0x1c   : > { %813 = vmatpush3.bf16.msra.mxu1 %v862_v4  ;;  %792 = vmatprep.subr.bf16.mxu0 %v863_v5  ;;  %v871_v13 = vld [vmem:[%s970_s25 + $0x58] sm:$0xff]   ;;  %v875_v17 = vld [vmem:[%s970_s25 + $0x60] sm:$0xff]   ;;  %v879_v21 = vld [vmem:[%s970_s25 + $0x68] sm:$0xff]  }
  0x1d   : > { %814 = vmatprep.subr.bf16.mxu1 %v864_v6  ;;  %v872_v14 = vld [vmem:[%s970_s25 + $0xd8] sm:$0xff]   ;;  %v876_v18 = vld [vmem:[%s970_s25 + $0xe0] sm:$0xff]   ;;  %v880_v22 = vld [vmem:[%s970_s25 + $0xe8] sm:$0xff]  }
  0x1e   : > { %v873_v15 = vld [vmem:[%s970_s25 + $0x18] sm:$0xff]   ;;  %v877_v19 = vld [vmem:[%s970_s25 + $0x20] sm:$0xff]   ;;  %v881_v23 = vld [vmem:[%s970_s25 + $0x28] sm:$0xff]  }
  0x1f   : > { %793 = vmatpush3.bf16.msra.mxu0 %v865_v7  ;;  %v874_v16 = vld [vmem:[%s970_s25 + $0x98] sm:$0xff]   ;;  %v878_v20 = vld [vmem:[%s970_s25 + $0xa0] sm:$0xff]   ;;  %v882_v24 = vld [vmem:[%s970_s25 + $0xa8] sm:$0xff]  }
  0x20   : > { %815 = vmatpush3.bf16.msra.mxu1 %v866_v8  ;;  %794 = vmatprep.subr.bf16.mxu0 %v867_v9  ;;  %v883_v25 = vld [vmem:[%s970_s25 + $0x70] sm:$0xff]   ;;  %v887_v29 = vld [vmem:[%s970_s25 + $0x78] sm:$0xff]   ;;  %v266_v33 = vld [vmem:[%s965_s21] sm:$0xff] }
  0x21   : > { %816 = vmatprep.subr.bf16.mxu1 %v868_v10  ;;  %v884_v26 = vld [vmem:[%s970_s25 + $0xf0] sm:$0xff]   ;;  %v888_v30 = vld [vmem:[%s970_s25 + $0xf8] sm:$0xff]   ;;  %v267_v34 = vld [vmem:[%s965_s21 + $0x8] sm:$0xff]  ;;  %v749_v35 = vcombine.low %v266_v33, %v266_v33  ;;  %v750_v36 = vcombine.high %v266_v33, %v266_v33 }
  0x22   : > { %v885_v27 = vld [vmem:[%s970_s25 + $0x30] sm:$0xff]   ;;  %v889_v31 = vld [vmem:[%s970_s25 + $0x38] sm:$0xff]   ;;  %v751_v37 = vcombine.low %v267_v34, %v267_v34  ;;  %v752_v38 = vcombine.high %v267_v34, %v267_v34  ;;  %v265_v47 = vld [vmem:[#allocation2] sm:$0xff] }
  0x23   : > { %795 = vmatpush3.bf16.msra.mxu0 %v869_v11  ;;  %v886_v28 = vld [vmem:[%s970_s25 + $0xb0] sm:$0xff]   ;;  %v890_v32 = vld [vmem:[%s970_s25 + $0xb8] sm:$0xff]   ;;  %570 = vmatprep.mubr.bf16.mxu0 %v750_v36  ;;  %v786_v53 = vld [vmem:[%s1025_s2] ss:$0 sm:$0xff] (!%p785_p7) }
  0x24   : > { %817 = vmatpush3.bf16.msra.mxu1 %v870_v12  ;;  %796 = vmatprep.subr.bf16.mxu0 %v871_v13 }
  0x25   : > { %818 = vmatprep.subr.bf16.mxu1 %v872_v14  ;;  %610 = vmatprep.mubr.bf16.mxu1 %v752_v38 }
  0x27   : > { %797 = vmatpush3.bf16.msra.mxu0 %v873_v15 }
  0x28   : > { %819 = vmatpush3.bf16.msra.mxu1 %v874_v16  ;;  %798 = vmatprep.subr.bf16.mxu0 %v875_v17 }
  0x29   : > { %820 = vmatprep.subr.bf16.mxu1 %v876_v18 }
  0x2b   : > { %799 = vmatpush3.bf16.msra.mxu0 %v877_v19 }
  0x2c   : > { %821 = vmatpush3.bf16.msra.mxu1 %v878_v20  ;;  %800 = vmatprep.subr.bf16.mxu0 %v879_v21 }
  0x2d   : > { %822 = vmatprep.subr.bf16.mxu1 %v880_v22 }
  0x2f   : > { %801 = vmatpush3.bf16.msra.mxu0 %v881_v23 }
  0x30   : > { %823 = vmatpush3.bf16.msra.mxu1 %v882_v24  ;;  %802 = vmatprep.subr.bf16.mxu0 %v883_v25 }
  0x31   : > { %824 = vmatprep.subr.bf16.mxu1 %v884_v26 }
  0x33   : > { %803 = vmatpush3.bf16.msra.mxu0 %v885_v27 }
  0x34   : > { %825 = vmatpush3.bf16.msra.mxu1 %v886_v28  ;;  %804 = vmatprep.subr.bf16.mxu0 %v887_v29 }
  0x35   : > { %826 = vmatprep.subr.bf16.mxu1 %v888_v30 }
  0x37   : > { %805 = vmatpush3.bf16.msra.mxu0 %v889_v31 }
  0x38   : > { %827 = vmatpush3.bf16.msra.mxu1 %v890_v32 }
  0x3a   : > { %571 = vmatmul.mubr.bf16.vlgmr.msra.gmra.mrb[0].mxu0 %v749_v35 }
  0x3b   : > { %611 = vmatmul.mubr.bf16.vlgmr.msra.gmra.mrb[0].mxu1 %v751_v37 }
 0x10d   : > { %v806_v39 = vpop.f32.mrb[0].mxu0 }
 0x10e   : > { %v828_v40 = vpop.f32.mrb[0].mxu1  ;;  %v807_v41 = vpop.f32.mrb[1].mxu0 }
 0x10f   : > { %v829_v42 = vpop.f32.mrb[1].mxu1  ;;  %v808_v43 = vadd.f32 %v807_v41, %v806_v39  ;;  %v809_v45 = vpop.f32.mrb[2].mxu0 }
 0x110   : > { %v830_v44 = vadd.f32 %v829_v42, %v828_v40  ;;  %v831_v46 = vpop.f32.mrb[2].mxu1  ;;  %v810_v48 = vpop.f32.mrb[3].mxu0  ;;  %623 = sbr.rel (%p785_p7) target bundleno = 289 (0x121), region = 40 }
 0x111   : > { %v832_v49 = vpop.f32.mrb[3].mxu1 }
 0x112   : > { %v613_v50 = vadd.f32 %v830_v44, %v808_v43 }
 0x114   : > { %v618_v51 = vadd.f32 %v613_v50, %v265_v47 }
 0x116   : > { %619 = vst [vmem:[#allocation2] sm:$0xff] %v618_v51 }
 0x11d   : > { %v624_v52 = vld [vmem:[#allocation2] sm:$0xff] }
 0x11e   : > { %v632_v54 = vadd.f32 %v786_v53, %v624_v52 }
 0x120   : > { %633 = vst [vmem:[%s1026_s3] sm:$0xff] %v632_v54 }
 0x121 PF: > { %s13_s14 = sadd.s32 1, %s917_s14   ;;  %s1027_s12 = smov %s913_s13 }
 0x122   : > { %p10_p8 = scmp.ge.s32.totalorder %s13_s14, 18   ;;  %s1028_s13 = smov %s1030_s15 }
 0x124   :  { %12 = sbr.rel (!%p10_p8) target bundleno = 2 (0x2), region = 76 }

</bundles_post_ra>
